<compile_context>
chip_gen: v6e
topology: v6e:2x2x1
jax: 0.10.0
libtpu: 0.0.40
codegen_flags: <defaults>
</compile_context>

<pallas_src>
import functools

import numpy as np
import jax
import jax.numpy as jnp
from jax import lax
from jax.experimental import pallas as pl
from jax.experimental.pallas import tpu as pltpu

# ----------------------------- model dimensions ------------------------------
NODE_FEAT = 8      # raw node feature dim
EDGE_FEAT = 4      # raw edge feature dim
D = 32             # node_state_dim
EDGE_ENC = 16      # encoder edge hidden size
MSG_H = 2 * D      # message net hidden / output size (= 64)
AGG_D = 32         # aggregator graph_state_dim
AGG_OUT = 32       # aggregator graph_transform size
N_PROP_LAYERS = 3


# ------------------------------- fused kernel --------------------------------
def _gmn_pair_kernel(nf_ref, ef_ref, fidx_ref, tidx_ref, lgc_ref, lgr_ref,
                     enc_wn_ref, enc_bn_ref, enc_we_ref, enc_be_ref,
                     msg_w1_ref, msg_we_ref, msg_b1_ref, msg_w2_ref, msg_b2_ref,
                     gru_wi_ref, gru_whh_ref, gru_bi_ref, gru_bh_ref,
                     agg_w1_ref, agg_b1_ref, agg_w2_ref, agg_b2_ref,
                     out_ref, *, n_prop_layers):
    """One graph PAIR per grid step: encoder -> n prop layers -> aggregator -> hinge."""
    f32 = jnp.float32

    nf = nf_ref[0]          # (MAX_N, NODE_FEAT)   zero-padded
    ef = ef_ref[0]          # (MAX_E, EDGE_FEAT)   zero-padded
    fidx = fidx_ref[0]      # (MAX_E, 1) int32     pair-local from idx, pad = -1
    tidx = tidx_ref[0]      # (MAX_E, 1) int32     pair-local to   idx, pad = -1
    lg_col = lgc_ref[0]     # (MAX_N, 1) int32     local graph id in pair {0,1}, pad = -1
    lg_row = lgr_ref[0]     # (1, MAX_N) int32     same, pre-transposed in the wrapper

    max_n = nf.shape[0]
    max_e = ef.shape[0]

    # ------------------------------ encoder (once) ------------------------------
    h = jnp.dot(nf, enc_wn_ref[...], preferred_element_type=f32) + enc_bn_ref[...]       # (N, D)
    e_enc = jnp.dot(ef, enc_we_ref[...], preferred_element_type=f32) + enc_be_ref[...]   # (E, 16)

    # -------- static per-pair structure (integer compares; no NxN matmuls) --------
    col_n = lax.broadcasted_iota(jnp.int32, (max_e, max_n), 1)
    from_oh = (col_n == fidx).astype(f32)          # (E, N); padded edges -> all-zero rows
    to_oh = (col_n == tidx).astype(f32)            # (E, N)
    # node j attended by node i iff different graph of the same pair and both valid:
    # lg in {0,1} for valid, -1 for pad  =>  lg_i + lg_j == 1  exactly for cross-graph pairs.
    attn_mask = (lg_col + lg_row) == 1             # (N, N) bool
    col_g = lax.broadcasted_iota(jnp.int32, (max_n, 2), 1)
    graph_oh = (col_g == lg_col).astype(f32)       # (N, 2); padded nodes -> zero rows

    # loop-invariant edge projection (first message layer e-term + bias), hoisted
    e_proj = jnp.dot(e_enc, msg_we_ref[...], preferred_element_type=f32) + msg_b1_ref[...]  # (E,128)

    # weights loaded once, live across all (shared-parameter) prop layers
    msg_w1 = msg_w1_ref[...]     # (2D, 2*MSG_H)  rows = [from ; to], cols = [fwd | rev]
    msg_w2 = msg_w2_ref[...]     # (2*MSG_H, 2*MSG_H) block-diagonal
    msg_b2 = msg_b2_ref[...]
    gru_wi = gru_wi_ref[...]     # (MSG_H + D, 3D) rows = [messages ; attention], cols = [r|z|n]
    gru_whh = gru_whh_ref[...]   # (D, 3D)
    gru_bi = gru_bi_ref[...]
    gru_bh = gru_bh_ref[...]

    # ------------------------- propagation layers (shared params) -------------------------
    for _ in range(n_prop_layers):    # static trip count: fully unrolled for the scheduler
        # --- message nets: gather endpoints, one fused (E,64)x(64,128) first layer ---
        fs = jnp.dot(from_oh, h, preferred_element_type=f32)      # h[from_idx]  (E, D)
        ts = jnp.dot(to_oh, h, preferred_element_type=f32)        # h[to_idx]    (E, D)
        x_ft = jnp.concatenate([fs, ts], axis=1)                  # (E, 2D)
        h1 = jnp.maximum(jnp.dot(x_ft, msg_w1, preferred_element_type=f32) + e_proj, 0.0)
        m = jnp.dot(h1, msg_w2, preferred_element_type=f32) + msg_b2   # (E, 128) = [fwd | rev]
        # scatter-add: forward messages onto to_idx, reverse messages onto from_idx
        agg = (lax.dot_general(to_oh, m[:, :MSG_H], (((0,), (0,)), ((), ())),
                               preferred_element_type=f32)
               + lax.dot_general(from_oh, m[:, MSG_H:], (((0,), (0,)), ((), ())),
                                 preferred_element_type=f32))          # (N, MSG_H)

        # --- cross-graph attention (dot-product similarity, masked softmax) ---
        sim = lax.dot_general(h, h, (((1,), (1,)), ((), ())),
                              preferred_element_type=f32)              # (N, N)
        s = jnp.where(attn_mask, sim, f32(-1e30))
        p = jnp.exp(s - jnp.max(s, axis=-1, keepdims=True))
        p = p / jnp.sum(p, axis=-1, keepdims=True)                     # exact divide
        a_in = h - jnp.dot(p, h, preferred_element_type=f32)           # node_states - attention

        # --- GRU node update: fused input matmul, gate columns stacked [r | z | n] ---
        x_gru = jnp.concatenate([agg, a_in], axis=1)                   # (N, MSG_H + D)
        gi = jnp.dot(x_gru, gru_wi, preferred_element_type=f32) + gru_bi   # (N, 3D)
        gh = jnp.dot(h, gru_whh, preferred_element_type=f32) + gru_bh      # (N, 3D)
        r = jax.nn.sigmoid(gi[:, :D] + gh[:, :D])
        z = jax.nn.sigmoid(gi[:, D:2 * D] + gh[:, D:2 * D])
        n = jnp.tanh(gi[:, 2 * D:] + r * gh[:, 2 * D:])
        h = (1.0 - z) * n + z * h

    # ------------------------- gated aggregator + hinge score -------------------------
    y1 = jnp.dot(h, agg_w1_ref[...], preferred_element_type=f32) + agg_b1_ref[...]   # (N, 2*AGG_D)
    gates = jax.nn.sigmoid(y1[:, :AGG_D])
    vals = y1[:, AGG_D:] * gates
    gs = lax.dot_general(graph_oh, vals, (((0,), (0,)), ((), ())),
                         preferred_element_type=f32)                  # (2, AGG_D) segment-sum
    gv = jnp.dot(gs, agg_w2_ref[...], preferred_element_type=f32) + agg_b2_ref[...]  # (2, AGG_OUT)

    # diff = gv[graph 0] - gv[graph 1] via a +1/-1 selection column + sublane reduce
    row_g = lax.broadcasted_iota(jnp.int32, (2, 1), 0)
    sel = (row_g == 0).astype(f32) - (row_g == 1).astype(f32)          # [[1], [-1]]
    diff = jnp.sum(sel * gv, axis=0, keepdims=True)                    # (1, AGG_OUT)
    out_ref[0] = jnp.maximum(diff, 0.0)     # relu'd diff; wrapper does -sum over lanes


# ------------------------------ parameter init --------------------------------
def init_params(key):
    keys = iter(jax.random.split(key, 32))

    def w(shape, scale=0.1):
        return (scale * jax.random.normal(next(keys), shape)).astype(jnp.float32)

    def b(shape):
        return jnp.zeros(shape, jnp.float32)

    p = {}
    # encoder
    p['enc_wn'] = w((NODE_FEAT, D)); p['enc_bn'] = b((1, D))
    p['enc_we'] = w((EDGE_FEAT, EDGE_ENC)); p['enc_be'] = b((1, EDGE_ENC))
    # message nets (forward / reverse with separate params); first Linear split by input chunk
    for name in ('msg', 'rmsg'):
        p[name] = dict(
            w1f=w((D, MSG_H)), w1t=w((D, MSG_H)), w1e=w((EDGE_ENC, MSG_H)), b1=b((1, MSG_H)),
            w2=w((MSG_H, MSG_H)), b2=b((1, MSG_H)))
    # GRU node update; gates [r, z, n], input = [messages(2D), attention(D)]
    p['gru'] = dict(
        wim=w((3, MSG_H, D)), wia=w((3, D, D)), whh=w((3, D, D)),
        bi=b((3, 1, D)), bh=b((3, 1, D)))
    # gated aggregator (MLP1 Linear(D, 2*AGG_D) split into gate / value halves)
    p['agg'] = dict(
        w1g=w((D, AGG_D)), b1g=b((1, AGG_D)),
        w1v=w((D, AGG_D)), b1v=b((1, AGG_D)),
        w2=w((AGG_D, AGG_OUT)), b2=b((1, AGG_OUT)))
    return p


def pack_params(p):
    """Stack module params into MXU-friendly fused weight tensors."""
    zeros = jnp.zeros((MSG_H, MSG_H), jnp.float32)
    # message first layer, columns [0:64] = forward direction, [64:128] = reverse:
    #   forward : relu(h_from @ w1f + h_to @ w1t + e @ w1e + b1)
    #   reverse : relu(h_to @ rw1f + h_from @ rw1t + e @ rw1e + rb1)
    msg_wf = jnp.concatenate([p['msg']['w1f'], p['rmsg']['w1t']], axis=1)   # acts on h_from
    msg_wt = jnp.concatenate([p['msg']['w1t'], p['rmsg']['w1f']], axis=1)   # acts on h_to
    gru_wim = jnp.concatenate([p['gru']['wim'][g] for g in range(3)], axis=1)  # (2D, 3D)
    gru_wia = jnp.concatenate([p['gru']['wia'][g] for g in range(3)], axis=1)  # (D, 3D)
    return {
        'enc_wn': p['enc_wn'], 'enc_bn': p['enc_bn'],
        'enc_we': p['enc_we'], 'enc_be': p['enc_be'],
        # fused first layer: x = [h_from | h_to] (E, 2D)  @  (2D, 128)
        'msg_w1': jnp.concatenate([msg_wf, msg_wt], axis=0),
        'msg_we': jnp.concatenate([p['msg']['w1e'], p['rmsg']['w1e']], axis=1),
        'msg_b1': jnp.concatenate([p['msg']['b1'], p['rmsg']['b1']], axis=1),
        # second layer block-diagonal so one (E,128)x(128,128) matmul does both directions
        'msg_w2': jnp.block([[p['msg']['w2'], zeros], [zeros, p['rmsg']['w2']]]),
        'msg_b2': jnp.concatenate([p['msg']['b2'], p['rmsg']['b2']], axis=1),
        # fused GRU input: x = [messages | attention_input] (N, 3D) @ (3D, 3D), cols [r|z|n]
        'gru_wi': jnp.concatenate([gru_wim, gru_wia], axis=0),
        'gru_whh': jnp.concatenate([p['gru']['whh'][g] for g in range(3)], axis=1),
        'gru_bi': jnp.concatenate([p['gru']['bi'][g] for g in range(3)], axis=1),
        'gru_bh': jnp.concatenate([p['gru']['bh'][g] for g in range(3)], axis=1),
        # gated aggregator MLP1: [gate | value] halves
        'agg_w1': jnp.concatenate([p['agg']['w1g'], p['agg']['w1v']], axis=1),
        'agg_b1': jnp.concatenate([p['agg']['b1g'], p['agg']['b1v']], axis=1),
        'agg_w2': p['agg']['w2'], 'agg_b2': p['agg']['b2'],
    }


# ---------------------- host-side per-pair batch packing ----------------------
def build_pair_batch(node_features, edge_features, from_idx, to_idx, graph_idx, sizes):
    """Repack the flat GMN batch into per-pair zero-padded slabs (numpy, host-side)."""
    node_features = np.asarray(node_features, np.float32)
    edge_features = np.asarray(edge_features, np.float32)
    from_idx = np.asarray(from_idx, np.int64)
    to_idx = np.asarray(to_idx, np.int64)
    graph_idx = np.asarray(graph_idx, np.int64)
    sizes = [int(s) for s in sizes]
    n_graphs = len(sizes)
    assert n_graphs % 2 == 0, "graphs come in (query, corpus) pairs"
    n_pairs = n_graphs // 2

    node_off = np.concatenate([[0], np.cumsum(sizes)])
    pair_node_start = node_off[0::2][:n_pairs]
    pair_node_count = [sizes[2 * p] + sizes[2 * p + 1] for p in range(n_pairs)]

    edge_pair = graph_idx[from_idx] // 2
    pair_edge_count = [int(np.sum(edge_pair == p)) for p in range(n_pairs)]

    def _round8(x):
        return int(-(-x // 8) * 8)

    max_n = _round8(max(pair_node_count))
    max_e = _round8(max(pair_edge_count))

    nf_p = np.zeros((n_pairs, max_n, node_features.shape[1]), np.float32)
    ef_p = np.zeros((n_pairs, max_e, edge_features.shape[1]), np.float32)
    fidx_p = np.full((n_pairs, max_e, 1), -1, np.int32)
    tidx_p = np.full((n_pairs, max_e, 1), -1, np.int32)
    lg_p = np.full((n_pairs, max_n, 1), -1, np.int32)

    for p in range(n_pairs):
        ns = int(pair_node_start[p]); nc = pair_node_count[p]
        nf_p[p, :nc] = node_features[ns:ns + nc]
        lg_p[p, :nc, 0] = graph_idx[ns:ns + nc] - 2 * p           # local graph id 0 / 1
        esel = np.nonzero(edge_pair == p)[0]
        ec = len(esel)
        ef_p[p, :ec] = edge_features[esel]
        fidx_p[p, :ec, 0] = from_idx[esel] - ns                    # pair-local indices
        tidx_p[p, :ec, 0] = to_idx[esel] - ns

    lgr_p = np.transpose(lg_p, (0, 2, 1)).copy()                   # (P, 1, MAX_N)
    return (jnp.asarray(nf_p), jnp.asarray(ef_p), jnp.asarray(fidx_p),
            jnp.asarray(tidx_p), jnp.asarray(lg_p), jnp.asarray(lgr_p))


def _cost_numbers(n_pairs, max_n, max_e, n_prop_layers):
    per_layer = (
        2 * 2 * max_e * max_n * D                      # one-hot endpoint gathers
        + 2 * max_e * (2 * D) * (2 * MSG_H)            # fused message layer 1
        + 2 * max_e * (2 * MSG_H) * (2 * MSG_H)        # block-diag message layer 2
        + 2 * 2 * max_e * max_n * MSG_H                # one-hot scatters
        + 2 * 2 * max_n * max_n * D                    # similarity + attention-weighted sum
        + 2 * max_n * (MSG_H + D) * (3 * D)            # fused GRU input matmul
        + 2 * max_n * D * (3 * D))                     # GRU hidden matmul
    enc = 2 * max_n * NODE_FEAT * D + 2 * max_e * EDGE_FEAT * EDGE_ENC
    aggr = 2 * max_n * D * (2 * AGG_D) + 2 * 2 * AGG_D * AGG_OUT
    flops = n_pairs * (enc + n_prop_layers * per_layer + aggr)
    transcend = n_pairs * n_prop_layers * (max_n * max_n + 3 * max_n * D)
    return int(flops), int(transcend)


# --------------------------------- forward ------------------------------------
@functools.partial(jax.jit, static_argnames=("n_prop_layers",))
def gmn_match_hinge_forward(packed, nf_p, ef_p, fidx_p, tidx_p, lgc_p, lgr_p, *,
                            n_prop_layers):
    n_pairs, max_n, _ = nf_p.shape
    max_e = ef_p.shape[1]

    weight_names = ['enc_wn', 'enc_bn', 'enc_we', 'enc_be',
                    'msg_w1', 'msg_we', 'msg_b1', 'msg_w2', 'msg_b2',
                    'gru_wi', 'gru_whh', 'gru_bi', 'gru_bh',
                    'agg_w1', 'agg_b1', 'agg_w2', 'agg_b2']
    weights = [packed[k] for k in weight_names]

    # one-pair-per-step BlockSpecs: last two dims are the full (padded) per-pair extents
    pair_specs = [
        pl.BlockSpec((1, max_n, NODE_FEAT), lambda p: (p, 0, 0)),
        pl.BlockSpec((1, max_e, EDGE_FEAT), lambda p: (p, 0, 0)),
        pl.BlockSpec((1, max_e, 1), lambda p: (p, 0, 0)),
        pl.BlockSpec((1, max_e, 1), lambda p: (p, 0, 0)),
        pl.BlockSpec((1, max_n, 1), lambda p: (p, 0, 0)),
        pl.BlockSpec((1, 1, max_n), lambda p: (p, 0, 0)),
    ]
    # weights: constant block index -> DMA'd once, resident across grid steps (all 2-D)
    weight_specs = [pl.BlockSpec(w.shape, lambda p: (0, 0)) for w in weights]

    flops, transcend = _cost_numbers(n_pairs, max_n, max_e, n_prop_layers)
    bytes_accessed = int(
        sum(x.size * x.dtype.itemsize for x in (nf_p, ef_p, fidx_p, tidx_p, lgc_p, lgr_p))
        + sum(w.size * w.dtype.itemsize for w in weights)
        + n_pairs * AGG_OUT * 4)

    kernel = functools.partial(_gmn_pair_kernel, n_prop_layers=n_prop_layers)
    hinge = pl.pallas_call(
        kernel,
        grid=(n_pairs,),
        in_specs=pair_specs + weight_specs,
        out_specs=pl.BlockSpec((1, 1, AGG_OUT), lambda p: (p, 0, 0)),
        out_shape=jax.ShapeDtypeStruct((n_pairs, 1, AGG_OUT), jnp.float32),
        compiler_params=pltpu.CompilerParams(
            dimension_semantics=("parallel",),        # v7x megacore: pairs across both TCs
            vmem_limit_bytes=48 * 1024 * 1024),       # explicit scoped-VMEM budget, all chips
        cost_estimate=pl.CostEstimate(
            flops=flops, transcendentals=transcend, bytes_accessed=bytes_accessed),
    )(nf_p, ef_p, fidx_p, tidx_p, lgc_p, lgr_p, *weights)

    # lane-reduce of the relu'd per-pair diff happens here (kept out of the kernel store)
    return -jnp.sum(hinge[:, 0, :], axis=-1)


# ----------------------------------- main --------------------------------------
if __name__ == "__main__":
    key = jax.random.PRNGKey(0)
    k_nodes, k_edges, k_params = jax.random.split(key, 3)

    # 2 graph pairs -> 4 graphs (n_graphs = 2 * len(batch_data_sizes))
    sizes = [5, 6, 7, 8]
    n_graphs = len(sizes)
    graph_idx = np.concatenate(
        [np.full((s,), g, np.int64) for g, s in enumerate(sizes)])
    n_nodes = int(sum(sizes))

    # deterministic edges: two rings per graph
    from_list, to_list = [], []
    offset = 0
    for s in sizes:
        for j in range(s):
            from_list.append(offset + j); to_list.append(offset + (j + 1) % s)
            from_list.append(offset + j); to_list.append(offset + (j + 2) % s)
        offset += s
    from_idx = np.array(from_list, np.int64)
    to_idx = np.array(to_list, np.int64)
    n_edges = int(from_idx.shape[0])

    node_features = jax.random.normal(k_nodes, (n_nodes, NODE_FEAT), jnp.float32)
    edge_features = jax.random.normal(k_edges, (n_edges, EDGE_FEAT), jnp.float32)

    params = init_params(k_params)
    packed = pack_params(params)

    pair_batch = build_pair_batch(node_features, edge_features, from_idx, to_idx,
                                  graph_idx, sizes)

    scores = gmn_match_hinge_forward(packed, *pair_batch, n_prop_layers=N_PROP_LAYERS)
    scores = jax.block_until_ready(scores)
    assert scores.shape == (n_graphs // 2,)
    assert bool(jnp.all(jnp.isfinite(scores)))
    print("KERNEL_OK")
</pallas_src>

<mosaic_0001>
module attributes {stable_mosaic.version = 11 : i64} {
  func.func @_gmn_pair_kernel(%arg0: i32, %arg1: memref<1x16x8xf32, #tpu.memory_space<vmem>>, %arg2: memref<1x32x4xf32, #tpu.memory_space<vmem>>, %arg3: memref<1x32x1xi32, #tpu.memory_space<vmem>>, %arg4: memref<1x32x1xi32, #tpu.memory_space<vmem>>, %arg5: memref<1x16x1xi32, #tpu.memory_space<vmem>>, %arg6: memref<1x1x16xi32, #tpu.memory_space<vmem>>, %arg7: memref<8x32xf32, #tpu.memory_space<vmem>>, %arg8: memref<1x32xf32, #tpu.memory_space<vmem>>, %arg9: memref<4x16xf32, #tpu.memory_space<vmem>>, %arg10: memref<1x16xf32, #tpu.memory_space<vmem>>, %arg11: memref<64x128xf32, #tpu.memory_space<vmem>>, %arg12: memref<16x128xf32, #tpu.memory_space<vmem>>, %arg13: memref<1x128xf32, #tpu.memory_space<vmem>>, %arg14: memref<128x128xf32, #tpu.memory_space<vmem>>, %arg15: memref<1x128xf32, #tpu.memory_space<vmem>>, %arg16: memref<96x96xf32, #tpu.memory_space<vmem>>, %arg17: memref<32x96xf32, #tpu.memory_space<vmem>>, %arg18: memref<1x96xf32, #tpu.memory_space<vmem>>, %arg19: memref<1x96xf32, #tpu.memory_space<vmem>>, %arg20: memref<32x64xf32, #tpu.memory_space<vmem>>, %arg21: memref<1x64xf32, #tpu.memory_space<vmem>>, %arg22: memref<32x32xf32, #tpu.memory_space<vmem>>, %arg23: memref<1x32xf32, #tpu.memory_space<vmem>>, %arg24: memref<1x1x32xf32, #tpu.memory_space<vmem>>) attributes {dimension_semantics = [#tpu.dimension_semantics<parallel>], iteration_bounds = array<i64: 2>, scalar_prefetch = 0 : i64, scratch_operands = 0 : i64, tpu.core_type = #tpu.core_type<tc>, window_params = [{transform_indices = @transform_0, window_bounds = array<i64: 1, 16, 8>}, {transform_indices = @transform_1, window_bounds = array<i64: 1, 32, 4>}, {transform_indices = @transform_2, window_bounds = array<i64: 1, 32, 1>}, {transform_indices = @transform_3, window_bounds = array<i64: 1, 32, 1>}, {transform_indices = @transform_4, window_bounds = array<i64: 1, 16, 1>}, {transform_indices = @transform_5, window_bounds = array<i64: 1, 1, 16>}, {pipeline_mode = #tpu.pipeline_mode<synchronous>, transform_indices = @transform_6, window_bounds = array<i64: 8, 32>}, {pipeline_mode = #tpu.pipeline_mode<synchronous>, transform_indices = @transform_7, window_bounds = array<i64: 1, 32>}, {pipeline_mode = #tpu.pipeline_mode<synchronous>, transform_indices = @transform_8, window_bounds = array<i64: 4, 16>}, {pipeline_mode = #tpu.pipeline_mode<synchronous>, transform_indices = @transform_9, window_bounds = array<i64: 1, 16>}, {pipeline_mode = #tpu.pipeline_mode<synchronous>, transform_indices = @transform_10, window_bounds = array<i64: 64, 128>}, {pipeline_mode = #tpu.pipeline_mode<synchronous>, transform_indices = @transform_11, window_bounds = array<i64: 16, 128>}, {pipeline_mode = #tpu.pipeline_mode<synchronous>, transform_indices = @transform_12, window_bounds = array<i64: 1, 128>}, {pipeline_mode = #tpu.pipeline_mode<synchronous>, transform_indices = @transform_13, window_bounds = array<i64: 128, 128>}, {pipeline_mode = #tpu.pipeline_mode<synchronous>, transform_indices = @transform_14, window_bounds = array<i64: 1, 128>}, {pipeline_mode = #tpu.pipeline_mode<synchronous>, transform_indices = @transform_15, window_bounds = array<i64: 96, 96>}, {pipeline_mode = #tpu.pipeline_mode<synchronous>, transform_indices = @transform_16, window_bounds = array<i64: 32, 96>}, {pipeline_mode = #tpu.pipeline_mode<synchronous>, transform_indices = @transform_17, window_bounds = array<i64: 1, 96>}, {pipeline_mode = #tpu.pipeline_mode<synchronous>, transform_indices = @transform_18, window_bounds = array<i64: 1, 96>}, {pipeline_mode = #tpu.pipeline_mode<synchronous>, transform_indices = @transform_19, window_bounds = array<i64: 32, 64>}, {pipeline_mode = #tpu.pipeline_mode<synchronous>, transform_indices = @transform_20, window_bounds = array<i64: 1, 64>}, {pipeline_mode = #tpu.pipeline_mode<synchronous>, transform_indices = @transform_21, window_bounds = array<i64: 32, 32>}, {pipeline_mode = #tpu.pipeline_mode<synchronous>, transform_indices = @transform_22, window_bounds = array<i64: 1, 32>}, {transform_indices = @transform_23, window_bounds = array<i64: 1, 1, 32>}]} {
    %c0 = arith.constant 0 : index
    %c0_0 = arith.constant 0 : index
    %c0_1 = arith.constant 0 : index
    %0 = vector.load %arg1[%c0, %c0_0, %c0_1] : memref<1x16x8xf32, #tpu.memory_space<vmem>>, vector<1x16x8xf32>
    %1 = vector.shape_cast %0 : vector<1x16x8xf32> to vector<16x8xf32>
    %c0_2 = arith.constant 0 : index
    %c0_3 = arith.constant 0 : index
    %c0_4 = arith.constant 0 : index
    %2 = vector.load %arg2[%c0_2, %c0_3, %c0_4] : memref<1x32x4xf32, #tpu.memory_space<vmem>>, vector<1x32x4xf32>
    %3 = vector.shape_cast %2 : vector<1x32x4xf32> to vector<32x4xf32>
    %c0_5 = arith.constant 0 : index
    %c0_6 = arith.constant 0 : index
    %c0_7 = arith.constant 0 : index
    %4 = vector.load %arg3[%c0_5, %c0_6, %c0_7] : memref<1x32x1xi32, #tpu.memory_space<vmem>>, vector<1x32x1xi32>
    %5 = vector.shape_cast %4 : vector<1x32x1xi32> to vector<32x1xi32>
    %c0_8 = arith.constant 0 : index
    %c0_9 = arith.constant 0 : index
    %c0_10 = arith.constant 0 : index
    %6 = vector.load %arg4[%c0_8, %c0_9, %c0_10] : memref<1x32x1xi32, #tpu.memory_space<vmem>>, vector<1x32x1xi32>
    %7 = vector.shape_cast %6 : vector<1x32x1xi32> to vector<32x1xi32>
    %c0_11 = arith.constant 0 : index
    %c0_12 = arith.constant 0 : index
    %c0_13 = arith.constant 0 : index
    %8 = vector.load %arg5[%c0_11, %c0_12, %c0_13] : memref<1x16x1xi32, #tpu.memory_space<vmem>>, vector<1x16x1xi32>
    %9 = vector.shape_cast %8 : vector<1x16x1xi32> to vector<16x1xi32>
    %c0_14 = arith.constant 0 : index
    %c0_15 = arith.constant 0 : index
    %c0_16 = arith.constant 0 : index
    %10 = vector.load %arg6[%c0_14, %c0_15, %c0_16] : memref<1x1x16xi32, #tpu.memory_space<vmem>>, vector<1x1x16xi32>
    %11 = vector.shape_cast %10 : vector<1x1x16xi32> to vector<1x16xi32>
    %c0_17 = arith.constant 0 : index
    %c0_18 = arith.constant 0 : index
    %12 = vector.load %arg7[%c0_17, %c0_18] : memref<8x32xf32, #tpu.memory_space<vmem>>, vector<8x32xf32>
    %cst = arith.constant dense<0.000000e+00> : vector<16x32xf32>
    %13 = tpu.matmul %1, %12, %cst {dimension_numbers = #tpu.dot_dimension_numbers<[1], [0], [0], [1], [0, 0, 1, 1], [], []>} : vector<16x8xf32>, vector<8x32xf32>, vector<16x32xf32> -> vector<16x32xf32>
    %c0_19 = arith.constant 0 : index
    %c0_20 = arith.constant 0 : index
    %14 = vector.load %arg8[%c0_19, %c0_20] : memref<1x32xf32, #tpu.memory_space<vmem>>, vector<1x32xf32>
    %15 = vector.broadcast %14 : vector<1x32xf32> to vector<16x32xf32>
    %16 = arith.addf %13, %15 : vector<16x32xf32>
    %c0_21 = arith.constant 0 : index
    %c0_22 = arith.constant 0 : index
    %17 = vector.load %arg9[%c0_21, %c0_22] : memref<4x16xf32, #tpu.memory_space<vmem>>, vector<4x16xf32>
    %cst_23 = arith.constant dense<0.000000e+00> : vector<32x16xf32>
    %18 = tpu.matmul %3, %17, %cst_23 {dimension_numbers = #tpu.dot_dimension_numbers<[1], [0], [0], [1], [0, 0, 1, 1], [], []>} : vector<32x4xf32>, vector<4x16xf32>, vector<32x16xf32> -> vector<32x16xf32>
    %c0_24 = arith.constant 0 : index
    %c0_25 = arith.constant 0 : index
    %19 = vector.load %arg10[%c0_24, %c0_25] : memref<1x16xf32, #tpu.memory_space<vmem>>, vector<1x16xf32>
    %20 = vector.broadcast %19 : vector<1x16xf32> to vector<32x16xf32>
    %21 = arith.addf %18, %20 : vector<32x16xf32>
    %22 = tpu.iota {dimensions = array<i32: 1>} : vector<32x16xi32>
    %23 = vector.broadcast %5 : vector<32x1xi32> to vector<32x16xi32>
    %24 = arith.cmpi eq, %22, %23 : vector<32x16xi32>
    %25 = arith.extui %24 : vector<32x16xi1> to vector<32x16xi32>
    %26 = arith.sitofp %25 : vector<32x16xi32> to vector<32x16xf32>
    %27 = vector.broadcast %7 : vector<32x1xi32> to vector<32x16xi32>
    %28 = arith.cmpi eq, %22, %27 : vector<32x16xi32>
    %29 = arith.extui %28 : vector<32x16xi1> to vector<32x16xi32>
    %30 = arith.sitofp %29 : vector<32x16xi32> to vector<32x16xf32>
    %31 = vector.broadcast %9 : vector<16x1xi32> to vector<16x16xi32>
    %32 = vector.broadcast %11 : vector<1x16xi32> to vector<16x16xi32>
    %33 = arith.addi %31, %32 : vector<16x16xi32>
    %c1_i32 = arith.constant 1 : i32
    %34 = vector.broadcast %c1_i32 : i32 to vector<16x16xi32>
    %35 = arith.cmpi eq, %33, %34 : vector<16x16xi32>
    %36 = tpu.iota {dimensions = array<i32: 1>} : vector<16x2xi32>
    %37 = vector.broadcast %9 : vector<16x1xi32> to vector<16x2xi32>
    %38 = arith.cmpi eq, %36, %37 : vector<16x2xi32>
    %39 = arith.extui %38 : vector<16x2xi1> to vector<16x2xi32>
    %40 = arith.sitofp %39 : vector<16x2xi32> to vector<16x2xf32>
    %c0_26 = arith.constant 0 : index
    %c0_27 = arith.constant 0 : index
    %41 = vector.load %arg12[%c0_26, %c0_27] : memref<16x128xf32, #tpu.memory_space<vmem>>, vector<16x128xf32>
    %cst_28 = arith.constant dense<0.000000e+00> : vector<32x128xf32>
    %42 = tpu.matmul %21, %41, %cst_28 {dimension_numbers = #tpu.dot_dimension_numbers<[1], [0], [0], [1], [0, 0, 1, 1], [], []>} : vector<32x16xf32>, vector<16x128xf32>, vector<32x128xf32> -> vector<32x128xf32>
    %c0_29 = arith.constant 0 : index
    %c0_30 = arith.constant 0 : index
    %43 = vector.load %arg13[%c0_29, %c0_30] : memref<1x128xf32, #tpu.memory_space<vmem>>, vector<1x128xf32>
    %44 = vector.broadcast %43 : vector<1x128xf32> to vector<32x128xf32>
    %45 = arith.addf %42, %44 : vector<32x128xf32>
    %c0_31 = arith.constant 0 : index
    %c0_32 = arith.constant 0 : index
    %46 = vector.load %arg11[%c0_31, %c0_32] : memref<64x128xf32, #tpu.memory_space<vmem>>, vector<64x128xf32>
    %c0_33 = arith.constant 0 : index
    %c0_34 = arith.constant 0 : index
    %47 = vector.load %arg14[%c0_33, %c0_34] : memref<128x128xf32, #tpu.memory_space<vmem>>, vector<128x128xf32>
    %c0_35 = arith.constant 0 : index
    %c0_36 = arith.constant 0 : index
    %48 = vector.load %arg15[%c0_35, %c0_36] : memref<1x128xf32, #tpu.memory_space<vmem>>, vector<1x128xf32>
    %c0_37 = arith.constant 0 : index
    %c0_38 = arith.constant 0 : index
    %49 = vector.load %arg16[%c0_37, %c0_38] : memref<96x96xf32, #tpu.memory_space<vmem>>, vector<96x96xf32>
    %c0_39 = arith.constant 0 : index
    %c0_40 = arith.constant 0 : index
    %50 = vector.load %arg17[%c0_39, %c0_40] : memref<32x96xf32, #tpu.memory_space<vmem>>, vector<32x96xf32>
    %c0_41 = arith.constant 0 : index
    %c0_42 = arith.constant 0 : index
    %51 = vector.load %arg18[%c0_41, %c0_42] : memref<1x96xf32, #tpu.memory_space<vmem>>, vector<1x96xf32>
    %c0_43 = arith.constant 0 : index
    %c0_44 = arith.constant 0 : index
    %52 = vector.load %arg19[%c0_43, %c0_44] : memref<1x96xf32, #tpu.memory_space<vmem>>, vector<1x96xf32>
    %cst_45 = arith.constant dense<0.000000e+00> : vector<32x32xf32>
    %53 = tpu.matmul %26, %16, %cst_45 {dimension_numbers = #tpu.dot_dimension_numbers<[1], [0], [0], [1], [0, 0, 1, 1], [], []>} : vector<32x16xf32>, vector<16x32xf32>, vector<32x32xf32> -> vector<32x32xf32>
    %cst_46 = arith.constant dense<0.000000e+00> : vector<32x32xf32>
    %54 = tpu.matmul %30, %16, %cst_46 {dimension_numbers = #tpu.dot_dimension_numbers<[1], [0], [0], [1], [0, 0, 1, 1], [], []>} : vector<32x16xf32>, vector<16x32xf32>, vector<32x32xf32> -> vector<32x32xf32>
    %55 = tpu.concatenate %53, %54 in 1 : vector<32x32xf32>, vector<32x32xf32> -> vector<32x64xf32>
    %cst_47 = arith.constant dense<0.000000e+00> : vector<32x128xf32>
    %56 = tpu.matmul %55, %46, %cst_47 {dimension_numbers = #tpu.dot_dimension_numbers<[1], [0], [0], [1], [0, 0, 1, 1], [], []>} : vector<32x64xf32>, vector<64x128xf32>, vector<32x128xf32> -> vector<32x128xf32>
    %57 = arith.addf %56, %45 : vector<32x128xf32>
    %cst_48 = arith.constant 0.000000e+00 : f32
    %58 = vector.broadcast %cst_48 : f32 to vector<32x128xf32>
    %59 = arith.maximumf %57, %58 : vector<32x128xf32>
    %cst_49 = arith.constant dense<0.000000e+00> : vector<32x128xf32>
    %60 = tpu.matmul %59, %47, %cst_49 {dimension_numbers = #tpu.dot_dimension_numbers<[1], [0], [0], [1], [0, 0, 1, 1], [], []>} : vector<32x128xf32>, vector<128x128xf32>, vector<32x128xf32> -> vector<32x128xf32>
    %61 = vector.broadcast %48 : vector<1x128xf32> to vector<32x128xf32>
    %62 = arith.addf %60, %61 : vector<32x128xf32>
    %63 = vector.extract_strided_slice %62 {offsets = [0, 0], sizes = [32, 64], strides = [1, 1]} : vector<32x128xf32> to vector<32x64xf32>
    %cst_50 = arith.constant dense<0.000000e+00> : vector<16x64xf32>
    %64 = tpu.matmul %30, %63, %cst_50 {dimension_numbers = #tpu.dot_dimension_numbers<[0], [0], [1], [1], [0, 1, 1, 1], [], []>} : vector<32x16xf32>, vector<32x64xf32>, vector<16x64xf32> -> vector<16x64xf32>
    %65 = vector.extract_strided_slice %62 {offsets = [0, 64], sizes = [32, 64], strides = [1, 1]} : vector<32x128xf32> to vector<32x64xf32>
    %cst_51 = arith.constant dense<0.000000e+00> : vector<16x64xf32>
    %66 = tpu.matmul %26, %65, %cst_51 {dimension_numbers = #tpu.dot_dimension_numbers<[0], [0], [1], [1], [0, 1, 1, 1], [], []>} : vector<32x16xf32>, vector<32x64xf32>, vector<16x64xf32> -> vector<16x64xf32>
    %67 = arith.addf %64, %66 : vector<16x64xf32>
    %cst_52 = arith.constant dense<0.000000e+00> : vector<16x16xf32>
    %68 = tpu.matmul %16, %16, %cst_52 {dimension_numbers = #tpu.dot_dimension_numbers<[1], [1], [0], [0], [0, 0, 1, 0], [], []>} : vector<16x32xf32>, vector<16x32xf32>, vector<16x16xf32> -> vector<16x16xf32>
    %cst_53 = arith.constant -1.000000e+30 : f32
    %69 = vector.broadcast %cst_53 : f32 to vector<16x16xf32>
    %70 = arith.select %35, %68, %69 : vector<16x16xi1>, vector<16x16xf32>
    %cst_54 = arith.constant dense<0xFF800000> : vector<16xf32>
    %71 = vector.multi_reduction <maximumf>, %70, %cst_54 [1] : vector<16x16xf32> to vector<16xf32>
    %72 = vector.shape_cast %71 : vector<16xf32> to vector<16x1xf32>
    %73 = vector.broadcast %72 : vector<16x1xf32> to vector<16x16xf32>
    %74 = arith.subf %70, %73 : vector<16x16xf32>
    %75 = math.exp %74 : vector<16x16xf32>
    %cst_55 = arith.constant dense<0.000000e+00> : vector<16xf32>
    %76 = vector.multi_reduction <add>, %75, %cst_55 [1] : vector<16x16xf32> to vector<16xf32>
    %77 = vector.shape_cast %76 : vector<16xf32> to vector<16x1xf32>
    %78 = vector.broadcast %77 : vector<16x1xf32> to vector<16x16xf32>
    %79 = arith.divf %75, %78 : vector<16x16xf32>
    %cst_56 = arith.constant dense<0.000000e+00> : vector<16x32xf32>
    %80 = tpu.matmul %79, %16, %cst_56 {dimension_numbers = #tpu.dot_dimension_numbers<[1], [0], [0], [1], [0, 0, 1, 1], [], []>} : vector<16x16xf32>, vector<16x32xf32>, vector<16x32xf32> -> vector<16x32xf32>
    %81 = arith.subf %16, %80 : vector<16x32xf32>
    %82 = tpu.concatenate %67, %81 in 1 : vector<16x64xf32>, vector<16x32xf32> -> vector<16x96xf32>
    %cst_57 = arith.constant dense<0.000000e+00> : vector<16x96xf32>
    %83 = tpu.matmul %82, %49, %cst_57 {dimension_numbers = #tpu.dot_dimension_numbers<[1], [0], [0], [1], [0, 0, 1, 1], [], []>} : vector<16x96xf32>, vector<96x96xf32>, vector<16x96xf32> -> vector<16x96xf32>
    %84 = vector.broadcast %51 : vector<1x96xf32> to vector<16x96xf32>
    %85 = arith.addf %83, %84 : vector<16x96xf32>
    %cst_58 = arith.constant dense<0.000000e+00> : vector<16x96xf32>
    %86 = tpu.matmul %16, %50, %cst_58 {dimension_numbers = #tpu.dot_dimension_numbers<[1], [0], [0], [1], [0, 0, 1, 1], [], []>} : vector<16x32xf32>, vector<32x96xf32>, vector<16x96xf32> -> vector<16x96xf32>
    %87 = vector.broadcast %52 : vector<1x96xf32> to vector<16x96xf32>
    %88 = arith.addf %86, %87 : vector<16x96xf32>
    %89 = vector.extract_strided_slice %85 {offsets = [0, 0], sizes = [16, 32], strides = [1, 1]} : vector<16x96xf32> to vector<16x32xf32>
    %90 = vector.extract_strided_slice %88 {offsets = [0, 0], sizes = [16, 32], strides = [1, 1]} : vector<16x96xf32> to vector<16x32xf32>
    %91 = arith.addf %89, %90 : vector<16x32xf32>
    %92 = arith.negf %91 : vector<16x32xf32>
    %93 = math.exp %92 : vector<16x32xf32>
    %cst_59 = arith.constant 1.000000e+00 : f32
    %94 = vector.broadcast %cst_59 : f32 to vector<16x32xf32>
    %95 = arith.addf %94, %93 : vector<16x32xf32>
    %96 = arith.divf %94, %95 : vector<16x32xf32>
    %97 = vector.extract_strided_slice %85 {offsets = [0, 32], sizes = [16, 32], strides = [1, 1]} : vector<16x96xf32> to vector<16x32xf32>
    %98 = vector.extract_strided_slice %88 {offsets = [0, 32], sizes = [16, 32], strides = [1, 1]} : vector<16x96xf32> to vector<16x32xf32>
    %99 = arith.addf %97, %98 : vector<16x32xf32>
    %100 = arith.negf %99 : vector<16x32xf32>
    %101 = math.exp %100 : vector<16x32xf32>
    %cst_60 = arith.constant 1.000000e+00 : f32
    %102 = vector.broadcast %cst_60 : f32 to vector<16x32xf32>
    %103 = arith.addf %102, %101 : vector<16x32xf32>
    %104 = arith.divf %102, %103 : vector<16x32xf32>
    %105 = vector.extract_strided_slice %85 {offsets = [0, 64], sizes = [16, 32], strides = [1, 1]} : vector<16x96xf32> to vector<16x32xf32>
    %106 = vector.extract_strided_slice %88 {offsets = [0, 64], sizes = [16, 32], strides = [1, 1]} : vector<16x96xf32> to vector<16x32xf32>
    %107 = arith.mulf %96, %106 : vector<16x32xf32>
    %108 = arith.addf %105, %107 : vector<16x32xf32>
    %109 = math.tanh %108 : vector<16x32xf32>
    %cst_61 = arith.constant 1.000000e+00 : f32
    %110 = vector.broadcast %cst_61 : f32 to vector<16x32xf32>
    %111 = arith.subf %110, %104 : vector<16x32xf32>
    %112 = arith.mulf %111, %109 : vector<16x32xf32>
    %113 = arith.mulf %104, %16 : vector<16x32xf32>
    %114 = arith.addf %112, %113 : vector<16x32xf32>
    %cst_62 = arith.constant dense<0.000000e+00> : vector<32x32xf32>
    %115 = tpu.matmul %26, %114, %cst_62 {dimension_numbers = #tpu.dot_dimension_numbers<[1], [0], [0], [1], [0, 0, 1, 1], [], []>} : vector<32x16xf32>, vector<16x32xf32>, vector<32x32xf32> -> vector<32x32xf32>
    %cst_63 = arith.constant dense<0.000000e+00> : vector<32x32xf32>
    %116 = tpu.matmul %30, %114, %cst_63 {dimension_numbers = #tpu.dot_dimension_numbers<[1], [0], [0], [1], [0, 0, 1, 1], [], []>} : vector<32x16xf32>, vector<16x32xf32>, vector<32x32xf32> -> vector<32x32xf32>
    %117 = tpu.concatenate %115, %116 in 1 : vector<32x32xf32>, vector<32x32xf32> -> vector<32x64xf32>
    %cst_64 = arith.constant dense<0.000000e+00> : vector<32x128xf32>
    %118 = tpu.matmul %117, %46, %cst_64 {dimension_numbers = #tpu.dot_dimension_numbers<[1], [0], [0], [1], [0, 0, 1, 1], [], []>} : vector<32x64xf32>, vector<64x128xf32>, vector<32x128xf32> -> vector<32x128xf32>
    %119 = arith.addf %118, %45 : vector<32x128xf32>
    %cst_65 = arith.constant 0.000000e+00 : f32
    %120 = vector.broadcast %cst_65 : f32 to vector<32x128xf32>
    %121 = arith.maximumf %119, %120 : vector<32x128xf32>
    %cst_66 = arith.constant dense<0.000000e+00> : vector<32x128xf32>
    %122 = tpu.matmul %121, %47, %cst_66 {dimension_numbers = #tpu.dot_dimension_numbers<[1], [0], [0], [1], [0, 0, 1, 1], [], []>} : vector<32x128xf32>, vector<128x128xf32>, vector<32x128xf32> -> vector<32x128xf32>
    %123 = vector.broadcast %48 : vector<1x128xf32> to vector<32x128xf32>
    %124 = arith.addf %122, %123 : vector<32x128xf32>
    %125 = vector.extract_strided_slice %124 {offsets = [0, 0], sizes = [32, 64], strides = [1, 1]} : vector<32x128xf32> to vector<32x64xf32>
    %cst_67 = arith.constant dense<0.000000e+00> : vector<16x64xf32>
    %126 = tpu.matmul %30, %125, %cst_67 {dimension_numbers = #tpu.dot_dimension_numbers<[0], [0], [1], [1], [0, 1, 1, 1], [], []>} : vector<32x16xf32>, vector<32x64xf32>, vector<16x64xf32> -> vector<16x64xf32>
    %127 = vector.extract_strided_slice %124 {offsets = [0, 64], sizes = [32, 64], strides = [1, 1]} : vector<32x128xf32> to vector<32x64xf32>
    %cst_68 = arith.constant dense<0.000000e+00> : vector<16x64xf32>
    %128 = tpu.matmul %26, %127, %cst_68 {dimension_numbers = #tpu.dot_dimension_numbers<[0], [0], [1], [1], [0, 1, 1, 1], [], []>} : vector<32x16xf32>, vector<32x64xf32>, vector<16x64xf32> -> vector<16x64xf32>
    %129 = arith.addf %126, %128 : vector<16x64xf32>
    %cst_69 = arith.constant dense<0.000000e+00> : vector<16x16xf32>
    %130 = tpu.matmul %114, %114, %cst_69 {dimension_numbers = #tpu.dot_dimension_numbers<[1], [1], [0], [0], [0, 0, 1, 0], [], []>} : vector<16x32xf32>, vector<16x32xf32>, vector<16x16xf32> -> vector<16x16xf32>
    %cst_70 = arith.constant -1.000000e+30 : f32
    %131 = vector.broadcast %cst_70 : f32 to vector<16x16xf32>
    %132 = arith.select %35, %130, %131 : vector<16x16xi1>, vector<16x16xf32>
    %cst_71 = arith.constant dense<0xFF800000> : vector<16xf32>
    %133 = vector.multi_reduction <maximumf>, %132, %cst_71 [1] : vector<16x16xf32> to vector<16xf32>
    %134 = vector.shape_cast %133 : vector<16xf32> to vector<16x1xf32>
    %135 = vector.broadcast %134 : vector<16x1xf32> to vector<16x16xf32>
    %136 = arith.subf %132, %135 : vector<16x16xf32>
    %137 = math.exp %136 : vector<16x16xf32>
    %cst_72 = arith.constant dense<0.000000e+00> : vector<16xf32>
    %138 = vector.multi_reduction <add>, %137, %cst_72 [1] : vector<16x16xf32> to vector<16xf32>
    %139 = vector.shape_cast %138 : vector<16xf32> to vector<16x1xf32>
    %140 = vector.broadcast %139 : vector<16x1xf32> to vector<16x16xf32>
    %141 = arith.divf %137, %140 : vector<16x16xf32>
    %cst_73 = arith.constant dense<0.000000e+00> : vector<16x32xf32>
    %142 = tpu.matmul %141, %114, %cst_73 {dimension_numbers = #tpu.dot_dimension_numbers<[1], [0], [0], [1], [0, 0, 1, 1], [], []>} : vector<16x16xf32>, vector<16x32xf32>, vector<16x32xf32> -> vector<16x32xf32>
    %143 = arith.subf %114, %142 : vector<16x32xf32>
    %144 = tpu.concatenate %129, %143 in 1 : vector<16x64xf32>, vector<16x32xf32> -> vector<16x96xf32>
    %cst_74 = arith.constant dense<0.000000e+00> : vector<16x96xf32>
    %145 = tpu.matmul %144, %49, %cst_74 {dimension_numbers = #tpu.dot_dimension_numbers<[1], [0], [0], [1], [0, 0, 1, 1], [], []>} : vector<16x96xf32>, vector<96x96xf32>, vector<16x96xf32> -> vector<16x96xf32>
    %146 = vector.broadcast %51 : vector<1x96xf32> to vector<16x96xf32>
    %147 = arith.addf %145, %146 : vector<16x96xf32>
    %cst_75 = arith.constant dense<0.000000e+00> : vector<16x96xf32>
    %148 = tpu.matmul %114, %50, %cst_75 {dimension_numbers = #tpu.dot_dimension_numbers<[1], [0], [0], [1], [0, 0, 1, 1], [], []>} : vector<16x32xf32>, vector<32x96xf32>, vector<16x96xf32> -> vector<16x96xf32>
    %149 = vector.broadcast %52 : vector<1x96xf32> to vector<16x96xf32>
    %150 = arith.addf %148, %149 : vector<16x96xf32>
    %151 = vector.extract_strided_slice %147 {offsets = [0, 0], sizes = [16, 32], strides = [1, 1]} : vector<16x96xf32> to vector<16x32xf32>
    %152 = vector.extract_strided_slice %150 {offsets = [0, 0], sizes = [16, 32], strides = [1, 1]} : vector<16x96xf32> to vector<16x32xf32>
    %153 = arith.addf %151, %152 : vector<16x32xf32>
    %154 = arith.negf %153 : vector<16x32xf32>
    %155 = math.exp %154 : vector<16x32xf32>
    %cst_76 = arith.constant 1.000000e+00 : f32
    %156 = vector.broadcast %cst_76 : f32 to vector<16x32xf32>
    %157 = arith.addf %156, %155 : vector<16x32xf32>
    %158 = arith.divf %156, %157 : vector<16x32xf32>
    %159 = vector.extract_strided_slice %147 {offsets = [0, 32], sizes = [16, 32], strides = [1, 1]} : vector<16x96xf32> to vector<16x32xf32>
    %160 = vector.extract_strided_slice %150 {offsets = [0, 32], sizes = [16, 32], strides = [1, 1]} : vector<16x96xf32> to vector<16x32xf32>
    %161 = arith.addf %159, %160 : vector<16x32xf32>
    %162 = arith.negf %161 : vector<16x32xf32>
    %163 = math.exp %162 : vector<16x32xf32>
    %cst_77 = arith.constant 1.000000e+00 : f32
    %164 = vector.broadcast %cst_77 : f32 to vector<16x32xf32>
    %165 = arith.addf %164, %163 : vector<16x32xf32>
    %166 = arith.divf %164, %165 : vector<16x32xf32>
    %167 = vector.extract_strided_slice %147 {offsets = [0, 64], sizes = [16, 32], strides = [1, 1]} : vector<16x96xf32> to vector<16x32xf32>
    %168 = vector.extract_strided_slice %150 {offsets = [0, 64], sizes = [16, 32], strides = [1, 1]} : vector<16x96xf32> to vector<16x32xf32>
    %169 = arith.mulf %158, %168 : vector<16x32xf32>
    %170 = arith.addf %167, %169 : vector<16x32xf32>
    %171 = math.tanh %170 : vector<16x32xf32>
    %cst_78 = arith.constant 1.000000e+00 : f32
    %172 = vector.broadcast %cst_78 : f32 to vector<16x32xf32>
    %173 = arith.subf %172, %166 : vector<16x32xf32>
    %174 = arith.mulf %173, %171 : vector<16x32xf32>
    %175 = arith.mulf %166, %114 : vector<16x32xf32>
    %176 = arith.addf %174, %175 : vector<16x32xf32>
    %cst_79 = arith.constant dense<0.000000e+00> : vector<32x32xf32>
    %177 = tpu.matmul %26, %176, %cst_79 {dimension_numbers = #tpu.dot_dimension_numbers<[1], [0], [0], [1], [0, 0, 1, 1], [], []>} : vector<32x16xf32>, vector<16x32xf32>, vector<32x32xf32> -> vector<32x32xf32>
    %cst_80 = arith.constant dense<0.000000e+00> : vector<32x32xf32>
    %178 = tpu.matmul %30, %176, %cst_80 {dimension_numbers = #tpu.dot_dimension_numbers<[1], [0], [0], [1], [0, 0, 1, 1], [], []>} : vector<32x16xf32>, vector<16x32xf32>, vector<32x32xf32> -> vector<32x32xf32>
    %179 = tpu.concatenate %177, %178 in 1 : vector<32x32xf32>, vector<32x32xf32> -> vector<32x64xf32>
    %cst_81 = arith.constant dense<0.000000e+00> : vector<32x128xf32>
    %180 = tpu.matmul %179, %46, %cst_81 {dimension_numbers = #tpu.dot_dimension_numbers<[1], [0], [0], [1], [0, 0, 1, 1], [], []>} : vector<32x64xf32>, vector<64x128xf32>, vector<32x128xf32> -> vector<32x128xf32>
    %181 = arith.addf %180, %45 : vector<32x128xf32>
    %cst_82 = arith.constant 0.000000e+00 : f32
    %182 = vector.broadcast %cst_82 : f32 to vector<32x128xf32>
    %183 = arith.maximumf %181, %182 : vector<32x128xf32>
    %cst_83 = arith.constant dense<0.000000e+00> : vector<32x128xf32>
    %184 = tpu.matmul %183, %47, %cst_83 {dimension_numbers = #tpu.dot_dimension_numbers<[1], [0], [0], [1], [0, 0, 1, 1], [], []>} : vector<32x128xf32>, vector<128x128xf32>, vector<32x128xf32> -> vector<32x128xf32>
    %185 = vector.broadcast %48 : vector<1x128xf32> to vector<32x128xf32>
    %186 = arith.addf %184, %185 : vector<32x128xf32>
    %187 = vector.extract_strided_slice %186 {offsets = [0, 0], sizes = [32, 64], strides = [1, 1]} : vector<32x128xf32> to vector<32x64xf32>
    %cst_84 = arith.constant dense<0.000000e+00> : vector<16x64xf32>
    %188 = tpu.matmul %30, %187, %cst_84 {dimension_numbers = #tpu.dot_dimension_numbers<[0], [0], [1], [1], [0, 1, 1, 1], [], []>} : vector<32x16xf32>, vector<32x64xf32>, vector<16x64xf32> -> vector<16x64xf32>
    %189 = vector.extract_strided_slice %186 {offsets = [0, 64], sizes = [32, 64], strides = [1, 1]} : vector<32x128xf32> to vector<32x64xf32>
    %cst_85 = arith.constant dense<0.000000e+00> : vector<16x64xf32>
    %190 = tpu.matmul %26, %189, %cst_85 {dimension_numbers = #tpu.dot_dimension_numbers<[0], [0], [1], [1], [0, 1, 1, 1], [], []>} : vector<32x16xf32>, vector<32x64xf32>, vector<16x64xf32> -> vector<16x64xf32>
    %191 = arith.addf %188, %190 : vector<16x64xf32>
    %cst_86 = arith.constant dense<0.000000e+00> : vector<16x16xf32>
    %192 = tpu.matmul %176, %176, %cst_86 {dimension_numbers = #tpu.dot_dimension_numbers<[1], [1], [0], [0], [0, 0, 1, 0], [], []>} : vector<16x32xf32>, vector<16x32xf32>, vector<16x16xf32> -> vector<16x16xf32>
    %cst_87 = arith.constant -1.000000e+30 : f32
    %193 = vector.broadcast %cst_87 : f32 to vector<16x16xf32>
    %194 = arith.select %35, %192, %193 : vector<16x16xi1>, vector<16x16xf32>
    %cst_88 = arith.constant dense<0xFF800000> : vector<16xf32>
    %195 = vector.multi_reduction <maximumf>, %194, %cst_88 [1] : vector<16x16xf32> to vector<16xf32>
    %196 = vector.shape_cast %195 : vector<16xf32> to vector<16x1xf32>
    %197 = vector.broadcast %196 : vector<16x1xf32> to vector<16x16xf32>
    %198 = arith.subf %194, %197 : vector<16x16xf32>
    %199 = math.exp %198 : vector<16x16xf32>
    %cst_89 = arith.constant dense<0.000000e+00> : vector<16xf32>
    %200 = vector.multi_reduction <add>, %199, %cst_89 [1] : vector<16x16xf32> to vector<16xf32>
    %201 = vector.shape_cast %200 : vector<16xf32> to vector<16x1xf32>
    %202 = vector.broadcast %201 : vector<16x1xf32> to vector<16x16xf32>
    %203 = arith.divf %199, %202 : vector<16x16xf32>
    %cst_90 = arith.constant dense<0.000000e+00> : vector<16x32xf32>
    %204 = tpu.matmul %203, %176, %cst_90 {dimension_numbers = #tpu.dot_dimension_numbers<[1], [0], [0], [1], [0, 0, 1, 1], [], []>} : vector<16x16xf32>, vector<16x32xf32>, vector<16x32xf32> -> vector<16x32xf32>
    %205 = arith.subf %176, %204 : vector<16x32xf32>
    %206 = tpu.concatenate %191, %205 in 1 : vector<16x64xf32>, vector<16x32xf32> -> vector<16x96xf32>
    %cst_91 = arith.constant dense<0.000000e+00> : vector<16x96xf32>
    %207 = tpu.matmul %206, %49, %cst_91 {dimension_numbers = #tpu.dot_dimension_numbers<[1], [0], [0], [1], [0, 0, 1, 1], [], []>} : vector<16x96xf32>, vector<96x96xf32>, vector<16x96xf32> -> vector<16x96xf32>
    %208 = vector.broadcast %51 : vector<1x96xf32> to vector<16x96xf32>
    %209 = arith.addf %207, %208 : vector<16x96xf32>
    %cst_92 = arith.constant dense<0.000000e+00> : vector<16x96xf32>
    %210 = tpu.matmul %176, %50, %cst_92 {dimension_numbers = #tpu.dot_dimension_numbers<[1], [0], [0], [1], [0, 0, 1, 1], [], []>} : vector<16x32xf32>, vector<32x96xf32>, vector<16x96xf32> -> vector<16x96xf32>
    %211 = vector.broadcast %52 : vector<1x96xf32> to vector<16x96xf32>
    %212 = arith.addf %210, %211 : vector<16x96xf32>
    %213 = vector.extract_strided_slice %209 {offsets = [0, 0], sizes = [16, 32], strides = [1, 1]} : vector<16x96xf32> to vector<16x32xf32>
    %214 = vector.extract_strided_slice %212 {offsets = [0, 0], sizes = [16, 32], strides = [1, 1]} : vector<16x96xf32> to vector<16x32xf32>
    %215 = arith.addf %213, %214 : vector<16x32xf32>
    %216 = arith.negf %215 : vector<16x32xf32>
    %217 = math.exp %216 : vector<16x32xf32>
    %cst_93 = arith.constant 1.000000e+00 : f32
    %218 = vector.broadcast %cst_93 : f32 to vector<16x32xf32>
    %219 = arith.addf %218, %217 : vector<16x32xf32>
    %220 = arith.divf %218, %219 : vector<16x32xf32>
    %221 = vector.extract_strided_slice %209 {offsets = [0, 32], sizes = [16, 32], strides = [1, 1]} : vector<16x96xf32> to vector<16x32xf32>
    %222 = vector.extract_strided_slice %212 {offsets = [0, 32], sizes = [16, 32], strides = [1, 1]} : vector<16x96xf32> to vector<16x32xf32>
    %223 = arith.addf %221, %222 : vector<16x32xf32>
    %224 = arith.negf %223 : vector<16x32xf32>
    %225 = math.exp %224 : vector<16x32xf32>
    %cst_94 = arith.constant 1.000000e+00 : f32
    %226 = vector.broadcast %cst_94 : f32 to vector<16x32xf32>
    %227 = arith.addf %226, %225 : vector<16x32xf32>
    %228 = arith.divf %226, %227 : vector<16x32xf32>
    %229 = vector.extract_strided_slice %209 {offsets = [0, 64], sizes = [16, 32], strides = [1, 1]} : vector<16x96xf32> to vector<16x32xf32>
    %230 = vector.extract_strided_slice %212 {offsets = [0, 64], sizes = [16, 32], strides = [1, 1]} : vector<16x96xf32> to vector<16x32xf32>
    %231 = arith.mulf %220, %230 : vector<16x32xf32>
    %232 = arith.addf %229, %231 : vector<16x32xf32>
    %233 = math.tanh %232 : vector<16x32xf32>
    %cst_95 = arith.constant 1.000000e+00 : f32
    %234 = vector.broadcast %cst_95 : f32 to vector<16x32xf32>
    %235 = arith.subf %234, %228 : vector<16x32xf32>
    %236 = arith.mulf %235, %233 : vector<16x32xf32>
    %237 = arith.mulf %228, %176 : vector<16x32xf32>
    %238 = arith.addf %236, %237 : vector<16x32xf32>
    %c0_96 = arith.constant 0 : index
    %c0_97 = arith.constant 0 : index
    %239 = vector.load %arg20[%c0_96, %c0_97] : memref<32x64xf32, #tpu.memory_space<vmem>>, vector<32x64xf32>
    %cst_98 = arith.constant dense<0.000000e+00> : vector<16x64xf32>
    %240 = tpu.matmul %238, %239, %cst_98 {dimension_numbers = #tpu.dot_dimension_numbers<[1], [0], [0], [1], [0, 0, 1, 1], [], []>} : vector<16x32xf32>, vector<32x64xf32>, vector<16x64xf32> -> vector<16x64xf32>
    %c0_99 = arith.constant 0 : index
    %c0_100 = arith.constant 0 : index
    %241 = vector.load %arg21[%c0_99, %c0_100] : memref<1x64xf32, #tpu.memory_space<vmem>>, vector<1x64xf32>
    %242 = vector.broadcast %241 : vector<1x64xf32> to vector<16x64xf32>
    %243 = arith.addf %240, %242 : vector<16x64xf32>
    %244 = vector.extract_strided_slice %243 {offsets = [0, 0], sizes = [16, 32], strides = [1, 1]} : vector<16x64xf32> to vector<16x32xf32>
    %245 = arith.negf %244 : vector<16x32xf32>
    %246 = math.exp %245 : vector<16x32xf32>
    %cst_101 = arith.constant 1.000000e+00 : f32
    %247 = vector.broadcast %cst_101 : f32 to vector<16x32xf32>
    %248 = arith.addf %247, %246 : vector<16x32xf32>
    %249 = arith.divf %247, %248 : vector<16x32xf32>
    %250 = vector.extract_strided_slice %243 {offsets = [0, 32], sizes = [16, 32], strides = [1, 1]} : vector<16x64xf32> to vector<16x32xf32>
    %251 = arith.mulf %250, %249 : vector<16x32xf32>
    %cst_102 = arith.constant dense<0.000000e+00> : vector<2x32xf32>
    %252 = tpu.matmul %40, %251, %cst_102 {dimension_numbers = #tpu.dot_dimension_numbers<[0], [0], [1], [1], [0, 1, 1, 1], [], []>} : vector<16x2xf32>, vector<16x32xf32>, vector<2x32xf32> -> vector<2x32xf32>
    %c0_103 = arith.constant 0 : index
    %c0_104 = arith.constant 0 : index
    %253 = vector.load %arg22[%c0_103, %c0_104] : memref<32x32xf32, #tpu.memory_space<vmem>>, vector<32x32xf32>
    %cst_105 = arith.constant dense<0.000000e+00> : vector<2x32xf32>
    %254 = tpu.matmul %252, %253, %cst_105 {dimension_numbers = #tpu.dot_dimension_numbers<[1], [0], [0], [1], [0, 0, 1, 1], [], []>} : vector<2x32xf32>, vector<32x32xf32>, vector<2x32xf32> -> vector<2x32xf32>
    %c0_106 = arith.constant 0 : index
    %c0_107 = arith.constant 0 : index
    %255 = vector.load %arg23[%c0_106, %c0_107] : memref<1x32xf32, #tpu.memory_space<vmem>>, vector<1x32xf32>
    %256 = vector.broadcast %255 : vector<1x32xf32> to vector<2x32xf32>
    %257 = arith.addf %254, %256 : vector<2x32xf32>
    %258 = tpu.iota {dimensions = array<i32: 0>} : vector<2x1xi32>
    %c0_i32 = arith.constant 0 : i32
    %259 = vector.broadcast %c0_i32 : i32 to vector<2x1xi32>
    %260 = arith.cmpi eq, %258, %259 : vector<2x1xi32>
    %261 = arith.extui %260 : vector<2x1xi1> to vector<2x1xi32>
    %262 = arith.sitofp %261 : vector<2x1xi32> to vector<2x1xf32>
    %c1_i32_108 = arith.constant 1 : i32
    %263 = vector.broadcast %c1_i32_108 : i32 to vector<2x1xi32>
    %264 = arith.cmpi eq, %258, %263 : vector<2x1xi32>
    %265 = arith.extui %264 : vector<2x1xi1> to vector<2x1xi32>
    %266 = arith.sitofp %265 : vector<2x1xi32> to vector<2x1xf32>
    %267 = arith.subf %262, %266 : vector<2x1xf32>
    %268 = vector.broadcast %267 : vector<2x1xf32> to vector<2x32xf32>
    %269 = arith.mulf %268, %257 : vector<2x32xf32>
    %cst_109 = arith.constant dense<0.000000e+00> : vector<32xf32>
    %270 = vector.multi_reduction <add>, %269, %cst_109 [0] : vector<2x32xf32> to vector<32xf32>
    %271 = vector.shape_cast %270 : vector<32xf32> to vector<1x32xf32>
    %cst_110 = arith.constant 0.000000e+00 : f32
    %272 = vector.broadcast %cst_110 : f32 to vector<1x32xf32>
    %273 = arith.maximumf %271, %272 : vector<1x32xf32>
    %c0_111 = arith.constant 0 : index
    %c0_112 = arith.constant 0 : index
    %c0_113 = arith.constant 0 : index
    %274 = vector.load %arg24[%c0_111, %c0_112, %c0_113] : memref<1x1x32xf32, #tpu.memory_space<vmem>>, vector<1x1x32xf32>
    %275 = vector.shape_cast %274 : vector<1x1x32xf32> to vector<1x32xf32>
    %276 = vector.shape_cast %273 : vector<1x32xf32> to vector<1x1x32xf32>
    tpu.vector_store %arg24[%c0_111, %c0_112, %c0_113], %276 {strides = array<i32>} : memref<1x1x32xf32, #tpu.memory_space<vmem>>, vector<1x1x32xf32>,
    return
  }
  func.func @transform_0(%arg0: i32) -> (i32, i32, i32) {
    %c0_i32 = arith.constant 0 : i32
    %c0_i32_0 = arith.constant 0 : i32
    %c0_i32_1 = arith.constant 0 : i32
    return %arg0, %c0_i32, %c0_i32_0 : i32, i32, i32
  }
  func.func @transform_1(%arg0: i32) -> (i32, i32, i32) {
    %c0_i32 = arith.constant 0 : i32
    %c0_i32_0 = arith.constant 0 : i32
    %c0_i32_1 = arith.constant 0 : i32
    return %arg0, %c0_i32, %c0_i32_0 : i32, i32, i32
  }
  func.func @transform_2(%arg0: i32) -> (i32, i32, i32) {
    %c0_i32 = arith.constant 0 : i32
    %c0_i32_0 = arith.constant 0 : i32
    %c0_i32_1 = arith.constant 0 : i32
    return %arg0, %c0_i32, %c0_i32_0 : i32, i32, i32
  }
  func.func @transform_3(%arg0: i32) -> (i32, i32, i32) {
    %c0_i32 = arith.constant 0 : i32
    %c0_i32_0 = arith.constant 0 : i32
    %c0_i32_1 = arith.constant 0 : i32
    return %arg0, %c0_i32, %c0_i32_0 : i32, i32, i32
  }
  func.func @transform_4(%arg0: i32) -> (i32, i32, i32) {
    %c0_i32 = arith.constant 0 : i32
    %c0_i32_0 = arith.constant 0 : i32
    %c0_i32_1 = arith.constant 0 : i32
    return %arg0, %c0_i32, %c0_i32_0 : i32, i32, i32
  }
  func.func @transform_5(%arg0: i32) -> (i32, i32, i32) {
    %c0_i32 = arith.constant 0 : i32
    %c0_i32_0 = arith.constant 0 : i32
    %c0_i32_1 = arith.constant 0 : i32
    return %arg0, %c0_i32, %c0_i32_0 : i32, i32, i32
  }
  func.func @transform_6(%arg0: i32) -> (i32, i32) {
    %c0_i32 = arith.constant 0 : i32
    %c0_i32_0 = arith.constant 0 : i32
    %c0_i32_1 = arith.constant 0 : i32
    return %c0_i32, %c0_i32_0 : i32, i32
  }
  func.func @transform_7(%arg0: i32) -> (i32, i32) {
    %c0_i32 = arith.constant 0 : i32
    %c0_i32_0 = arith.constant 0 : i32
    %c0_i32_1 = arith.constant 0 : i32
    return %c0_i32, %c0_i32_0 : i32, i32
  }
  func.func @transform_8(%arg0: i32) -> (i32, i32) {
    %c0_i32 = arith.constant 0 : i32
    %c0_i32_0 = arith.constant 0 : i32
    %c0_i32_1 = arith.constant 0 : i32
    return %c0_i32, %c0_i32_0 : i32, i32
  }
  func.func @transform_9(%arg0: i32) -> (i32, i32) {
    %c0_i32 = arith.constant 0 : i32
    %c0_i32_0 = arith.constant 0 : i32
    %c0_i32_1 = arith.constant 0 : i32
    return %c0_i32, %c0_i32_0 : i32, i32
  }
  func.func @transform_10(%arg0: i32) -> (i32, i32) {
    %c0_i32 = arith.constant 0 : i32
    %c0_i32_0 = arith.constant 0 : i32
    %c0_i32_1 = arith.constant 0 : i32
    return %c0_i32, %c0_i32_0 : i32, i32
  }
  func.func @transform_11(%arg0: i32) -> (i32, i32) {
    %c0_i32 = arith.constant 0 : i32
    %c0_i32_0 = arith.constant 0 : i32
    %c0_i32_1 = arith.constant 0 : i32
    return %c0_i32, %c0_i32_0 : i32, i32
  }
  func.func @transform_12(%arg0: i32) -> (i32, i32) {
    %c0_i32 = arith.constant 0 : i32
    %c0_i32_0 = arith.constant 0 : i32
    %c0_i32_1 = arith.constant 0 : i32
    return %c0_i32, %c0_i32_0 : i32, i32
  }
  func.func @transform_13(%arg0: i32) -> (i32, i32) {
    %c0_i32 = arith.constant 0 : i32
    %c0_i32_0 = arith.constant 0 : i32
    %c0_i32_1 = arith.constant 0 : i32
    return %c0_i32, %c0_i32_0 : i32, i32
  }
  func.func @transform_14(%arg0: i32) -> (i32, i32) {
    %c0_i32 = arith.constant 0 : i32
    %c0_i32_0 = arith.constant 0 : i32
    %c0_i32_1 = arith.constant 0 : i32
    return %c0_i32, %c0_i32_0 : i32, i32
  }
  func.func @transform_15(%arg0: i32) -> (i32, i32) {
    %c0_i32 = arith.constant 0 : i32
    %c0_i32_0 = arith.constant 0 : i32
    %c0_i32_1 = arith.constant 0 : i32
    return %c0_i32, %c0_i32_0 : i32, i32
  }
  func.func @transform_16(%arg0: i32) -> (i32, i32) {
    %c0_i32 = arith.constant 0 : i32
    %c0_i32_0 = arith.constant 0 : i32
    %c0_i32_1 = arith.constant 0 : i32
    return %c0_i32, %c0_i32_0 : i32, i32
  }
  func.func @transform_17(%arg0: i32) -> (i32, i32) {
    %c0_i32 = arith.constant 0 : i32
    %c0_i32_0 = arith.constant 0 : i32
    %c0_i32_1 = arith.constant 0 : i32
    return %c0_i32, %c0_i32_0 : i32, i32
  }
  func.func @transform_18(%arg0: i32) -> (i32, i32) {
    %c0_i32 = arith.constant 0 : i32
    %c0_i32_0 = arith.constant 0 : i32
    %c0_i32_1 = arith.constant 0 : i32
    return %c0_i32, %c0_i32_0 : i32, i32
  }
  func.func @transform_19(%arg0: i32) -> (i32, i32) {
    %c0_i32 = arith.constant 0 : i32
    %c0_i32_0 = arith.constant 0 : i32
    %c0_i32_1 = arith.constant 0 : i32
    return %c0_i32, %c0_i32_0 : i32, i32
  }
  func.func @transform_20(%arg0: i32) -> (i32, i32) {
    %c0_i32 = arith.constant 0 : i32
    %c0_i32_0 = arith.constant 0 : i32
    %c0_i32_1 = arith.constant 0 : i32
    return %c0_i32, %c0_i32_0 : i32, i32
  }
  func.func @transform_21(%arg0: i32) -> (i32, i32) {
    %c0_i32 = arith.constant 0 : i32
    %c0_i32_0 = arith.constant 0 : i32
    %c0_i32_1 = arith.constant 0 : i32
    return %c0_i32, %c0_i32_0 : i32, i32
  }
  func.func @transform_22(%arg0: i32) -> (i32, i32) {
    %c0_i32 = arith.constant 0 : i32
    %c0_i32_0 = arith.constant 0 : i32
    %c0_i32_1 = arith.constant 0 : i32
    return %c0_i32, %c0_i32_0 : i32, i32
  }
  func.func @transform_23(%arg0: i32) -> (i32, i32, i32) {
    %c0_i32 = arith.constant 0 : i32
    %c0_i32_0 = arith.constant 0 : i32
    %c0_i32_1 = arith.constant 0 : i32
    return %arg0, %c0_i32, %c0_i32_0 : i32, i32, i32
  }
}

</mosaic_0001>

<bundles_post_ra>
// kernel: neg.1
= control target key start
LH: loop header
LB: loop body
LE: loop exit
PB: predicated region body
PF: predicated region fallthrough
CT: control target
= control target key end

     0   :  { %2 = vsyncpa [#allocation1], 0  ;;  %s59_s0 = inlined_call_operand.vmem [shape: f32[2], index: 0, kind: input, shape index: {}]   ;;  %s60_s1 = inlined_call_operand.hbm [shape: f32[2], index: 1, kind: output, shape index: {}]  }
   0x1   :  { %v3_v0 = vld [vmem:[%s59_s0] sm:$0x1]  ;;  %s42_s0 = smov [#allocation0]  }
   0x2   :  { %v6_v1 = vxor.u32 2147483648, %v3_v0  ;;  %s13_s8 = sshll.u32 %s42_s0, 4  ;;  %s14_s8 = int_to_ptr.vmem [resolvable:$true] %s13_s8 }
   0x3   :  { %s20_s9 = scalar_lea.vmem %s14_s8, 16  ;;  %s24_s10 = scalar_lea.vmem %s14_s8, 32 }
   0x4   :  { %8 = vst [vmem:[#allocation0] sm:$0x1] %v6_v1  ;;  %p21_p0 = scmp.ne.s32.totalorder %s14_s8, %s20_s9  ;;  %p25_p1 = scmp.lt.s32.totalorder %s14_s8, %s14_s8 }
   0x5   :  { %p26_p2 = scmp.lt.s32.totalorder %s24_s10, %s20_s9 }
   0x7   :  { %p27_p3 = por %p26_p2, %p25_p1 }
   0x9   :  { %p28_p4 = pnand %p27_p3, %p21_p0 }
   0xb   :  { %31 = shalt.err (!%p28_p4)
}
   0xc   :  { %16 = dma.vmem_to_hbm [thread:$0]  %s14_s8, 16, %s60_s1, [#allocation1]  }
   0xd   :  { %40 = dma.done.wait [#allocation1], 16  }
   0xe   :  { %41 = vsyncadd [#allocation1], 4294967280 }
   0xf   :  { %18 = vsyncpa [#allocation1], 1 }

// kernel: gmn_match_hinge_forward.1
= control target key start
LH: loop header
LB: loop body
LE: loop exit
PB: predicated region body
PF: predicated region fallthrough
CT: control target
= control target key end

     0   :  { %s7957_s0 = inlined_call_operand.vmem [shape: f32[2,16,8], index: 0, kind: input, shape index: {}]   ;;  %s7958_s1 = inlined_call_operand.vmem [shape: f32[2,32,4], index: 1, kind: input, shape index: {}]   ;;  %s7959_s2 = inlined_call_operand.vmem [shape: s32[2,32,1], index: 2, kind: input, shape index: {}]   ;;  %s7960_s3 = inlined_call_operand.vmem [shape: s32[2,32,1], index: 3, kind: input, shape index: {}]   ;;  %s7961_s4 = inlined_call_operand.vmem [shape: s32[2,16,1], index: 4, kind: input, shape index: {}]   ;;  %s7962_s5 = inlined_call_operand.vmem [shape: s32[2,1,16], index: 5, kind: input, shape index: {}]   ;;  %s7963_s6 = inlined_call_operand.hbm [shape: f32[8,32], index: 6, kind: input, shape index: {}]   ;;  %s7964_s7 = inlined_call_operand.hbm [shape: f32[1,32], index: 7, kind: input, shape index: {}]   ;;  %s7965_s8 = inlined_call_operand.hbm [shape: f32[4,16], index: 8, kind: input, shape index: {}]   ;;  %s7966_s9 = inlined_call_operand.hbm [shape: f32[1,16], index: 9, kind: input, shape index: {}]   ;;  %s7967_s10 = inlined_call_operand.vmem [shape: f32[64,128], index: 10, kind: input, shape index: {}]   ;;  %s7968_s11 = inlined_call_operand.hbm [shape: f32[16,128], index: 11, kind: input, shape index: {}]   ;;  %s7969_s12 = inlined_call_operand.hbm [shape: f32[1,128], index: 12, kind: input, shape index: {}]   ;;  %s7970_s13 = inlined_call_operand.vmem [shape: f32[128,128], index: 13, kind: input, shape index: {}]   ;;  %s7971_s14 = inlined_call_operand.hbm [shape: f32[1,128], index: 14, kind: input, shape index: {}]   ;;  %s7972_s15 = inlined_call_operand.vmem [shape: f32[96,96], index: 15, kind: input, shape index: {}]   ;;  %s7973_s16 = inlined_call_operand.hbm [shape: f32[32,96], index: 16, kind: input, shape index: {}]   ;;  %s7974_s17 = inlined_call_operand.hbm [shape: f32[1,96], index: 17, kind: input, shape index: {}]   ;;  %s7975_s18 = inlined_call_operand.hbm [shape: f32[1,96], index: 18, kind: input, shape index: {}]   ;;  %s7976_s19 = inlined_call_operand.hbm [shape: f32[32,64], index: 19, kind: input, shape index: {}]   ;;  %s7977_s20 = inlined_call_operand.hbm [shape: f32[1,64], index: 20, kind: input, shape index: {}]   ;;  %s7978_s21 = inlined_call_operand.hbm [shape: f32[32,32], index: 21, kind: input, shape index: {}]   ;;  %s7979_s22 = inlined_call_operand.hbm [shape: f32[1,32], index: 22, kind: input, shape index: {}]   ;;  %s7980_s23 = inlined_call_operand.vmem [shape: f32[2,1,32], index: 23, kind: output, shape index: {}]  }
   0x1   :  { %8011 = sst [smem:[#allocation44_spill]] %s7957_s0 }
   0x2   :  { %8012 = sst [smem:[#allocation45_spill]] %s7958_s1 }
   0x3   :  { %8013 = sst [smem:[#allocation46_spill]] %s7959_s2 }
   0x4   :  { %8014 = sst [smem:[#allocation47_spill]] %s7960_s3 }
   0x5   :  { %8015 = sst [smem:[#allocation48_spill]] %s7961_s4 }
   0x6   :  { %8016 = sst [smem:[#allocation49_spill]] %s7962_s5 }
   0x7   :  { %8017 = sst [smem:[#allocation50_spill]] %s7963_s6 }
   0x8   :  { %8018 = sst [smem:[#allocation51_spill]] %s7964_s7 }
   0x9   :  { %8019 = sst [smem:[#allocation52_spill]] %s7966_s9 }
   0xa   :  { %28 = vsyncpa [#allocation3], 0 }
   0xb   :  { %29 = vsyncpa [#allocation5], 0 }
   0xc   :  { %30 = vsyncpa [#allocation8], 0 }
   0xd   :  { %31 = vsyncpa [#allocation11], 0 }
   0xe   :  { %32 = vsyncpa [#allocation14], 0 }
   0xf   :  { %33 = vsyncpa [#allocation17], 0 }
  0x10   :  { %34 = vsyncpa [#allocation20], 0 }
  0x11   :  { %35 = vsyncpa [#allocation23], 0  ;;  %s6783_s4 = smov 0  }
  0x12 LB: > { %s6641_s30 = smov [#allocation4]   ;;  %s6789_s25 = sadd.s32 4294967295, %s6639_s4   ;;  %s6639_s4 = sphi %s6783_s4, %s41_s4  }
  0x13   : > { %s609_s24 = sshll.u32 %s6641_s30, 4  ;;  %p4999_p0 = scmp.ge.s32.totalorder %s6639_s4, 1  ;;  %s610_s24 = int_to_ptr.vmem [resolvable:$true] %s609_s24 }
  0x14   : > { %p585_p1 = scmp.lt.s32.totalorder %s6639_s4, 3  ;;  %p7981_p2 = scmp.eq.s32.totalorder %s6789_s25, 0 }
  0x15   : > { %s6642_s1 = smov [#allocation7]   ;;  %s6643_s2 = smov [#allocation10]  }
  0x16   : > { %p6794_p3 = pnand %p4999_p0, %p585_p1  ;;  %s631_s26 = sshll.u32 %s6642_s1, 4  ;;  %s6800_s26 = int_to_ptr.vmem [resolvable:$true] %s631_s26 }
  0x17   : > { %s658_s6 = sshll.u32 %s6643_s2, 4  ;;  %s6644_s7 = smov [#allocation13]   ;;  %s6808_s6 = int_to_ptr.vmem [resolvable:$true] %s658_s6 }
  0x18   : > { %s8020_s5 = scalar_select %p6794_p3, 1, 0 }
  0x19   : > { %p6023_p4 = pneg %p6794_p3  ;;  %s6810_s28 = sshll.u32 %s6644_s7, 4  ;;  %s686_s28 = int_to_ptr.vmem [resolvable:$true] %s6810_s28 }
  0x1a   : > { %s6248_s3 = scalar_lea.vmem %s610_s24, 16  ;;  %s6255_s0 = scalar_lea.vmem %s610_s24, 32 }
  0x1b   : > { %p6804_p5 = pnand %p7981_p2, %p6023_p4  ;;  %p6249_p7 = scmp.ne.s32.totalorder %s610_s24, %s6248_s3 }
  0x1c   : > { %p6256_p10 = scmp.lt.s32.totalorder %s610_s24, %s610_s24  ;;  %p6257_p11 = scmp.lt.s32.totalorder %s6255_s0, %s6248_s3 }
  0x1d   : > { %p6814_p6 = pneg %p6804_p5 }
  0x1e   : > { %p6258_p12 = por %p6257_p11, %p6256_p10 }
  0x1f   : > { %p6251_p8 = pnand %p6249_p7, %p6814_p6 }
  0x21   : > { %p6252_p9 = pneg %p6251_p8 }
  0x23   : > { %p6259_p13 = pnand %p6258_p12, %p6252_p9 }
  0x25   : > { %6262 = shalt.err (!%p6259_p13)
}
  0x26   : > { %s8023_s2 = sld [smem:[#allocation51_spill]]  ;;  %s6274_s7 = scalar_lea.vmem %s6800_s26, 16 }
  0x27   : > { %p6275_p0 = scmp.ne.s32.totalorder %s6800_s26, %s6274_s7  ;;  %s6281_s3 = scalar_lea.vmem %s6800_s26, 32 }
  0x28   : > { %p6282_p7 = scmp.lt.s32.totalorder %s6800_s26, %s6800_s26  ;;  %p6283_p8 = scmp.lt.s32.totalorder %s6281_s3, %s6274_s7 }
  0x29   : > { %p6277_p1 = pnand %p6275_p0, %p6814_p6 }
  0x2a   : > { %p6284_p9 = por %p6283_p8, %p6282_p7 }
  0x2b   : > { %p6278_p4 = pneg %p6277_p1 }
  0x2c   : > { %6029 = dma.hbm_to_vmem [thread:$0]  (!%p6804_p5), %s8023_s2, 16, %s610_s24, [#allocation5]  }
  0x2d   : > { %p6285_p10 = pnand %p6284_p9, %p6278_p4 }
  0x2f   : > { %6288 = shalt.err (!%p6285_p10)
}
  0x30   : > { %s8024_s9 = sld [smem:[#allocation52_spill]]  ;;  %s6300_s24 = scalar_lea.vmem %s6808_s6, 16 }
  0x31   : > { %p6301_p11 = scmp.ne.s32.totalorder %s6808_s6, %s6300_s24  ;;  %s6307_s1 = scalar_lea.vmem %s6808_s6, 32 }
  0x32   : > { %p6308_p0 = scmp.lt.s32.totalorder %s6808_s6, %s6808_s6  ;;  %p6309_p1 = scmp.lt.s32.totalorder %s6307_s1, %s6300_s24 }
  0x33   : > { %p6303_p12 = pnand %p6301_p11, %p6814_p6 }
  0x34   : > { %p6310_p4 = por %p6309_p1, %p6308_p0 }
  0x35   : > { %p6304_p13 = pneg %p6303_p12 }
  0x36   : > { %6035 = dma.hbm_to_vmem [thread:$0]  (!%p6804_p5), %s8024_s9, 16, %s6800_s26, [#allocation8]  }
  0x37   : > { %p6311_p7 = pnand %p6310_p4, %p6304_p13 }
  0x39   : > { %6314 = shalt.err (!%p6311_p7)
}
  0x3a   : > { %6041 = dma.hbm_to_vmem [thread:$0]  (!%p6804_p5), %s7969_s12, 16, %s6808_s6, [#allocation11]  }
  0x3b   : > { %s6326_s26 = scalar_lea.vmem %s686_s28, 512  ;;  %p6334_p11 = scmp.lt.s32.totalorder %s686_s28, %s686_s28 }
  0x3c   : > { %p6327_p8 = scmp.ne.s32.totalorder %s686_s28, %s6326_s26  ;;  %p6335_p12 = scmp.lt.s32.totalorder %s6326_s26, %s6326_s26 }
  0x3e   : > { %p6329_p9 = pnand %p6327_p8, %p6814_p6  ;;  %p6336_p0 = por %p6335_p12, %p6334_p11 }
  0x40   : > { %p6330_p10 = pneg %p6329_p9 }
  0x42   : > { %p6337_p13 = pnand %p6336_p0, %p6330_p10 }
  0x44   : > { %6340 = shalt.err (!%p6337_p13)
}
  0x45   : > { %s7982_s3 = smov 128   ;;  %s7985_s0 = smov 8  }
  0x46   : > { %6047 = dma.hbm_to_vmem [thread:$0]  (!%p6804_p5), %s7973_s16, 512, %s686_s28, [#allocation14], %s7982_s3, %s7982_s3, %s7985_s0  }
  0x47   : > { %s6647_s24 = smov [#allocation16]   ;;  %s6648_s2 = smov [#allocation19]  }
  0x48   : > { %s710_s1 = sshll.u32 %s6647_s24, 4  ;;  %s734_s7 = sshll.u32 %s6648_s2, 4  ;;  %s711_s1 = int_to_ptr.vmem [resolvable:$true] %s710_s1  ;;  %s735_s7 = int_to_ptr.vmem [resolvable:$true] %s734_s7 }
  0x49   : > { %s6352_s26 = scalar_lea.vmem %s711_s1, 16  ;;  %s6359_s9 = scalar_lea.vmem %s711_s1, 32 }
  0x4a   : > { %p6353_p1 = scmp.ne.s32.totalorder %s711_s1, %s6352_s26  ;;  %p6360_p8 = scmp.lt.s32.totalorder %s711_s1, %s711_s1 }
  0x4b   : > { %p6361_p9 = scmp.lt.s32.totalorder %s6359_s9, %s6352_s26 }
  0x4c   : > { %p6355_p4 = pnand %p6353_p1, %p6814_p6 }
  0x4d   : > { %p6362_p10 = por %p6361_p9, %p6360_p8 }
  0x4e   : > { %p6356_p7 = pneg %p6355_p4 }
  0x50   : > { %p6363_p11 = pnand %p6362_p10, %p6356_p7 }
  0x52   : > { %6366 = shalt.err (!%p6363_p11)
}
  0x53   : > { %6053 = dma.hbm_to_vmem [thread:$0]  (!%p6804_p5), %s7975_s18, 16, %s711_s1, [#allocation17]  }
  0x54   : > { %s6378_s30 = scalar_lea.vmem %s735_s7, 16  ;;  %s6385_s24 = scalar_lea.vmem %s735_s7, 32 }
  0x55   : > { %p6379_p12 = scmp.ne.s32.totalorder %s735_s7, %s6378_s30  ;;  %p6386_p1 = scmp.lt.s32.totalorder %s735_s7, %s735_s7 }
  0x56   : > { %p6387_p4 = scmp.lt.s32.totalorder %s6385_s24, %s6378_s30 }
  0x57   : > { %p6381_p0 = pnand %p6379_p12, %p6814_p6 }
  0x58   : > { %p6388_p2 = por %p6387_p4, %p6386_p1 }
  0x59   : > { %p6382_p13 = pneg %p6381_p0 }
  0x5b   : > { %p6389_p8 = pnand %p6388_p2, %p6382_p13 }
  0x5d   : > { %6392 = shalt.err (!%p6389_p8)
}
  0x5e   : > { %6059 = dma.hbm_to_vmem [thread:$0]  (!%p6804_p5), %s7977_s20, 16, %s735_s7, [#allocation20]  }
  0x5f   : > { %s6649_s1 = smov [#allocation2]   ;;  %s6650_s6 = smov [#allocation6]  }
  0x60   : > { %s598_s26 = sshll.u32 %s6649_s1, 4  ;;  %s620_s28 = sshll.u32 %s6650_s6, 4  ;;  %s599_s26 = int_to_ptr.vmem [resolvable:$true] %s598_s26  ;;  %s621_s28 = int_to_ptr.vmem [resolvable:$true] %s620_s28 }
  0x61   : > { %s6404_s3 = scalar_lea.vmem %s599_s26, 128  ;;  %p6412_p11 = scmp.lt.s32.totalorder %s599_s26, %s599_s26 }
  0x62   : > { %p6405_p7 = scmp.ne.s32.totalorder %s599_s26, %s6404_s3  ;;  %p6413_p2 = scmp.lt.s32.totalorder %s6404_s3, %s6404_s3 }
  0x64   : > { %p6407_p9 = pnand %p6405_p7, %p6814_p6  ;;  %p6414_p12 = por %p6413_p2, %p6412_p11 }
  0x66   : > { %p6408_p10 = pneg %p6407_p9 }
  0x68   : > { %p6415_p0 = pnand %p6414_p12, %p6408_p10 }
  0x6a   : > { %6418 = shalt.err (!%p6415_p0)
}
  0x6b   : > { %s8025_s7 = sld [smem:[#allocation50_spill]]  ;;  %s6430_s9 = scalar_lea.vmem %s621_s28, 64 }
  0x6c   : > { %p6431_p13 = scmp.ne.s32.totalorder %s621_s28, %s6430_s9  ;;  %p6438_p8 = scmp.lt.s32.totalorder %s621_s28, %s621_s28 }
  0x6d   : > { %p6439_p7 = scmp.lt.s32.totalorder %s6430_s9, %s6430_s9 }
  0x6e   : > { %p6433_p1 = pnand %p6431_p13, %p6814_p6 }
  0x6f   : > { %p6440_p9 = por %p6439_p7, %p6438_p8 }
  0x70   : > { %p6434_p4 = pneg %p6433_p1 }
  0x71   : > { %6026 = dma.hbm_to_vmem [thread:$0]  (!%p6804_p5), %s8025_s7, 128, %s599_s26, [#allocation3]  }
  0x72   : > { %p6441_p3 = pnand %p6440_p9, %p6434_p4 }
  0x74   : > { %6444 = shalt.err (!%p6441_p3)
}
  0x75   : > { %6032 = dma.hbm_to_vmem [thread:$0]  (!%p6804_p5), %s7965_s8, 64, %s621_s28, [#allocation5]  }
  0x76   : > { %s6651_s1 = smov [#allocation9]   ;;  %s6652_s6 = smov [#allocation12]  }
  0x77   : > { %s644_s26 = sshll.u32 %s6651_s1, 4  ;;  %s672_s30 = sshll.u32 %s6652_s6, 4  ;;  %s645_s26 = int_to_ptr.vmem [resolvable:$true] %s644_s26  ;;  %s673_s30 = int_to_ptr.vmem [resolvable:$true] %s672_s30 }
  0x78   : > { %s6456_s24 = scalar_lea.vmem %s645_s26, 256  ;;  %p6464_p12 = scmp.lt.s32.totalorder %s645_s26, %s645_s26 }
  0x79   : > { %p6457_p10 = scmp.ne.s32.totalorder %s645_s26, %s6456_s24  ;;  %p6465_p0 = scmp.lt.s32.totalorder %s6456_s24, %s6456_s24 }
  0x7b   : > { %p6459_p11 = pnand %p6457_p10, %p6814_p6  ;;  %p6466_p3 = por %p6465_p0, %p6464_p12 }
  0x7d   : > { %p6460_p2 = pneg %p6459_p11 }
  0x7f   : > { %p6467_p13 = pnand %p6466_p3, %p6460_p2 }
  0x81   : > { %6470 = shalt.err (!%p6467_p13)
}
  0x82   : > { %s8026_s7 = smov 128   ;;  %s6482_s3 = scalar_lea.vmem %s673_s30, 16 }
  0x83   : > { %6038 = dma.hbm_to_vmem [thread:$0]  (!%p6804_p5), %s7968_s11, 256, %s645_s26, [#allocation8], %s8026_s7, %s8026_s7, %s7985_s0  }
  0x84   : > { %p6483_p1 = scmp.ne.s32.totalorder %s673_s30, %s6482_s3  ;;  %s6489_s2 = scalar_lea.vmem %s673_s30, 32 }
  0x85   : > { %p6490_p7 = scmp.lt.s32.totalorder %s673_s30, %s673_s30  ;;  %p6491_p9 = scmp.lt.s32.totalorder %s6489_s2, %s6482_s3 }
  0x86   : > { %p6485_p4 = pnand %p6483_p1, %p6814_p6 }
  0x87   : > { %p6492_p10 = por %p6491_p9, %p6490_p7 }
  0x88   : > { %p6486_p8 = pneg %p6485_p4 }
  0x8a   : > { %p6493_p11 = pnand %p6492_p10, %p6486_p8 }
  0x8c   : > { %6496 = shalt.err (!%p6493_p11)
}
  0x8d   : > { %6044 = dma.hbm_to_vmem [thread:$0]  (!%p6804_p5), %s7971_s14, 16, %s673_s30, [#allocation11]  }
  0x8e   : > { %s6653_s26 = smov [#allocation15]   ;;  %s6654_s28 = smov [#allocation18]  }
  0x8f   : > { %s699_s24 = sshll.u32 %s6653_s26, 4  ;;  %s720_s9 = sshll.u32 %s6654_s28, 4  ;;  %s700_s24 = int_to_ptr.vmem [resolvable:$true] %s699_s24  ;;  %s721_s9 = int_to_ptr.vmem [resolvable:$true] %s720_s9 }
  0x90   : > { %s6508_s0 = scalar_lea.vmem %s700_s24, 16  ;;  %s6515_s3 = scalar_lea.vmem %s700_s24, 32 }
  0x91   : > { %p6509_p2 = scmp.ne.s32.totalorder %s700_s24, %s6508_s0  ;;  %p6516_p3 = scmp.lt.s32.totalorder %s700_s24, %s700_s24 }
  0x92   : > { %p6517_p13 = scmp.lt.s32.totalorder %s6515_s3, %s6508_s0 }
  0x93   : > { %p6511_p12 = pnand %p6509_p2, %p6814_p6 }
  0x94   : > { %p6518_p1 = por %p6517_p13, %p6516_p3 }
  0x95   : > { %p6512_p0 = pneg %p6511_p12 }
  0x97   : > { %p6519_p4 = pnand %p6518_p1, %p6512_p0 }
  0x99   : > { %6522 = shalt.err (!%p6519_p4)
}
  0x9a   : > { %6050 = dma.hbm_to_vmem [thread:$0]  (!%p6804_p5), %s7974_s17, 16, %s700_s24, [#allocation14]  }
  0x9b   : > { %s6534_s1 = scalar_lea.vmem %s721_s9, 512  ;;  %p6542_p10 = scmp.lt.s32.totalorder %s721_s9, %s721_s9 }
  0x9c   : > { %p6535_p8 = scmp.ne.s32.totalorder %s721_s9, %s6534_s1  ;;  %p6543_p11 = scmp.lt.s32.totalorder %s6534_s1, %s6534_s1 }
  0x9e   : > { %p6537_p7 = pnand %p6535_p8, %p6814_p6  ;;  %p6544_p2 = por %p6543_p11, %p6542_p10 }
  0xa0   : > { %p6538_p9 = pneg %p6537_p7 }
  0xa2   : > { %p6545_p12 = pnand %p6544_p2, %p6538_p9 }
  0xa4   : > { %6548 = shalt.err (!%p6545_p12)
}
  0xa5   : > { %s8027_s0 = smov 8   ;;  %s6655_s24 = smov [#allocation21]  }
  0xa6   : > { %6056 = dma.hbm_to_vmem [thread:$0]  (!%p6804_p5), %s7976_s19, 512, %s721_s9, [#allocation17], %s8026_s7, %s8026_s7, %s8027_s0  }
  0xa7   : > { %s744_s28 = sshll.u32 %s6655_s24, 4  ;;  %s6656_s3 = smov [#allocation22]   ;;  %s745_s28 = int_to_ptr.vmem [resolvable:$true] %s744_s28 }
  0xa8   : > { %s758_s2 = sshll.u32 %s6656_s3, 4  ;;  %s6560_s30 = scalar_lea.vmem %s745_s28, 512  ;;  %s759_s2 = int_to_ptr.vmem [resolvable:$true] %s758_s2 }
  0xa9   : > { %p6561_p0 = scmp.ne.s32.totalorder %s745_s28, %s6560_s30  ;;  %p6568_p1 = scmp.lt.s32.totalorder %s745_s28, %s745_s28 }
  0xaa   : > { %p6569_p4 = scmp.lt.s32.totalorder %s6560_s30, %s6560_s30 }
  0xab   : > { %p6563_p3 = pnand %p6561_p0, %p6814_p6 }
  0xac   : > { %p6570_p8 = por %p6569_p4, %p6568_p1 }
  0xad   : > { %p6564_p13 = pneg %p6563_p3 }
  0xaf   : > { %p6571_p7 = pnand %p6570_p8, %p6564_p13 }
  0xb1   : > { %6574 = shalt.err (!%p6571_p7)
}
  0xb2   : > { %6062 = dma.hbm_to_vmem [thread:$0]  (!%p6804_p5), %s7978_s21, 512, %s745_s28, [#allocation20], %s8026_s7, %s8026_s7, %s8027_s0  }
  0xb3   : > { %s6586_s6 = scalar_lea.vmem %s759_s2, 16  ;;  %s6593_s26 = scalar_lea.vmem %s759_s2, 32 }
  0xb4   : > { %p6587_p9 = scmp.ne.s32.totalorder %s759_s2, %s6586_s6  ;;  %p6594_p2 = scmp.lt.s32.totalorder %s759_s2, %s759_s2 }
  0xb5   : > { %p6595_p12 = scmp.lt.s32.totalorder %s6593_s26, %s6586_s6 }
  0xb6   : > { %p6589_p10 = pnand %p6587_p9, %p6814_p6 }
  0xb7   : > { %p6596_p0 = por %p6595_p12, %p6594_p2 }
  0xb8   : > { %p6590_p11 = pneg %p6589_p10 }
  0xba   : > { %p6597_p3 = pnand %p6596_p0, %p6590_p11 }
  0xbc   : > { %6600 = shalt.err (!%p6597_p3)
}
  0xbd   : > { %6065 = dma.hbm_to_vmem [thread:$0]  (!%p6804_p5), %s7979_s22, 16, %s759_s2, [#allocation23]  }
  0xbe   : > { %p8028_p13 = scmp.ne.s32.totalorder %s8020_s5, 0 }
  0xc0   : > { %817 = sbr.rel (%p8028_p13) target bundleno = 8462 (0x210e), region = 112 }
  0xc5   : > { %p8029_p1 = scmp.eq.s32.totalorder %s6789_s25, 0 }
  0xc7   : > { %6606 = dma.done.wait (%p8029_p1), [#allocation3], 128   ;;  %p8030_p6 = pmov %p8029_p1 }
  0xc8   : > { %p8031_p4 = pmov %p8029_p1 }
  0xc9   : > { %6608 = vsyncadd (%p8030_p6), [#allocation3], 4294967168 }
  0xca   : > { %6610 = dma.done.wait (%p8031_p4), [#allocation5], 80   ;;  %p8032_p8 = pmov %p8029_p1 }
  0xcb   : > { %p8033_p7 = pmov %p8029_p1 }
  0xcc   : > { %6612 = vsyncadd (%p8032_p8), [#allocation5], 4294967216 }
  0xcd   : > { %6614 = dma.done.wait (%p8033_p7), [#allocation8], 272   ;;  %p8034_p5 = pmov %p8029_p1 }
  0xce   : > { %p8035_p9 = pmov %p8029_p1 }
  0xcf   : > { %6616 = vsyncadd (%p8034_p5), [#allocation8], 4294967024 }
  0xd0   : > { %6618 = dma.done.wait (%p8035_p9), [#allocation11], 32   ;;  %p8036_p10 = pmov %p8029_p1 }
  0xd1   : > { %p8037_p11 = pmov %p8029_p1 }
  0xd2   : > { %6620 = vsyncadd (%p8036_p10), [#allocation11], 4294967264 }
  0xd3   : > { %6622 = dma.done.wait (%p8037_p11), [#allocation14], 528   ;;  %p8038_p2 = pmov %p8029_p1 }
  0xd4   : > { %p8039_p12 = pmov %p8029_p1 }
  0xd5   : > { %6624 = vsyncadd (%p8038_p2), [#allocation14], 4294966768 }
  0xd6   : > { %6626 = dma.done.wait (%p8039_p12), [#allocation17], 528   ;;  %p8040_p0 = pmov %p8029_p1 }
  0xd8   : > { %6628 = vsyncadd (%p8040_p0), [#allocation17], 4294966768  ;;  %p8041_p3 = pmov %p8040_p0 }
  0xd9   : > { %p8042_p13 = pmov %p8040_p0 }
  0xda   : > { %6630 = dma.done.wait (%p8041_p3), [#allocation20], 528  }
  0xdb   : > { %6632 = vsyncadd (%p8042_p13), [#allocation20], 4294966768  ;;  %p8043_p1 = pmov %p8040_p0 }
  0xdc   : > { %p8044_p6 = pmov %p8040_p0 }
  0xdd   : > { %6634 = dma.done.wait (%p8043_p1), [#allocation23], 16  }
  0xde   : > { %6636 = vsyncadd (%p8044_p6), [#allocation23], 4294967280  ;;  %p954_p4 = scmp.lt.s32.totalorder %s6789_s25, 1  ;;  %v6657_v0 = vmov 0   ;;  %vm1113_vm0 = vcmask 1043456   ;;  %s8045_s0 = sld [smem:[#allocation45_spill]]  ;;  %v7987_v20 = vlaneseq }
  0xdf   : > { %6124 = vset.pattern.permute.xlu0 %v6657_v0  ;;  %6125 = vset.pattern.permute.xlu1 %v6657_v0  ;;  %s8046_s9 = sld [smem:[#allocation44_spill]]  ;;  %vm1100_vm1 = vcmask 31744   ;;  %v1092_v1 = vld [vmem:[#allocation6] sm:$0xf]  ;;  %v1002_v2 = vld [vmem:[#allocation2] sm:$0xff]  ;;  %vm1010_vm2 = vcmask 64512  }
  0xe0   : > { %s8078_s25 = smov (!%p954_p4, %s6789_s25), 1  ;;  %s8047_s24 = sld [smem:[#allocation47_spill]]  ;;  %5454 = vmatprep.subr.msk.mxu1 %vm1113_vm0, %v1092_v1  ;;  %5449 = vmatprep.subr.mxu0 %v1002_v2  ;;  %v1273_v17 = vld [vmem:[#allocation9 + $0x8] sm:$0xff]  ;;  %v1272_v18 = vld [vmem:[#allocation9] sm:$0xff]  ;;  %v7005_v22 = vand.u32 127, %v7987_v20  ;;  %vm1281_vm4 = vcmask 130048  }
  0xe1   : > { %s6980_s5 = sshll.u32 %s8078_s25, 5  ;;  %s5164_s27 = sshll.u32 %s8078_s25, 4  ;;  %5455 = vmatpush3.msk.msra.mxu1 %vm1113_vm0, %v1092_v1  ;;  %5450 = vmatpush3.msra.mxu0 %v1002_v2  ;;  %v5040_v24 = vld [vmem:[#allocation4] ss:$0 sm:$0xff]  ;;  %v5043_v28 = vld [vmem:[#allocation7] ss:$0 sm:$0xff] }
  0xe2   : > { %5462 = vmatprep.subr.mxu0 %v1273_v17  ;;  %5963 = vmatprep.subr.mxu1 %v1273_v17  ;;  %8049 = vst [vmem:[#allocation32_spill] sm:$0xff] %v7005_v22  ;;  %v7988_v33 = vmov 0.0   ;;  %v7027_v43 = vld [vmem:[%s7970_s13 + $0x78] sm:$0xff]  ;;  %v7048_v47 = vld [vmem:[%s7970_s13 + $0x70] sm:$0xff]  ;;  %v7064_v50 = vld [vmem:[%s7970_s13 + $0x68] sm:$0xff]  ;;  %s6659_s29 = smov 32  }
  0xe3   : > { %v7081_v53 = vld [vmem:[%s7970_s13 + $0x60] sm:$0xff]  ;;  %v7095_v55 = vld [vmem:[%s7970_s13 + $0x58] sm:$0xff]  ;;  %v7107_v57 = vld [vmem:[%s7970_s13 + $0x50] sm:$0xff]  ;;  %vm1632_vm12 = vcmask 261120   ;;  %vm1637_vm13 = vcmask 523264   ;;  %s6660_s7 = smov 64  }
  0xe4   : > { %s963_s28 = scalar_lea.vmem %s8045_s0, %s6980_s5  ;;  %s8048_s0 = sld [smem:[#allocation46_spill]]  ;;  %v7114_v58 = vld [vmem:[%s7970_s13 + $0x48] sm:$0xff]  ;;  %v7121_v59 = vld [vmem:[%s7970_s13 + $0x40] sm:$0xff]  ;;  %v7128_v60 = vld [vmem:[%s7970_s13 + $0x38] sm:$0xff]  ;;  %vm2276_vm0 = vcmask 785408  }
  0xe5   : > { %s958_s1 = scalar_lea.vmem %s8046_s9, %s5164_s27  ;;  %v987_v3 = vld [vmem:[%s963_s28] sm:$0xff]  ;;  %v988_v6 = vld [vmem:[%s963_s28 + $0x8] sm:$0xff]  ;;  %v989_v7 = vld [vmem:[%s963_s28 + $0x10] sm:$0xff]  ;;  %s8052_s9 = sld [smem:[#allocation49_spill]] }
  0xe6   : > { %s973_s3 = scalar_lea.vmem %s8047_s24, %s6980_s5  ;;  %v985_v4 = vld [vmem:[%s958_s1] sm:$0xff]  ;;  %v986_v5 = vld [vmem:[%s958_s1 + $0x8] sm:$0xff]  ;;  %5456 = vmatprep.mubr.msk.f32.mxu1 %vm1100_vm1, %v987_v3  ;;  %v990_v10 = vld [vmem:[%s963_s28 + $0x18] sm:$0xff]  ;;  %s6661_s6 = smov 96  }
  0xe7   : > { %v995_v8 = vld [vmem:[%s973_s3] sm:$0xff]  ;;  %5451 = vmatprep.mubr.msk.f32.mxu0 %vm1010_vm2, %v985_v4  ;;  %v997_v9 = vld [vmem:[%s973_s3 + $0x10] sm:$0xff]  ;;  %5457 = vmatmul.mubr.msk.f32.vlgmr.msra.gmra.mxu1 %vm1100_vm1, %v988_v6  ;;  %v996_v11 = vld [vmem:[%s973_s3 + $0x8] sm:$0xff] }
  0xe8   : > { %5452 = vmatmul.mubr.msk.f32.vlgmr.msra.gmra.mxu0 %vm1010_vm2, %v986_v5  ;;  %5459 = vmatprep.mubr.msk.f32.mxu1 %vm1100_vm1, %v989_v7  ;;  %v998_v12 = vld [vmem:[%s973_s3 + $0x18] sm:$0xff]  ;;  %v7135_v61 = vld [vmem:[%s7970_s13 + $0x30] sm:$0xff]  ;;  %v7142_v62 = vld [vmem:[%s7970_s13 + $0x28] sm:$0xff] }
  0xe9   : > { %1229 = vperm.xlu0 %6124, %v995_v8   ;;  %1235 = vperm.xlu1 %6125, %v997_v9   ;;  %v7149_v63 = vld [vmem:[%s7970_s13 + $0x20] sm:$0xff]  ;;  %v7156_v0 = vld [vmem:[%s7970_s13 + $0x18] sm:$0xff]  ;;  %v7163_v1 = vld [vmem:[%s7970_s13 + $0x10] sm:$0xff] }
  0xea   : > { %s968_s2 = scalar_lea.vmem %s8048_s0, %s6980_s5  ;;  %5463 = vmatpush3.msra.mxu0 %v1273_v17  ;;  %5965 = vmatpush3.msra.mxu1 %v1273_v17  ;;  %v7170_v2 = vld [vmem:[%s7970_s13 + $0x8] sm:$0xff]  ;;  %v7177_v3 = vld [vmem:[%s7970_s13] sm:$0xff]  ;;  %v7187_v4 = vld [vmem:[%s7967_s10 + $0x38] sm:$0xff]  ;;  %s8051_s5 = sld [smem:[#allocation48_spill]] }
  0xeb   : > { %5460 = vmatmul.mubr.msk.f32.gmra.mxu1 %vm1100_vm1, %v990_v10  ;;  %v991_v13 = vld [vmem:[%s968_s2] sm:$0xff]  ;;  %v992_v14 = vld [vmem:[%s968_s2 + $0x8] sm:$0xff]  ;;  %v993_v15 = vld [vmem:[%s968_s2 + $0x10] sm:$0xff]  ;;  %5464 = vmatprep.subr.mxu0 %v1272_v18  ;;  %s981_s1 = scalar_lea.vmem %s8052_s9, %s8078_s25  ;;  %vm6662_vm1 = vmmov 0  }
  0xec   : > { %v994_v16 = vld [vmem:[%s968_s2 + $0x18] sm:$0xff]  ;;  %5964 = vmatprep.subr.mxu1 %v1272_v18  ;;  %5465 = vmatpush3.msra.mxu0 %v1272_v18  ;;  %v7192_v5 = vld [vmem:[%s7967_s10 + $0x30] sm:$0xff]  ;;  %v7199_v6 = vld [vmem:[%s7967_s10 + $0x28] sm:$0xff] }
  0xed   : > { %1232 = vperm.xlu0 %6124, %v996_v11   ;;  %1238 = vperm.xlu1 %6125, %v998_v12   ;;  %v7206_v7 = vld [vmem:[%s7967_s10 + $0x20] sm:$0xff]  ;;  %v7213_v8 = vld [vmem:[%s7967_s10 + $0x18] sm:$0xff]  ;;  %v7220_v9 = vld [vmem:[%s7967_s10 + $0x10] sm:$0xff] }
  0xee   : > { %5966 = vmatpush3.msra.mxu1 %v1272_v18  ;;  %v7229_v10 = vld [vmem:[%s7967_s10 + $0x8] sm:$0xff]  ;;  %v7236_v11 = vld [vmem:[%s7967_s10] sm:$0xff] }
  0xf0   : > { %s978_s28 = scalar_lea.vmem %s8051_s5, %s5164_s27 }
  0xf1   : > { %1205 = vperm.xlu0 %6124, %v991_v13   ;;  %1208 = vperm.xlu1 %6125, %v992_v14  }
  0xf5   : > { %1211 = vperm.xlu0 %6124, %v993_v15   ;;  %1214 = vperm.xlu1 %6125, %v994_v16  }
 0x164   : > { %v1230_v19 = vpop.permute.xlu0 %1229  ;;  %v1236_v21 = vpop.permute.xlu1 %1235 }
 0x165   : > { %vm1240_vm3 = vcmp.eq.s32.totalorder %v7005_v22, %v1230_v19  ;;  %vm1242_vm5 = vcmp.eq.s32.totalorder %v7005_v22, %v1236_v21 }
 0x166   : > { %v7013_v34 = vsel %vm1240_vm3, 1.0, %v7988_v33  ;;  %v7034_v44 = vsel %vm1242_vm5, 1.0, %v7988_v33 }
 0x168   : > { %v1233_v23 = vpop.permute.xlu0 %1232  ;;  %v1239_v25 = vpop.permute.xlu1 %1238 }
 0x169   : > { %vm1241_vm6 = vcmp.eq.s32.totalorder %v7005_v22, %v1233_v23  ;;  %vm1243_vm9 = vcmp.eq.s32.totalorder %v7005_v22, %v1239_v25 }
 0x16a   : > { %v7037_v45 = vsel %vm1241_vm6, 1.0, %v7988_v33  ;;  %v7072_v52 = vsel %vm1243_vm9, 1.0, %v7988_v33  ;;  %vm4746_vm6 = vcmask 254976  }
 0x16c   : > { %v1206_v35 = vpop.permute.xlu0 %1205  ;;  %v1209_v39 = vpop.permute.xlu1 %1208 }
 0x16d   : > { %vm1216_vm7 = vcmp.eq.s32.totalorder %v7005_v22, %v1206_v35  ;;  %vm1217_vm8 = vcmp.eq.s32.totalorder %v7005_v22, %v1209_v39 }
 0x16e   : > { %v7052_v48 = vsel %vm1216_vm7, 1.0, %v7988_v33  ;;  %v7067_v51 = vsel %vm1217_vm8, 1.0, %v7988_v33  ;;  %vm4755_vm7 = vcmask 253952  }
 0x16f   : > { %8050 = vst [vmem:[#allocation33_spill] sm:$0xff] %v7052_v48 }
 0x170   : > { %v1212_v46 = vpop.permute.xlu0 %1211  ;;  %v1215_v49 = vpop.permute.xlu1 %1214 }
 0x171   : > { %vm1218_vm10 = vcmp.eq.s32.totalorder %v7005_v22, %v1212_v46  ;;  %vm1219_vm11 = vcmp.eq.s32.totalorder %v7005_v22, %v1215_v49  ;;  %v7450_v22 = vld [vmem:[%s7972_s15] sm:$0xff] }
 0x172   : > { %v7084_v54 = vsel %vm1218_vm10, 1.0, %v7988_v33  ;;  %v7098_v56 = vsel %vm1219_vm11, 1.0, %v7988_v33  ;;  %8062 = vst [vmem:[#allocation43_spill] sm:$0xff] %v7450_v22 }
 0x1a7   : > { %v5458_v26 = vpop.f32.mrf.mxu1 }
 0x1a8   : > { %v5453_v27 = vpop.f32.mrf.mxu0  ;;  %v1189_v36 = vadd.f32 %v5458_v26, %v5043_v28 }
 0x1a9   : > { %v7008_v29 = vadd.f32 %v5453_v27, %v5040_v24  ;;  %v1183_v30 = vpop.f32.mrf.mxu1 }
 0x1aa   : > { %v1083_v31 = vpop.f32.mrf.mxu0  ;;  %v1184_v32 = vadd.f32 %v5043_v28, %v1183_v30 }
 0x1ab   : > { %5482 = vmatprep.subr.mxu0 %v7008_v29  ;;  %5472 = vmatprep.subr.mxu1 %v7008_v29  ;;  %v7015_v37 = vadd.f32 %v5040_v24, %v1083_v31  ;;  %v5461_v38 = vpop.f32.mrf.mxu1 }
 0x1ac   : > { %5466 = vmatprep.mubr.msk.f32.mxu0 %vm1281_vm4, %v1184_v32  ;;  %v1199_v40 = vadd.f32 %v5461_v38, %v5043_v28  ;;  %v5060_v38 = vld [vmem:[#allocation10] ss:$0 sm:$0xff] }
 0x1ad   : > { %v1193_v41 = vpop.f32.mrf.mxu1  ;;  %5467 = vmatmul.mubr.msk.f32.vlgmr.msra.gmra.mxu0 %vm1281_vm4, %v1189_v36 }
 0x1ae   : > { %v1194_v42 = vadd.f32 %v5043_v28, %v1193_v41  ;;  %5483 = vmatpush3.msra.mxu0 %v7008_v29  ;;  %5486 = vmatprep.mubr.msk.f32.mxu0 %vm1281_vm4, %v7013_v34 }
 0x1af   : > { %5484 = vmatprep.subr.mxu0 %v7015_v37 }
 0x1b0   : > { %5485 = vmatpush3.msra.mxu0 %v7015_v37  ;;  %5469 = vmatprep.mubr.msk.f32.mxu1 %vm1281_vm4, %v1194_v42 }
 0x1b1   : > { %5514 = vmatprep.subr.mxu0 %v7027_v43  ;;  %5470 = vmatmul.mubr.msk.f32.vlgmr.msra.gmra.mxu1 %vm1281_vm4, %v1199_v40 }
 0x1b2   : > { %5473 = vmatpush3.msra.mxu1 %v7008_v29  ;;  %5487 = vmatmul.mubr.msk.f32.vlgmr.msra.gmra.mxu0 %vm1281_vm4, %v7037_v45 }
 0x1b3   : > { %5515 = vmatpush3.msra.mxu0 %v7027_v43  ;;  %5474 = vmatprep.subr.mxu1 %v7015_v37 }
 0x1b4   : > { %5476 = vmatprep.mubr.msk.f32.mxu1 %vm1281_vm4, %v7052_v48  ;;  %5489 = vmatprep.mubr.msk.f32.mxu0 %vm1281_vm4, %v7034_v44 }
 0x1b5   : > { %5516 = vmatprep.subr.mxu0 %v7048_v47  ;;  %5475 = vmatpush3.msra.mxu1 %v7015_v37 }
 0x1b6   : > { %5517 = vmatpush3.msra.mxu0 %v7048_v47  ;;  %5477 = vmatmul.mubr.msk.f32.vlgmr.msra.gmra.mxu1 %vm1281_vm4, %v7067_v51 }
 0x1b7   : > { %5518 = vmatprep.subr.mxu0 %v7064_v50  ;;  %5490 = vmatmul.mubr.msk.f32.gmra.mxu0 %vm1281_vm4, %v7072_v52 }
 0x1b8   : > { %5519 = vmatpush3.msra.mxu0 %v7064_v50  ;;  %5479 = vmatprep.mubr.msk.f32.mxu1 %vm1281_vm4, %v7084_v54 }
 0x1b9   : > { %5520 = vmatprep.subr.mxu0 %v7081_v53  ;;  %5492 = vmatprep.subr.mxu1 %v7187_v4 }
 0x1ba   : > { %5521 = vmatpush3.msra.mxu0 %v7081_v53  ;;  %5480 = vmatmul.mubr.msk.f32.gmra.mxu1 %vm1281_vm4, %v7098_v56 }
 0x1bb   : > { %5522 = vmatprep.subr.mxu0 %v7095_v55  ;;  %5493 = vmatpush3.msra.mxu1 %v7187_v4 }
 0x1bc   : > { %5523 = vmatpush3.msra.mxu0 %v7095_v55  ;;  %5494 = vmatprep.subr.mxu1 %v7192_v5 }
 0x1bd   : > { %5524 = vmatprep.subr.mxu0 %v7107_v57  ;;  %5495 = vmatpush3.msra.mxu1 %v7192_v5 }
 0x1be   : > { %5525 = vmatpush3.msra.mxu0 %v7107_v57  ;;  %5496 = vmatprep.subr.mxu1 %v7199_v6 }
 0x1bf   : > { %5526 = vmatprep.subr.mxu0 %v7114_v58  ;;  %5497 = vmatpush3.msra.mxu1 %v7199_v6 }
 0x1c0   : > { %5527 = vmatpush3.msra.mxu0 %v7114_v58  ;;  %5498 = vmatprep.subr.mxu1 %v7206_v7 }
 0x1c1   : > { %5528 = vmatprep.subr.mxu0 %v7121_v59  ;;  %5499 = vmatpush3.msra.mxu1 %v7206_v7 }
 0x1c2   : > { %5529 = vmatpush3.msra.mxu0 %v7121_v59  ;;  %5500 = vmatprep.subr.mxu1 %v7213_v8 }
 0x1c3   : > { %5530 = vmatprep.subr.mxu0 %v7128_v60  ;;  %5501 = vmatpush3.msra.mxu1 %v7213_v8 }
 0x1c4   : > { %5531 = vmatpush3.msra.mxu0 %v7128_v60  ;;  %5502 = vmatprep.subr.mxu1 %v7220_v9 }
 0x1c5   : > { %5532 = vmatprep.subr.mxu0 %v7135_v61  ;;  %5503 = vmatpush3.msra.mxu1 %v7220_v9 }
 0x1c6   : > { %5533 = vmatpush3.msra.mxu0 %v7135_v61  ;;  %5504 = vmatprep.subr.mxu1 %v7229_v10 }
 0x1c7   : > { %5534 = vmatprep.subr.mxu0 %v7142_v62  ;;  %5505 = vmatpush3.msra.mxu1 %v7229_v10 }
 0x1c8   : > { %5535 = vmatpush3.msra.mxu0 %v7142_v62  ;;  %5506 = vmatprep.subr.mxu1 %v7236_v11 }
 0x1c9   : > { %5536 = vmatprep.subr.mxu0 %v7149_v63  ;;  %5507 = vmatpush3.msra.mxu1 %v7236_v11 }
 0x1ca   : > { %5537 = vmatpush3.msra.mxu0 %v7149_v63 }
 0x1cb   : > { %5538 = vmatprep.subr.mxu0 %v7156_v0 }
 0x1cc   : > { %5539 = vmatpush3.msra.mxu0 %v7156_v0 }
 0x1cd   : > { %5540 = vmatprep.subr.mxu0 %v7163_v1 }
 0x1ce   : > { %5541 = vmatpush3.msra.mxu0 %v7163_v1 }
 0x1cf   : > { %5542 = vmatprep.subr.mxu0 %v7170_v2 }
 0x1d0   : > { %5543 = vmatpush3.msra.mxu0 %v7170_v2 }
 0x1d1   : > { %5544 = vmatprep.subr.mxu0 %v7177_v3 }
 0x1d2   : > { %5545 = vmatpush3.msra.mxu0 %v7177_v3 }
 0x1d3   : > { %5581 = vmatprep.subr.mxu0 %v7008_v29 }
 0x26d   : > { %v5468_v12 = vpop.f32.mrf.mxu0 }
 0x26e   : > { %v7252_v39 = vadd.f32 %v5468_v12, %v5060_v38 }
 0x26f   : > { %v1360_v13 = vpop.f32.mrf.mxu0 }
 0x270   : > { %v7254_v41 = vadd.f32 %v5060_v38, %v1360_v13 }
 0x271   : > { %v5471_v18 = vpop.f32.mrf.mxu1 }
 0x272   : > { %v5488_v14 = vpop.f32.mrf.mxu0 }
 0x273   : > { %1622 = vrot.lane.b32.xlu1 %v5488_v14, %s6659_s29  ;;  %v1370_v19 = vpop.f32.mrf.mxu1  ;;  %v7258_v14 = vadd.f32 %v5471_v18, %v5060_v38  ;;  %v7267_v18 = vld [vmem:[#allocation12] ss:$0 sm:$0xff] }
 0x274   : > { %v1597_v15 = vpop.f32.mrf.mxu0 }
 0x275   : > { %1620 = vrot.lane.b32.xlu0 %v1597_v15, %s6659_s29 }
 0x276   : > { %v5478_v21 = vpop.f32.mrf.mxu1 }
 0x277   : > { %v5491_v16 = vpop.f32.mrf.mxu0 }
 0x278   : > { %1626 = vrot.lane.b32.xlu1 %v5491_v16, %s6659_s29  ;;  %v1500_v23 = vpop.f32.mrf.mxu1 }
 0x279   : > { %v1607_v17 = vpop.f32.mrf.mxu0 }
 0x27a   : > { %1624 = vrot.lane.b32.xlu0 %v1607_v17, %s6659_s29  ;;  %v5481_v26 = vpop.f32.mrf.mxu1  ;;  %v7260_v17 = vadd.f32 %v5060_v38, %v1370_v19  ;;  %v1000_v38 = vld [vmem:[%s978_s28 + $0x8] sm:$0xff] }
 0x27c   : > { %v1510_v31 = vpop.f32.mrf.mxu1 }
 0x2e5   : > { %v1623_v24 = vpop.permute.xlu1 %1622 }
 0x2e6   : > { %v1634_v28 = vsel %vm1632_vm12, %v5478_v21, %v1623_v24 }
 0x2e7   : > { %v1621_v25 = vpop.permute.xlu0 %1620 }
 0x2e8   : > { %v1633_v27 = vsel %vm1632_vm12, %v1500_v23, %v1621_v25 }
 0x2e9   : > { %5508 = vmatprep.mubr.msk.f32.mxu1 %vm1637_vm13, %v1633_v27 }
 0x2ea   : > { %5509 = vmatmul.mubr.msk.f32.vlgmr.msra.gmra.mxu1 %vm1637_vm13, %v1634_v28  ;;  %v1627_v30 = vpop.permute.xlu1 %1626 }
 0x2eb   : > { %v1636_v36 = vsel %vm1632_vm12, %v5481_v26, %v1627_v30 }
 0x2ec   : > { %v1625_v32 = vpop.permute.xlu0 %1624 }
 0x2ed   : > { %v1635_v35 = vsel %vm1632_vm12, %v1510_v31, %v1625_v32 }
 0x2ee   : > { %5511 = vmatprep.mubr.msk.f32.mxu1 %vm1637_vm13, %v1635_v35 }
 0x2ef   : > { %5512 = vmatmul.mubr.msk.f32.gmra.mxu1 %vm1637_vm13, %v1636_v36  ;;  %v999_v36 = vld [vmem:[%s978_s28] sm:$0xff] }
 0x3aa   : > { %v5510_v40 = vpop.f32.mrf.mxu1 }
 0x3ab   : > { %v1722_v42 = vadd.f32 %v5510_v40, %v7252_v39 }
 0x3ac   : > { %v1716_v46 = vpop.f32.mrf.mxu1 }
 0x3ad   : > { %v1717_v49 = vadd.f32 %v1716_v46, %v7254_v41  ;;  %v1736_v21 = vmax.f32 %v1722_v42, 0.0 }
 0x3af   : > { %v1735_v15 = vmax.f32 %v1717_v49, 0.0  ;;  %v5513_v16 = vpop.f32.mrf.mxu1 }
 0x3b0   : > { %v1732_v23 = vadd.f32 %v5513_v16, %v7258_v14 }
 0x3b1   : > { %v1726_v24 = vpop.f32.mrf.mxu1  ;;  %5546 = vmatprep.mubr.f32.mxu0 %v1735_v15 }
 0x3b2   : > { %v1727_v12 = vadd.f32 %v1726_v24, %v7260_v17  ;;  %5547 = vmatmul.mubr.f32.vlgmr.msra.gmra.mxu0 %v1736_v21  ;;  %v1738_v25 = vmax.f32 %v1732_v23, 0.0 }
 0x3b3   : > { %5582 = vmatpush3.msra.mxu0 %v7008_v29 }
 0x3b4   : > { %v1737_v13 = vmax.f32 %v1727_v12, 0.0  ;;  %5583 = vmatprep.subr.mxu0 %v7015_v37 }
 0x3b5   : > { %5584 = vmatpush3.msra.mxu0 %v7015_v37 }
 0x3b6   : > { %5549 = vmatprep.mubr.f32.mxu0 %v1737_v13 }
 0x3b7   : > { %5550 = vmatmul.mubr.f32.gmra.mxu0 %v1738_v25 }
 0x472   : > { %v5548_v19 = vpop.f32.mrf.mxu0 }
 0x473   : > { %v1817_v26 = vadd.f32 %v5548_v19, %v7267_v18 }
 0x474   : > { %v1811_v27 = vpop.f32.mrf.mxu0 }
 0x475   : > { %v1812_v28 = vadd.f32 %v7267_v18, %v1811_v27  ;;  %1868 = vrot.lane.b32.xlu0 %v1817_v26, %s6660_s7  ;;  %v5057_v27 = vld [vmem:[%s981_s1] ss:$0 sm:$0xff] }
 0x477   : > { %v5551_v30 = vpop.f32.mrf.mxu0  ;;  %1866 = vrot.lane.b32.xlu1 %v1812_v28, %s6660_s7 }
 0x478   : > { %v1827_v31 = vadd.f32 %v5551_v30, %v7267_v18 }
 0x479   : > { %v1821_v32 = vpop.f32.mrf.mxu0 }
 0x47a   : > { %v1822_v35 = vadd.f32 %v7267_v18, %v1821_v32  ;;  %1872 = vrot.lane.b32.xlu0 %v1827_v31, %s6660_s7 }
 0x47c   : > { %1870 = vrot.lane.b32.xlu1 %v1822_v35, %s6660_s7 }
 0x498   : > { %1830 = vxpose.xlu0.b32.start [1/4] (short) (narrow) %v7052_v48, 16 }
 0x49c   : > { %1831 = vxpose.xlu0.b32.cont [2/4] (short) (narrow) %v7067_v51, 16 }
 0x4a0   : > { %1832 = vxpose.xlu0.b32.cont [3/4] (short) (narrow) %v7084_v54, 16 }
 0x4a4   : > { %1833 = vxpose.xlu0.b32.end [4/4] (short) (narrow) %v7098_v56, 16 }
 0x4a5   : > { %1959 = vxpose.xlu1.b32.start [1/4] (short) (narrow) %v7013_v34, 16 }
 0x4a9   : > { %1960 = vxpose.xlu1.b32.cont [2/4] (short) (narrow) %v7037_v45, 16 }
 0x4ad   : > { %1961 = vxpose.xlu1.b32.cont [3/4] (short) (narrow) %v7034_v44, 16 }
 0x4b1   : > { %1962 = vxpose.xlu1.b32.end [4/4] (short) (narrow) %v7072_v52, 16 }
 0x4cd   : > { %1253 = vperm.xlu0 %6124, %v999_v36  }
 0x4cf   : > { %1256 = vperm.xlu1 %6125, %v1000_v38  }
 0x4e7   : > { %v1869_v40 = vpop.permute.xlu0 %1868 }
 0x4e9   : > { %v1867_v42 = vpop.permute.xlu1 %1866 }
 0x4ec   : > { %v1873_v46 = vpop.permute.xlu0 %1872 }
 0x4ed   : > { %5552 = vmatprep.subr.mxu1 %v1873_v46 }
 0x4ee   : > { %5553 = vmatpush3.msra.mxu1 %v1873_v46  ;;  %v1871_v49 = vpop.permute.xlu1 %1870 }
 0x4ef   : > { %5554 = vmatprep.subr.mxu1 %v1871_v49 }
 0x4f0   : > { %5555 = vmatpush3.msra.mxu1 %v1871_v49 }
 0x4f1   : > { %5556 = vmatprep.subr.mxu1 %v1869_v40 }
 0x4f2   : > { %5557 = vmatpush3.msra.mxu1 %v1869_v40 }
 0x4f3   : > { %5558 = vmatprep.subr.mxu1 %v1867_v42 }
 0x4f4   : > { %5559 = vmatpush3.msra.mxu1 %v1867_v42 }
 0x4f5   : > { %5563 = vmatprep.subr.mxu1 %v1827_v31 }
 0x514   : > { %v7290_v15 = vpop.trf.xlu0 }
 0x515   : > { %5560 = vmatprep.mubr.msk.f32.mxu1 %vm1632_vm12, %v7290_v15 }
 0x518   : > { %v7294_v16 = vpop.trf.xlu0 }
 0x519   : > { %5561 = vmatmul.mubr.msk.f32.vlgmr.msra.gmra.mxu1 %vm1632_vm12, %v7294_v16 }
 0x51a   : > { %5564 = vmatpush3.msra.mxu1 %v1827_v31 }
 0x51b   : > { %5565 = vmatprep.subr.mxu1 %v1822_v35 }
 0x51c   : > { %5566 = vmatpush3.msra.mxu1 %v1822_v35 }
 0x51d   : > { %5567 = vmatprep.subr.mxu1 %v1817_v26 }
 0x51e   : > { %5568 = vmatpush3.msra.mxu1 %v1817_v26 }
 0x51f   : > { %5569 = vmatprep.subr.mxu1 %v1812_v28 }
 0x520   : > { %5570 = vmatpush3.msra.mxu1 %v1812_v28 }
 0x521   : > { %5574 = vmatprep.subr.msk.mxu1 %vm1632_vm12, %v7008_v29  ;;  %v7300_v21 = vpop.trf.xlu1 }
 0x522   : > { %5571 = vmatprep.mubr.msk.f32.mxu1 %vm1632_vm12, %v7300_v21 }
 0x525   : > { %v7304_v23 = vpop.trf.xlu1 }
 0x526   : > { %5572 = vmatmul.mubr.msk.f32.vlgmr.msra.gmra.mxu1 %vm1632_vm12, %v7304_v23 }
 0x527   : > { %5575 = vmatpush3.xpose.msk.msra.mxu1 %vm1632_vm12, %v7008_v29  ;;  %5578 = vmatprep.mubr.msk.f32.mxu1 %vm1632_vm12, %v7015_v37 }
 0x528   : > { %5576 = vmatprep.subr.msk.mxu1 %vm1632_vm12, %v7015_v37 }
 0x52b   : > { %5577 = vmatpush3.xpose.msk.msra.mxu1 %vm1632_vm12, %v7015_v37 }
 0x52e   : > { %5579 = vmatmul.mubr.msk.f32.vlgmr.msra.gmra.mxu1 %vm1632_vm12, %v7008_v29 }
 0x548   : > { %v7326_v28 = vpop.permute.xlu0 %1253 }
 0x549   : > { %8054 = vst [vmem:[#allocation35_spill] sm:$0xff] %v7326_v28  ;;  %v7334_v32 = vadd.s32 %v5057_v27, %v7326_v28 }
 0x54a   : > { %v7322_v25 = vpop.permute.xlu1 %1256 }
 0x54b   : > { %8053 = vst [vmem:[#allocation34_spill] sm:$0xff] %v7322_v25  ;;  %v7331_v31 = vadd.s32 %v5057_v27, %v7322_v25  ;;  %8056 = vst [vmem:[#allocation37_spill] sm:$0xff] %v7334_v32  ;;  %vm1264_vm15 = vcmp.eq.s32.totalorder %v7334_v32, 1 }
 0x54d   : > { %8055 = vst [vmem:[#allocation36_spill] sm:$0xff] %v7331_v31  ;;  %vm1265_vm14 = vcmp.eq.s32.totalorder %v7331_v31, 1 }
 0x5d9   : > { %v5562_v24 = vpop.f32.mrf.mxu1 }
 0x5db   : > { %v1950_v12 = vpop.f32.mrf.mxu1 }
 0x5e6   : > { %v5573_v13 = vpop.f32.mrf.mxu1 }
 0x5e7   : > { %v7324_v19 = vadd.f32 %v5573_v13, %v5562_v24 }
 0x5e8   : > { %v2063_v26 = vpop.f32.mrf.mxu1 }
 0x5e9   : > { %v7328_v30 = vadd.f32 %v2063_v26, %v1950_v12 }
 0x5ee   : > { %v5580_v35 = vpop.f32.mrf.mxu1 }
 0x5ef   : > { %v2154_v36 = vsel %vm1265_vm14, %v5580_v35, -1e+30 }
 0x5f0   : > { %v2144_v38 = vpop.f32.mrf.mxu1  ;;  %v2158_v40 = vsel %vm1281_vm4, %v2154_v36, -inf }
 0x5f1   : > { %v2153_v42 = vsel %vm1264_vm15, %v2144_v38, -1e+30  ;;  %2159 = vmax.xlane.f32.xlu1 %v2158_v40  ;;  %v7346_v38 = vld [vmem:[#allocation13 + $0x18] sm:$0xff] }
 0x5f2   : > { %v2155_v46 = vsel %vm1281_vm4, %v2153_v42, -inf  ;;  %5615 = vmatprep.subr.mxu0 %v7346_v38 }
 0x5f3   : > { %2156 = vmax.xlane.f32.xlu0 %v2155_v46 }
 0x67a   : > { %v2160_v49 = vpop.xlane.xlu1 %2159 }
 0x67b   : > { %v2162_v24 = vsub.f32 %v2154_v36, %v2160_v49 }
 0x67c   : > { %v2157_v12 = vpop.xlane.xlu0 %2156 }
 0x67d   : > { %v2161_v13 = vsub.f32 %v2153_v42, %v2157_v12  ;;  %v2165_v26 = vmul.f32 1.442695, %v2162_v24  ;;  %v7350_v12 = vld [vmem:[#allocation13 + $0x10] sm:$0xff] }
 0x67e   : > { %8057 = vst [vmem:[#allocation38_spill] sm:$0xff] %v7350_v12 }
 0x67f   : > { %v2163_v27 = vmul.f32 1.442695, %v2161_v13  ;;  %v7378_v13 = vld [vmem:[%s7972_s15 + $0x50] sm:$0xff] }
 0x681   : > { %6126 = vpow2.f32 %v2163_v27  ;;  %v7392_v27 = vld [vmem:[%s7972_s15 + $0x40] sm:$0xff] }
 0x682   : > { %6128 = vpow2.f32 %v2165_v26  ;;  %v7385_v26 = vld [vmem:[%s7972_s15 + $0x48] sm:$0xff] }
 0x68e   : > { %v6127_v35 = vpop.eup %6126 }
 0x68f   : > { %v2167_v20 = vsel %vm1281_vm4, %v6127_v35, 0.0  ;;  %v6129_v33 = vpop.eup %6128 }
 0x690   : > { %2168 = vadd.xlane.f32.xlu0 %v2167_v20  ;;  %v2170_v25 = vsel %vm1281_vm4, %v6129_v33, 0.0  ;;  %v7356_v20 = vld [vmem:[#allocation13 + $0x8] sm:$0xff] }
 0x691   : > { %8058 = vst [vmem:[#allocation39_spill] sm:$0xff] %v7356_v20 }
 0x694   : > { %2171 = vadd.xlane.f32.xlu0 %v2170_v25  ;;  %v7360_v25 = vld [vmem:[#allocation13] sm:$0xff] }
 0x695   : > { %8059 = vst [vmem:[#allocation40_spill] sm:$0xff] %v7360_v25 }
 0x719   : > { %v2169_v40 = vpop.xlane.xlu0 %2168 }
 0x71a   : > { %6130 = vrcp.f32 %v2169_v40  ;;  %v7406_v40 = vld [vmem:[%s7972_s15 + $0x30] sm:$0xff] }
 0x71d   : > { %v2172_v36 = vpop.xlane.xlu0 %2171 }
 0x71e   : > { %6132 = vrcp.f32 %v2172_v36  ;;  %v7413_v36 = vld [vmem:[%s7972_s15 + $0x28] sm:$0xff] }
 0x727   : > { %v6131_v42 = vpop.eup %6130 }
 0x728   : > { %v2174_v46 = vmul.f32 %v6131_v42, %v6127_v35  ;;  %v7399_v35 = vld [vmem:[%s7972_s15 + $0x38] sm:$0xff]  ;;  %v7420_v42 = vld [vmem:[%s7972_s15 + $0x20] sm:$0xff] }
 0x72a   : > { %5585 = vmatprep.mubr.msk.f32.mxu0 %vm1281_vm4, %v2174_v46  ;;  %v7427_v46 = vld [vmem:[%s7972_s15 + $0x18] sm:$0xff] }
 0x72b   : > { %v6133_v49 = vpop.eup %6132 }
 0x72c   : > { %v2176_v24 = vmul.f32 %v6133_v49, %v6129_v33  ;;  %v7373_v33 = vld [vmem:[%s7972_s15 + $0x58] sm:$0xff]  ;;  %v7434_v49 = vld [vmem:[%s7972_s15 + $0x10] sm:$0xff] }
 0x72d   : > { %5588 = vmatprep.subr.mxu1 %v7373_v33  ;;  %8060 = vst [vmem:[#allocation41_spill] sm:$0xff] %v7434_v49 }
 0x72e   : > { %5586 = vmatmul.mubr.msk.f32.vlgmr.msra.gmra.mxu0 %vm1281_vm4, %v2176_v24  ;;  %5589 = vmatpush3.msra.mxu1 %v7373_v33  ;;  %v7443_v24 = vld [vmem:[%s7972_s15 + $0x8] sm:$0xff] }
 0x72f   : > { %5616 = vmatpush3.msra.mxu0 %v7346_v38  ;;  %5623 = vmatprep.mubr.msk.f32.mxu0 %vm1632_vm12, %v7015_v37  ;;  %8061 = vst [vmem:[#allocation42_spill] sm:$0xff] %v7443_v24 }
 0x730   : > { %5617 = vmatprep.subr.mxu0 %v7350_v12  ;;  %5590 = vmatprep.subr.mxu1 %v7378_v13 }
 0x731   : > { %5618 = vmatpush3.msra.mxu0 %v7350_v12  ;;  %5591 = vmatpush3.msra.mxu1 %v7378_v13  ;;  %v7459_v12 = vld [vmem:[#allocation16] ss:$0 sm:$0xff] }
 0x732   : > { %5619 = vmatprep.subr.mxu0 %v7356_v20  ;;  %5592 = vmatprep.subr.mxu1 %v7385_v26 }
 0x733   : > { %5620 = vmatpush3.msra.mxu0 %v7356_v20  ;;  %5593 = vmatpush3.msra.mxu1 %v7385_v26 }
 0x734   : > { %5621 = vmatprep.subr.mxu0 %v7360_v25  ;;  %5594 = vmatprep.subr.mxu1 %v7392_v27 }
 0x735   : > { %5622 = vmatpush3.msra.mxu0 %v7360_v25  ;;  %5595 = vmatpush3.msra.mxu1 %v7392_v27 }
 0x736   : > { %5624 = vmatmul.mubr.msk.f32.vlgmr.msra.gmra.mxu0 %vm1632_vm12, %v7008_v29  ;;  %5596 = vmatprep.subr.mxu1 %v7399_v35 }
 0x737   : > { %5630 = vmatprep.mubr.msk.f32.mxu0 %vm1281_vm4, %v7052_v48  ;;  %5597 = vmatpush3.msra.mxu1 %v7399_v35 }
 0x738   : > { %5598 = vmatprep.subr.mxu1 %v7406_v40 }
 0x739   : > { %5599 = vmatpush3.msra.mxu1 %v7406_v40 }
 0x73a   : > { %5600 = vmatprep.subr.mxu1 %v7413_v36 }
 0x73b   : > { %5601 = vmatpush3.msra.mxu1 %v7413_v36 }
 0x73c   : > { %5602 = vmatprep.subr.mxu1 %v7420_v42 }
 0x73d   : > { %5603 = vmatpush3.msra.mxu1 %v7420_v42 }
 0x73e   : > { %5604 = vmatprep.subr.mxu1 %v7427_v46 }
 0x73f   : > { %5605 = vmatpush3.msra.mxu1 %v7427_v46 }
 0x740   : > { %5606 = vmatprep.subr.mxu1 %v7434_v49 }
 0x741   : > { %5607 = vmatpush3.msra.mxu1 %v7434_v49 }
 0x742   : > { %5608 = vmatprep.subr.mxu1 %v7443_v24 }
 0x743   : > { %5609 = vmatpush3.msra.mxu1 %v7443_v24 }
 0x744   : > { %5610 = vmatprep.subr.mxu1 %v7450_v22 }
 0x745   : > { %5611 = vmatpush3.msra.mxu1 %v7450_v22 }
 0x746   : > { %5668 = vmatprep.subr.mxu1 %v7027_v43 }
 0x7ee   : > { %v5587_v28 = vpop.f32.mrf.mxu0 }
 0x7ef   : > { %v2259_v48 = vsub.f32 %v7008_v29, %v5587_v28 }
 0x7f0   : > { %v2249_v25 = vpop.f32.mrf.mxu0 }
 0x7f1   : > { %v2258_v20 = vsub.f32 %v7015_v37, %v2249_v25  ;;  %2264 = vrot.lane.b32.xlu0 %v2259_v48, %s6660_s7 }
 0x7f3   : > { %2262 = vrot.lane.b32.xlu1 %v2258_v20, %s6660_s7 }
 0x7f6   : > { %v5625_v32 = vpop.f32.mrf.mxu0 }
 0x7f7   : > { %v2436_v31 = vadd.f32 %v5625_v32, %v7459_v12 }
 0x7f8   : > { %v2430_v24 = vpop.f32.mrf.mxu0 }
 0x7f9   : > { %2457 = vrot.lane.b32.xlu1 %v2436_v31, %s6660_s7  ;;  %v2431_v22 = vadd.f32 %v7459_v12, %v2430_v24 }
 0x7fd   : > { %2455 = vrot.lane.b32.xlu1 %v2431_v22, %s6660_s7 }
 0x863   : > { %v2265_v28 = vpop.permute.xlu0 %2264 }
 0x864   : > { %v2269_v20 = vsel %vm1637_vm13, %v7324_v19, %v2265_v28 }
 0x865   : > { %v2263_v49 = vpop.permute.xlu1 %2262 }
 0x866   : > { %v2268_v48 = vsel %vm1637_vm13, %v7328_v30, %v2263_v49 }
 0x867   : > { %5612 = vmatprep.mubr.msk.f32.mxu1 %vm2276_vm0, %v2268_v48 }
 0x868   : > { %5613 = vmatmul.mubr.msk.f32.vlgmr.msra.gmra.mxu1 %vm2276_vm0, %v2269_v20 }
 0x869   : > { %5669 = vmatpush3.msra.mxu1 %v7027_v43  ;;  %v7502_v43 = vld [vmem:[#allocation15] ss:$0 sm:$0xff] }
 0x86a   : > { %5670 = vmatprep.subr.mxu1 %v7048_v47 }
 0x86b   : > { %5671 = vmatpush3.msra.mxu1 %v7048_v47 }
 0x86c   : > { %5672 = vmatprep.subr.mxu1 %v7064_v50 }
 0x86d   : > { %5673 = vmatpush3.msra.mxu1 %v7064_v50 }
 0x86e   : > { %5674 = vmatprep.subr.mxu1 %v7081_v53 }
 0x86f   : > { %5675 = vmatpush3.msra.mxu1 %v7081_v53 }
 0x870   : > { %5676 = vmatprep.subr.mxu1 %v7095_v55 }
 0x871   : > { %5677 = vmatpush3.msra.mxu1 %v7095_v55 }
 0x872   : > { %5678 = vmatprep.subr.mxu1 %v7107_v57 }
 0x873   : > { %5679 = vmatpush3.msra.mxu1 %v7107_v57 }
 0x874   : > { %5680 = vmatprep.subr.mxu1 %v7114_v58 }
 0x875   : > { %5681 = vmatpush3.msra.mxu1 %v7114_v58 }
 0x876   : > { %5682 = vmatprep.subr.mxu1 %v7121_v59 }
 0x877   : > { %5683 = vmatpush3.msra.mxu1 %v7121_v59 }
 0x878   : > { %5684 = vmatprep.subr.mxu1 %v7128_v60 }
 0x879   : > { %5685 = vmatpush3.msra.mxu1 %v7128_v60 }
 0x87a   : > { %5686 = vmatprep.subr.mxu1 %v7135_v61 }
 0x87b   : > { %5687 = vmatpush3.msra.mxu1 %v7135_v61 }
 0x87c   : > { %5688 = vmatprep.subr.mxu1 %v7142_v62 }
 0x87d   : > { %5689 = vmatpush3.msra.mxu1 %v7142_v62 }
 0x87e   : > { %5690 = vmatprep.subr.mxu1 %v7149_v63 }
 0x87f   : > { %5691 = vmatpush3.msra.mxu1 %v7149_v63 }
 0x880   : > { %5692 = vmatprep.subr.mxu1 %v7156_v0 }
 0x881   : > { %5693 = vmatpush3.msra.mxu1 %v7156_v0 }
 0x882   : > { %5694 = vmatprep.subr.mxu1 %v7163_v1 }
 0x883   : > { %5695 = vmatpush3.msra.mxu1 %v7163_v1  ;;  %v2458_v1 = vpop.permute.xlu1 %2457 }
 0x884   : > { %5696 = vmatprep.subr.mxu1 %v7170_v2 }
 0x885   : > { %5697 = vmatpush3.msra.mxu1 %v7170_v2 }
 0x886   : > { %5698 = vmatprep.subr.mxu1 %v7177_v3 }
 0x887   : > { %5699 = vmatpush3.msra.mxu1 %v7177_v3  ;;  %v2456_v30 = vpop.permute.xlu1 %2455 }
 0x928   : > { %v5614_v47 = vpop.f32.mrf.mxu1 }
 0x929   : > { %v2355_v50 = vadd.f32 %v5614_v47, %v7502_v43 }
 0x92a   : > { %v2349_v53 = vpop.f32.mrf.mxu1 }
 0x92b   : > { %v2440_v55 = vadd.f32 %v2436_v31, %v2355_v50  ;;  %v2350_v57 = vadd.f32 %v7502_v43, %v2349_v53 }
 0x92d   : > { %v5095_v58 = vmul.f32 -1.442695, %v2440_v55  ;;  %v2439_v59 = vadd.f32 %v2431_v22, %v2350_v57 }
 0x92f   : > { %6134 = vpow2.f32 %v5095_v58  ;;  %v5094_v60 = vmul.f32 -1.442695, %v2439_v59 }
 0x931   : > { %6136 = vpow2.f32 %v5094_v60 }
 0x93c   : > { %v6135_v61 = vpop.eup %6134 }
 0x93d   : > { %v2448_v62 = vadd.f32 1.0, %v6135_v61 }
 0x93e   : > { %v6137_v63 = vpop.eup %6136 }
 0x93f   : > { %6138 = vrcp.f32 %v2448_v62  ;;  %v2447_v0 = vadd.f32 1.0, %v6137_v63 }
 0x941   : > { %6140 = vrcp.f32 %v2447_v0 }
 0x94c   : > { %v6139_v2 = vpop.eup %6138 }
 0x94d   : > { %v2462_v3 = vmul.f32 %v6139_v2, %v2458_v1  ;;  %v2476_v20 = vsub.f32 1.0, %v6139_v2 }
 0x94e   : > { %v6141_v19 = vpop.eup %6140 }
 0x94f   : > { %2467 = vrot.lane.b32.xlu0 %v2462_v3, %s6660_s7  ;;  %v2461_v31 = vmul.f32 %v6141_v19, %v2456_v30 }
 0x951   : > { %2465 = vrot.lane.b32.xlu1 %v2461_v31, %s6660_s7 }
 0x955   : > { %2489 = vrot.lane.b32.xlu1 %v7008_v29, %s6659_s29 }
 0x959   : > { %2487 = vrot.lane.b32.xlu1 %v7015_v37, %s6659_s29 }
 0x9c1   : > { %v2468_v22 = vpop.permute.xlu0 %2467 }
 0x9c2   : > { %v2472_v32 = vadd.f32 %v2468_v22, %v2355_v50  ;;  %v2475_v50 = vsub.f32 1.0, %v6141_v19 }
 0x9c3   : > { %v2466_v25 = vpop.permute.xlu1 %2465 }
 0x9c4   : > { %6142 = vtanh.f32 %v2472_v32  ;;  %v2471_v49 = vadd.f32 %v2466_v25, %v2350_v57 }
 0x9c6   : > { %6144 = vtanh.f32 %v2471_v49 }
 0x9c7   : > { %v2490_v48 = vpop.permute.xlu1 %2489 }
 0x9c8   : > { %v2494_v29 = vmul.f32 %v6139_v2, %v2490_v48 }
 0x9cb   : > { %v2488_v55 = vpop.permute.xlu1 %2487 }
 0x9cc   : > { %v2493_v59 = vmul.f32 %v6141_v19, %v2488_v55 }
 0x9d1   : > { %v6143_v24 = vpop.eup %6142 }
 0x9d2   : > { %2481 = vrot.lane.b32.xlu0 %v6143_v24, %s6661_s6 }
 0x9d3   : > { %v6145_v28 = vpop.eup %6144 }
 0x9d6   : > { %2479 = vrot.lane.b32.xlu0 %v6145_v28, %s6661_s6 }
 0xa44   : > { %v2482_v47 = vpop.permute.xlu0 %2481 }
 0xa45   : > { %v2486_v53 = vmul.f32 %v2482_v47, %v2476_v20 }
 0xa47   : > { %v7514_v37 = vadd.f32 %v2494_v29, %v2486_v53 }
 0xa48   : > { %v2480_v58 = vpop.permute.xlu0 %2479 }
 0xa49   : > { %v2485_v57 = vmul.f32 %v2480_v58, %v2475_v50  ;;  %2501 = vrot.lane.b32.xlu0 %v7514_v37, %s6661_s6 }
 0xa4b   : > { %v7518_v60 = vadd.f32 %v2493_v59, %v2485_v57 }
 0xa4d   : > { %2499 = vrot.lane.b32.xlu1 %v7518_v60, %s6661_s6 }
 0xabb   : > { %v7522_v61 = vpop.permute.xlu0 %2501 }
 0xabc   : > { %5626 = vmatprep.subr.mxu0 %v7522_v61  ;;  %5735 = vmatprep.subr.mxu1 %v7522_v61 }
 0xabd   : > { %5627 = vmatpush3.msra.mxu0 %v7522_v61 }
 0xabf   : > { %v7527_v62 = vpop.permute.xlu1 %2499 }
 0xac0   : > { %5628 = vmatprep.subr.mxu0 %v7527_v62 }
 0xac1   : > { %5629 = vmatpush3.msra.mxu0 %v7527_v62 }
 0xac2   : > { %5631 = vmatmul.mubr.msk.f32.vlgmr.msra.gmra.mxu0 %vm1281_vm4, %v7067_v51  ;;  %5636 = vmatprep.subr.mxu0 %v7522_v61 }
 0xac3   : > { %5633 = vmatprep.mubr.msk.f32.mxu0 %vm1281_vm4, %v7084_v54  ;;  %5637 = vmatpush3.msra.mxu0 %v7522_v61 }
 0xac4   : > { %5638 = vmatprep.subr.mxu0 %v7527_v62 }
 0xac5   : > { %5639 = vmatpush3.msra.mxu0 %v7527_v62 }
 0xac6   : > { %5634 = vmatmul.mubr.msk.f32.gmra.mxu0 %vm1281_vm4, %v7098_v56  ;;  %5646 = vmatprep.subr.mxu0 %v7187_v4 }
 0xac7   : > { %5640 = vmatprep.mubr.msk.f32.mxu0 %vm1281_vm4, %v7013_v34 }
 0xaca   : > { %5641 = vmatmul.mubr.msk.f32.vlgmr.msra.gmra.mxu0 %vm1281_vm4, %v7037_v45 }
 0xacb   : > { %5643 = vmatprep.mubr.msk.f32.mxu0 %vm1281_vm4, %v7034_v44  ;;  %5647 = vmatpush3.msra.mxu0 %v7187_v4 }
 0xacc   : > { %5648 = vmatprep.subr.mxu0 %v7192_v5 }
 0xacd   : > { %5649 = vmatpush3.msra.mxu0 %v7192_v5 }
 0xace   : > { %5644 = vmatmul.mubr.msk.f32.gmra.mxu0 %vm1281_vm4, %v7072_v52  ;;  %5650 = vmatprep.subr.mxu0 %v7199_v6 }
 0xacf   : > { %5651 = vmatpush3.msra.mxu0 %v7199_v6 }
 0xad0   : > { %5652 = vmatprep.subr.mxu0 %v7206_v7 }
 0xad1   : > { %5653 = vmatpush3.msra.mxu0 %v7206_v7 }
 0xad2   : > { %5654 = vmatprep.subr.mxu0 %v7213_v8 }
 0xad3   : > { %5655 = vmatpush3.msra.mxu0 %v7213_v8 }
 0xad4   : > { %5656 = vmatprep.subr.mxu0 %v7220_v9 }
 0xad5   : > { %5657 = vmatpush3.msra.mxu0 %v7220_v9 }
 0xad6   : > { %5658 = vmatprep.subr.mxu0 %v7229_v10 }
 0xad7   : > { %5659 = vmatpush3.msra.mxu0 %v7229_v10 }
 0xad8   : > { %5660 = vmatprep.subr.mxu0 %v7236_v11 }
 0xad9   : > { %5661 = vmatpush3.msra.mxu0 %v7236_v11 }
 0xb82   : > { %v5632_v4 = vpop.f32.mrf.mxu0 }
 0xb84   : > { %v2571_v5 = vpop.f32.mrf.mxu0 }
 0xb86   : > { %v5635_v6 = vpop.f32.mrf.mxu0 }
 0xb88   : > { %v2581_v7 = vpop.f32.mrf.mxu0 }
 0xb8a   : > { %v5642_v63 = vpop.f32.mrf.mxu0 }
 0xb8b   : > { %2681 = vrot.lane.b32.xlu1 %v5642_v63, %s6659_s29 }
 0xb8c   : > { %v2656_v8 = vpop.f32.mrf.mxu0 }
 0xb8d   : > { %2679 = vrot.lane.b32.xlu0 %v2656_v8, %s6659_s29 }
 0xb8e   : > { %v5645_v0 = vpop.f32.mrf.mxu0 }
 0xb8f   : > { %2685 = vrot.lane.b32.xlu1 %v5645_v0, %s6659_s29 }
 0xb90   : > { %v2666_v9 = vpop.f32.mrf.mxu0 }
 0xb91   : > { %2683 = vrot.lane.b32.xlu0 %v2666_v9, %s6659_s29 }
 0xbfd   : > { %v2682_v10 = vpop.permute.xlu1 %2681 }
 0xbfe   : > { %v2692_v2 = vsel %vm1632_vm12, %v5632_v4, %v2682_v10 }
 0xbff   : > { %v2680_v1 = vpop.permute.xlu0 %2679 }
 0xc00   : > { %v2691_v11 = vsel %vm1632_vm12, %v2571_v5, %v2680_v1 }
 0xc01   : > { %5662 = vmatprep.mubr.msk.f32.mxu0 %vm1637_vm13, %v2691_v11  ;;  %v2686_v3 = vpop.permute.xlu1 %2685 }
 0xc02   : > { %5663 = vmatmul.mubr.msk.f32.vlgmr.msra.gmra.mxu0 %vm1637_vm13, %v2692_v2  ;;  %v2694_v31 = vsel %vm1632_vm12, %v5635_v6, %v2686_v3 }
 0xc03   : > { %v2684_v19 = vpop.permute.xlu0 %2683 }
 0xc04   : > { %v2693_v30 = vsel %vm1632_vm12, %v2581_v7, %v2684_v19 }
 0xc05   : > { %5665 = vmatprep.mubr.msk.f32.mxu0 %vm1637_vm13, %v2693_v30 }
 0xc06   : > { %5666 = vmatmul.mubr.msk.f32.gmra.mxu0 %vm1637_vm13, %v2694_v31 }
 0xc07   : > { %5714 = vmatprep.mubr.msk.f32.mxu0 %vm1632_vm12, %v7290_v15 }
 0xcc2   : > { %v5664_v22 = vpop.f32.mrf.mxu0 }
 0xcc3   : > { %v2779_v32 = vadd.f32 %v5664_v22, %v7252_v39 }
 0xcc4   : > { %v2773_v25 = vpop.f32.mrf.mxu0 }
 0xcc5   : > { %v2774_v49 = vadd.f32 %v2773_v25, %v7254_v41  ;;  %v2793_v48 = vmax.f32 %v2779_v32, 0.0 }
 0xcc6   : > { %v5667_v24 = vpop.f32.mrf.mxu0 }
 0xcc7   : > { %v2792_v28 = vmax.f32 %v2774_v49, 0.0  ;;  %v2789_v20 = vadd.f32 %v5667_v24, %v7258_v14 }
 0xcc8   : > { %v2783_v47 = vpop.f32.mrf.mxu0 }
 0xcc9   : > { %v2784_v29 = vadd.f32 %v2783_v47, %v7260_v17  ;;  %5700 = vmatprep.mubr.f32.mxu1 %v2792_v28  ;;  %v2795_v55 = vmax.f32 %v2789_v20, 0.0 }
 0xcca   : > { %5701 = vmatmul.mubr.f32.vlgmr.msra.gmra.mxu1 %v2793_v48 }
 0xccb   : > { %v2794_v53 = vmax.f32 %v2784_v29, 0.0  ;;  %5736 = vmatpush3.msra.mxu1 %v7522_v61 }
 0xccc   : > { %5737 = vmatprep.subr.mxu1 %v7527_v62 }
 0xccd   : > { %5738 = vmatpush3.msra.mxu1 %v7527_v62  ;;  %5703 = vmatprep.mubr.f32.mxu1 %v2794_v53 }
 0xcce   : > { %5704 = vmatmul.mubr.f32.gmra.mxu1 %v2795_v55  ;;  %5769 = vmatprep.subr.mxu1 %v7346_v38 }
 0xd8a   : > { %v5702_v50 = vpop.f32.mrf.mxu1 }
 0xd8b   : > { %v2868_v6 = vadd.f32 %v5702_v50, %v7267_v18 }
 0xd8c   : > { %v2862_v58 = vpop.f32.mrf.mxu1 }
 0xd8d   : > { %v2863_v7 = vadd.f32 %v7267_v18, %v2862_v58 }
 0xd8e   : > { %v5705_v59 = vpop.f32.mrf.mxu1 }
 0xd8f   : > { %v2878_v57 = vadd.f32 %v5705_v59, %v7267_v18 }
 0xd90   : > { %v2872_v4 = vpop.f32.mrf.mxu1 }
 0xd91   : > { %v2873_v5 = vadd.f32 %v7267_v18, %v2872_v4  ;;  %2891 = vrot.lane.b32.xlu0 %v2878_v57, %s6660_s7  ;;  %v8063_v18 = vld [vmem:[#allocation41_spill] sm:$0xff]  ;;  %v8068_v4 = vld [vmem:[#allocation38_spill] sm:$0xff] }
 0xd93   : > { %2889 = vrot.lane.b32.xlu1 %v2873_v5, %s6660_s7 }
 0xd95   : > { %2887 = vrot.lane.b32.xlu0 %v2868_v6, %s6660_s7 }
 0xd97   : > { %2885 = vrot.lane.b32.xlu1 %v2863_v7, %s6660_s7 }
 0xe03   : > { %v2892_v63 = vpop.permute.xlu0 %2891 }
 0xe04   : > { %5706 = vmatprep.subr.mxu0 %v2892_v63 }
 0xe05   : > { %5707 = vmatpush3.msra.mxu0 %v2892_v63  ;;  %v2890_v8 = vpop.permute.xlu1 %2889 }
 0xe06   : > { %5708 = vmatprep.subr.mxu0 %v2890_v8 }
 0xe07   : > { %v2888_v0 = vpop.permute.xlu0 %2887  ;;  %5709 = vmatpush3.msra.mxu0 %v2890_v8 }
 0xe08   : > { %5710 = vmatprep.subr.mxu0 %v2888_v0 }
 0xe09   : > { %5711 = vmatpush3.msra.mxu0 %v2888_v0  ;;  %v2886_v9 = vpop.permute.xlu1 %2885 }
 0xe0a   : > { %5712 = vmatprep.subr.mxu0 %v2886_v9 }
 0xe0b   : > { %5713 = vmatpush3.msra.mxu0 %v2886_v9 }
 0xe0c   : > { %5715 = vmatmul.mubr.msk.f32.vlgmr.msra.gmra.mxu0 %vm1632_vm12, %v7294_v16  ;;  %5717 = vmatprep.subr.mxu0 %v2878_v57 }
 0xe0d   : > { %5718 = vmatpush3.msra.mxu0 %v2878_v57  ;;  %5725 = vmatprep.mubr.msk.f32.mxu0 %vm1632_vm12, %v7300_v21 }
 0xe0e   : > { %5719 = vmatprep.subr.mxu0 %v2873_v5 }
 0xe0f   : > { %5720 = vmatpush3.msra.mxu0 %v2873_v5  ;;  %v8069_v5 = vld [vmem:[#allocation39_spill] sm:$0xff] }
 0xe10   : > { %5721 = vmatprep.subr.mxu0 %v2868_v6 }
 0xe11   : > { %5722 = vmatpush3.msra.mxu0 %v2868_v6  ;;  %v8070_v6 = vld [vmem:[#allocation40_spill] sm:$0xff] }
 0xe12   : > { %5723 = vmatprep.subr.mxu0 %v2863_v7 }
 0xe13   : > { %5724 = vmatpush3.msra.mxu0 %v2863_v7  ;;  %v8071_v7 = vld [vmem:[#allocation33_spill] sm:$0xff] }
 0xe14   : > { %5726 = vmatmul.mubr.msk.f32.vlgmr.msra.gmra.mxu0 %vm1632_vm12, %v7304_v23  ;;  %5728 = vmatprep.subr.msk.mxu0 %vm1632_vm12, %v7522_v61 }
 0xe15   : > { %5729 = vmatpush3.xpose.msk.msra.mxu0 %vm1632_vm12, %v7522_v61  ;;  %5732 = vmatprep.mubr.msk.f32.mxu0 %vm1632_vm12, %v7527_v62 }
 0xe16   : > { %5730 = vmatprep.subr.msk.mxu0 %vm1632_vm12, %v7527_v62 }
 0xe19   : > { %5731 = vmatpush3.xpose.msk.msra.mxu0 %vm1632_vm12, %v7527_v62 }
 0xe1a   : > { %5742 = vmatprep.subr.mxu0 %v7373_v33 }
 0xe1c   : > { %5733 = vmatmul.mubr.msk.f32.vlgmr.msra.gmra.mxu0 %vm1632_vm12, %v7522_v61 }
 0xe1d   : > { %5743 = vmatpush3.msra.mxu0 %v7373_v33  ;;  %v8064_v33 = vld [vmem:[#allocation42_spill] sm:$0xff] }
 0xe1e   : > { %5744 = vmatprep.subr.mxu0 %v7378_v13 }
 0xe1f   : > { %5745 = vmatpush3.msra.mxu0 %v7378_v13  ;;  %v8065_v13 = vld [vmem:[#allocation43_spill] sm:$0xff] }
 0xe20   : > { %5746 = vmatprep.subr.mxu0 %v7385_v26 }
 0xe21   : > { %5747 = vmatpush3.msra.mxu0 %v7385_v26  ;;  %v7640_v26 = vld [vmem:[%s7970_s13 + $0x78] sm:$0xff] }
 0xe22   : > { %5748 = vmatprep.subr.mxu0 %v7392_v27 }
 0xe23   : > { %5749 = vmatpush3.msra.mxu0 %v7392_v27 }
 0xe24   : > { %5750 = vmatprep.subr.mxu0 %v7399_v35 }
 0xe25   : > { %5751 = vmatpush3.msra.mxu0 %v7399_v35 }
 0xe26   : > { %5752 = vmatprep.subr.mxu0 %v7406_v40 }
 0xe27   : > { %5753 = vmatpush3.msra.mxu0 %v7406_v40 }
 0xe28   : > { %5754 = vmatprep.subr.mxu0 %v7413_v36 }
 0xe29   : > { %5755 = vmatpush3.msra.mxu0 %v7413_v36 }
 0xe2a   : > { %5756 = vmatprep.subr.mxu0 %v7420_v42 }
 0xe2b   : > { %5757 = vmatpush3.msra.mxu0 %v7420_v42 }
 0xe2c   : > { %5758 = vmatprep.subr.mxu0 %v7427_v46 }
 0xe2d   : > { %5759 = vmatpush3.msra.mxu0 %v7427_v46 }
 0xe2e   : > { %5760 = vmatprep.subr.mxu0 %v8063_v18 }
 0xe2f   : > { %5761 = vmatpush3.msra.mxu0 %v8063_v18 }
 0xe30   : > { %5762 = vmatprep.subr.mxu0 %v8064_v33 }
 0xe31   : > { %5763 = vmatpush3.msra.mxu0 %v8064_v33 }
 0xe32   : > { %5764 = vmatprep.subr.mxu0 %v8065_v13 }
 0xe33   : > { %5765 = vmatpush3.msra.mxu0 %v8065_v13 }
 0xe34   : > { %5822 = vmatprep.subr.mxu0 %v7640_v26 }
 0xecc   : > { %v5716_v27 = vpop.f32.mrf.mxu0 }
 0xece   : > { %v2963_v35 = vpop.f32.mrf.mxu0 }
 0xed4   : > { %v5727_v40 = vpop.f32.mrf.mxu0 }
 0xed5   : > { %v7643_v36 = vadd.f32 %v5727_v40, %v5716_v27 }
 0xed6   : > { %v3038_v42 = vpop.f32.mrf.mxu0 }
 0xed7   : > { %v3039_v46 = vadd.f32 %v3038_v42, %v2963_v35 }
 0xedc   : > { %v5734_v10 = vpop.f32.mrf.mxu0 }
 0xedd   : > { %v3127_v11 = vsel %vm1265_vm14, %v5734_v10, -1e+30  ;;  %v6195_v10 = vld [vmem:[%s7970_s13 + $0x70] sm:$0xff] }
 0xede   : > { %v3117_v2 = vpop.f32.mrf.mxu0  ;;  %v3131_v3 = vsel %vm1281_vm4, %v3127_v11, -inf }
 0xedf   : > { %v3126_v30 = vsel %vm1264_vm15, %v3117_v2, -1e+30  ;;  %3132 = vmax.xlane.f32.xlu1 %v3131_v3  ;;  %v6201_v2 = vld [vmem:[%s7970_s13 + $0x40] sm:$0xff]  ;;  %v6202_v3 = vld [vmem:[%s7970_s13 + $0x38] sm:$0xff] }
 0xee0   : > { %v3128_v31 = vsel %vm1281_vm4, %v3126_v30, -inf }
 0xee1   : > { %3129 = vmax.xlane.f32.xlu0 %v3128_v31  ;;  %v6204_v31 = vld [vmem:[%s7970_s13 + $0x28] sm:$0xff] }
 0xf68   : > { %v3133_v22 = vpop.xlane.xlu1 %3132 }
 0xf69   : > { %v3135_v32 = vsub.f32 %v3127_v11, %v3133_v22  ;;  %v6200_v11 = vld [vmem:[%s7970_s13 + $0x48] sm:$0xff]  ;;  %v6205_v22 = vld [vmem:[%s7970_s13 + $0x20] sm:$0xff] }
 0xf6a   : > { %v3130_v25 = vpop.xlane.xlu0 %3129 }
 0xf6b   : > { %v3134_v49 = vsub.f32 %v3126_v30, %v3130_v25  ;;  %v3138_v24 = vmul.f32 1.442695, %v3135_v32  ;;  %v6203_v30 = vld [vmem:[%s7970_s13 + $0x30] sm:$0xff]  ;;  %v6206_v32 = vld [vmem:[%s7970_s13 + $0x18] sm:$0xff] }
 0xf6c   : > { %v6207_v25 = vld [vmem:[%s7970_s13 + $0x10] sm:$0xff] }
 0xf6d   : > { %v3136_v28 = vmul.f32 1.442695, %v3134_v49  ;;  %v6208_v49 = vld [vmem:[%s7970_s13 + $0x8] sm:$0xff] }
 0xf6f   : > { %6146 = vpow2.f32 %v3136_v28 }
 0xf70   : > { %6148 = vpow2.f32 %v3138_v24  ;;  %v6209_v24 = vld [vmem:[%s7970_s13] sm:$0xff] }
 0xf7c   : > { %v6147_v48 = vpop.eup %6146 }
 0xf7d   : > { %v3140_v20 = vsel %vm1281_vm4, %v6147_v48, 0.0  ;;  %v6149_v47 = vpop.eup %6148 }
 0xf7e   : > { %3141 = vadd.xlane.f32.xlu0 %v3140_v20  ;;  %v3143_v29 = vsel %vm1281_vm4, %v6149_v47, 0.0 }
 0xf82   : > { %3144 = vadd.xlane.f32.xlu0 %v3143_v29 }
0x1007   : > { %v3142_v53 = vpop.xlane.xlu0 %3141 }
0x1008   : > { %6150 = vrcp.f32 %v3142_v53 }
0x100b   : > { %v3145_v55 = vpop.xlane.xlu0 %3144 }
0x100c   : > { %6152 = vrcp.f32 %v3145_v55 }
0x1015   : > { %v6151_v50 = vpop.eup %6150 }
0x1016   : > { %v3147_v58 = vmul.f32 %v6151_v50, %v6147_v48 }
0x1018   : > { %5739 = vmatprep.mubr.msk.f32.mxu1 %vm1281_vm4, %v3147_v58 }
0x1019   : > { %v6153_v59 = vpop.eup %6152 }
0x101a   : > { %v3149_v57 = vmul.f32 %v6153_v59, %v6149_v47 }
0x101c   : > { %5740 = vmatmul.mubr.msk.f32.vlgmr.msra.gmra.mxu1 %vm1281_vm4, %v3149_v57 }
0x101d   : > { %5770 = vmatpush3.msra.mxu1 %v7346_v38  ;;  %5777 = vmatprep.mubr.msk.f32.mxu1 %vm1632_vm12, %v7527_v62 }
0x101e   : > { %5771 = vmatprep.subr.mxu1 %v8068_v4 }
0x101f   : > { %5772 = vmatpush3.msra.mxu1 %v8068_v4 }
0x1020   : > { %5773 = vmatprep.subr.mxu1 %v8069_v5 }
0x1021   : > { %5774 = vmatpush3.msra.mxu1 %v8069_v5 }
0x1022   : > { %5775 = vmatprep.subr.mxu1 %v8070_v6 }
0x1023   : > { %5776 = vmatpush3.msra.mxu1 %v8070_v6 }
0x1024   : > { %5778 = vmatmul.mubr.msk.f32.vlgmr.msra.gmra.mxu1 %vm1632_vm12, %v7522_v61 }
0x1025   : > { %5784 = vmatprep.mubr.msk.f32.mxu1 %vm1281_vm4, %v8071_v7 }
0x10dc   : > { %v5741_v38 = vpop.f32.mrf.mxu1 }
0x10dd   : > { %3235 = vrot.lane.b32.xlu0 %v5741_v38, %s6659_s29 }
0x10de   : > { %v3222_v62 = vpop.f32.mrf.mxu1 }
0x10df   : > { %3233 = vrot.lane.b32.xlu1 %v3222_v62, %s6659_s29 }
0x10e4   : > { %v5779_v63 = vpop.f32.mrf.mxu1 }
0x10e5   : > { %v7671_v8 = vadd.f32 %v5779_v63, %v7459_v12 }
0x10e6   : > { %v3398_v33 = vpop.f32.mrf.mxu1 }
0x10e7   : > { %3425 = vrot.lane.b32.xlu0 %v7671_v8, %s6660_s7  ;;  %v3399_v13 = vadd.f32 %v7459_v12, %v3398_v33  ;;  %v6196_v12 = vld [vmem:[%s7970_s13 + $0x68] sm:$0xff] }
0x114f   : > { %v3236_v61 = vpop.permute.xlu0 %3235 }
0x1150   : > { %v3240_v18 = vsub.f32 %v7514_v37, %v3236_v61 }
0x1151   : > { %v3234_v0 = vpop.permute.xlu1 %3233 }
0x1152   : > { %v3239_v9 = vsub.f32 %v7518_v60, %v3234_v0 }
0x1154   : > { %3243 = vrot.lane.b32.xlu1 %v3239_v9, %s6659_s29 }
0x1158   : > { %3245 = vrot.lane.b32.xlu1 %v3240_v18, %s6659_s29 }
0x1159   : > { %v3426_v6 = vpop.permute.xlu0 %3425 }
0x115c   : > { %3423 = vrot.lane.b32.xlu1 %v3399_v13, %s6660_s7 }
0x11c6   : > { %v3244_v27 = vpop.permute.xlu1 %3243 }
0x11c7   : > { %v3249_v35 = vsel %vm1637_vm13, %v3039_v46, %v3244_v27  ;;  %v6199_v46 = vld [vmem:[%s7970_s13 + $0x50] sm:$0xff] }
0x11c8   : > { %5766 = vmatprep.mubr.msk.f32.mxu0 %vm2276_vm0, %v3249_v35 }
0x11ca   : > { %v3246_v40 = vpop.permute.xlu1 %3245 }
0x11cb   : > { %v3250_v42 = vsel %vm1637_vm13, %v7643_v36, %v3246_v40  ;;  %v6197_v36 = vld [vmem:[%s7970_s13 + $0x60] sm:$0xff] }
0x11cc   : > { %5767 = vmatmul.mubr.msk.f32.vlgmr.msra.gmra.mxu0 %vm2276_vm0, %v3250_v42 }
0x11cd   : > { %5823 = vmatpush3.msra.mxu0 %v7640_v26  ;;  %v6198_v26 = vld [vmem:[%s7970_s13 + $0x58] sm:$0xff] }
0x11ce   : > { %5824 = vmatprep.subr.mxu0 %v6195_v10  ;;  %v3424_v62 = vpop.permute.xlu1 %3423 }
0x11cf   : > { %5825 = vmatpush3.msra.mxu0 %v6195_v10 }
0x11d0   : > { %5826 = vmatprep.subr.mxu0 %v6196_v12 }
0x11d1   : > { %5827 = vmatpush3.msra.mxu0 %v6196_v12 }
0x11d2   : > { %5828 = vmatprep.subr.mxu0 %v6197_v36 }
0x11d3   : > { %5829 = vmatpush3.msra.mxu0 %v6197_v36 }
0x11d4   : > { %5830 = vmatprep.subr.mxu0 %v6198_v26 }
0x11d5   : > { %5831 = vmatpush3.msra.mxu0 %v6198_v26 }
0x11d6   : > { %5832 = vmatprep.subr.mxu0 %v6199_v46 }
0x11d7   : > { %5833 = vmatpush3.msra.mxu0 %v6199_v46 }
0x11d8   : > { %5834 = vmatprep.subr.mxu0 %v6200_v11 }
0x11d9   : > { %5835 = vmatpush3.msra.mxu0 %v6200_v11 }
0x11da   : > { %5836 = vmatprep.subr.mxu0 %v6201_v2 }
0x11db   : > { %5837 = vmatpush3.msra.mxu0 %v6201_v2 }
0x11dc   : > { %5838 = vmatprep.subr.mxu0 %v6202_v3 }
0x11dd   : > { %5839 = vmatpush3.msra.mxu0 %v6202_v3 }
0x11de   : > { %5840 = vmatprep.subr.mxu0 %v6203_v30 }
0x11df   : > { %5841 = vmatpush3.msra.mxu0 %v6203_v30 }
0x11e0   : > { %5842 = vmatprep.subr.mxu0 %v6204_v31 }
0x11e1   : > { %5843 = vmatpush3.msra.mxu0 %v6204_v31 }
0x11e2   : > { %5844 = vmatprep.subr.mxu0 %v6205_v22 }
0x11e3   : > { %5845 = vmatpush3.msra.mxu0 %v6205_v22 }
0x11e4   : > { %5846 = vmatprep.subr.mxu0 %v6206_v32 }
0x11e5   : > { %5847 = vmatpush3.msra.mxu0 %v6206_v32 }
0x11e6   : > { %5848 = vmatprep.subr.mxu0 %v6207_v25 }
0x11e7   : > { %5849 = vmatpush3.msra.mxu0 %v6207_v25 }
0x11e8   : > { %5850 = vmatprep.subr.mxu0 %v6208_v49 }
0x11e9   : > { %5851 = vmatpush3.msra.mxu0 %v6208_v49 }
0x11ea   : > { %5852 = vmatprep.subr.mxu0 %v6209_v24 }
0x11eb   : > { %5853 = vmatpush3.msra.mxu0 %v6209_v24 }
0x128c   : > { %v5768_v28 = vpop.f32.mrf.mxu0 }
0x128d   : > { %v3329_v48 = vadd.f32 %v5768_v28, %v7502_v43 }
0x128e   : > { %v3323_v20 = vpop.f32.mrf.mxu0 }
0x128f   : > { %v3408_v47 = vadd.f32 %v7671_v8, %v3329_v48  ;;  %v3324_v29 = vadd.f32 %v7502_v43, %v3323_v20 }
0x1291   : > { %v5123_v53 = vmul.f32 -1.442695, %v3408_v47  ;;  %v3407_v55 = vadd.f32 %v3399_v13, %v3324_v29 }
0x1293   : > { %6154 = vpow2.f32 %v5123_v53  ;;  %v5122_v50 = vmul.f32 -1.442695, %v3407_v55 }
0x1295   : > { %6156 = vpow2.f32 %v5122_v50 }
0x12a0   : > { %v6155_v58 = vpop.eup %6154 }
0x12a1   : > { %v3416_v59 = vadd.f32 1.0, %v6155_v58 }
0x12a2   : > { %v6157_v57 = vpop.eup %6156 }
0x12a3   : > { %6158 = vrcp.f32 %v3416_v59  ;;  %v3415_v4 = vadd.f32 1.0, %v6157_v57 }
0x12a5   : > { %6160 = vrcp.f32 %v3415_v4 }
0x12b0   : > { %v6159_v5 = vpop.eup %6158 }
0x12b1   : > { %v3430_v7 = vmul.f32 %v6159_v5, %v3426_v6  ;;  %v3444_v33 = vsub.f32 1.0, %v6159_v5  ;;  %v3456_v27 = vmul.f32 %v6159_v5, %v7514_v37 }
0x12b2   : > { %v6161_v38 = vpop.eup %6160 }
0x12b3   : > { %3435 = vrot.lane.b32.xlu0 %v3430_v7, %s6660_s7  ;;  %v3429_v63 = vmul.f32 %v6161_v38, %v3424_v62  ;;  %v3443_v40 = vsub.f32 1.0, %v6161_v38  ;;  %v3455_v12 = vmul.f32 %v6161_v38, %v7518_v60  ;;  %v6210_v60 = vld [vmem:[%s7967_s10 + $0x38] sm:$0xff] }
0x12b5   : > { %3433 = vrot.lane.b32.xlu1 %v3429_v63, %s6660_s7 }
0x1325   : > { %v3436_v43 = vpop.permute.xlu0 %3435 }
0x1326   : > { %v3440_v8 = vadd.f32 %v3436_v43, %v3329_v48 }
0x1327   : > { %v3434_v0 = vpop.permute.xlu1 %3433 }
0x1328   : > { %6162 = vtanh.f32 %v3440_v8  ;;  %v3439_v9 = vadd.f32 %v3434_v0, %v3324_v29 }
0x132a   : > { %6164 = vtanh.f32 %v3439_v9 }
0x1335   : > { %v6163_v61 = vpop.eup %6162 }
0x1336   : > { %3449 = vrot.lane.b32.xlu0 %v6163_v61, %s6661_s6 }
0x1337   : > { %v6165_v18 = vpop.eup %6164 }
0x1338   : > { %3447 = vrot.lane.b32.xlu1 %v6165_v18, %s6661_s6 }
0x13a8   : > { %v3450_v13 = vpop.permute.xlu0 %3449 }
0x13a9   : > { %v3454_v35 = vmul.f32 %v3450_v13, %v3444_v33 }
0x13aa   : > { %v3448_v42 = vpop.permute.xlu1 %3447 }
0x13ab   : > { %v7740_v10 = vadd.f32 %v3456_v27, %v3454_v35  ;;  %v3453_v36 = vmul.f32 %v3448_v42, %v3443_v40  ;;  %v6223_v35 = vld [vmem:[%s7972_s15 + $0x40] sm:$0xff]  ;;  %v6224_v40 = vld [vmem:[%s7972_s15 + $0x38] sm:$0xff]  ;;  %v6225_v42 = vld [vmem:[%s7972_s15 + $0x30] sm:$0xff] }
0x13ad   : > { %v7743_v26 = vadd.f32 %v3455_v12, %v3453_v36  ;;  %3463 = vrot.lane.b32.xlu0 %v7740_v10, %s6661_s6  ;;  %v6226_v12 = vld [vmem:[%s7972_s15 + $0x28] sm:$0xff]  ;;  %v6227_v36 = vld [vmem:[%s7972_s15 + $0x20] sm:$0xff] }
0x13af   : > { %3461 = vrot.lane.b32.xlu1 %v7743_v26, %s6661_s6 }
0x141f   : > { %v7749_v46 = vpop.permute.xlu0 %3463 }
0x1420   : > { %5780 = vmatprep.subr.mxu1 %v7749_v46  ;;  %5889 = vmatprep.subr.mxu0 %v7749_v46 }
0x1421   : > { %5781 = vmatpush3.msra.mxu1 %v7749_v46  ;;  %v7754_v37 = vpop.permute.xlu1 %3461 }
0x1422   : > { %5782 = vmatprep.subr.mxu1 %v7754_v37 }
0x1423   : > { %5783 = vmatpush3.msra.mxu1 %v7754_v37 }
0x1424   : > { %5785 = vmatmul.mubr.msk.f32.vlgmr.msra.gmra.mxu1 %vm1281_vm4, %v7067_v51  ;;  %5790 = vmatprep.subr.mxu1 %v7749_v46  ;;  %v6211_v51 = vld [vmem:[%s7967_s10 + $0x30] sm:$0xff] }
0x1425   : > { %5787 = vmatprep.mubr.msk.f32.mxu1 %vm1281_vm4, %v7084_v54  ;;  %5791 = vmatpush3.msra.mxu1 %v7749_v46  ;;  %v6216_v54 = vld [vmem:[%s7967_s10 + $0x8] sm:$0xff] }
0x1426   : > { %5792 = vmatprep.subr.mxu1 %v7754_v37 }
0x1427   : > { %5793 = vmatpush3.msra.mxu1 %v7754_v37 }
0x1428   : > { %5788 = vmatmul.mubr.msk.f32.gmra.mxu1 %vm1281_vm4, %v7098_v56  ;;  %5800 = vmatprep.subr.mxu1 %v6210_v60  ;;  %v6217_v56 = vld [vmem:[%s7967_s10] sm:$0xff] }
0x1429   : > { %5794 = vmatprep.mubr.msk.f32.mxu1 %vm1281_vm4, %v7013_v34  ;;  %v6212_v34 = vld [vmem:[%s7967_s10 + $0x28] sm:$0xff] }
0x142c   : > { %5795 = vmatmul.mubr.msk.f32.vlgmr.msra.gmra.mxu1 %vm1281_vm4, %v7037_v45  ;;  %v6214_v45 = vld [vmem:[%s7967_s10 + $0x18] sm:$0xff] }
0x142d   : > { %5797 = vmatprep.mubr.msk.f32.mxu1 %vm1281_vm4, %v7034_v44  ;;  %5801 = vmatpush3.msra.mxu1 %v6210_v60  ;;  %v6213_v44 = vld [vmem:[%s7967_s10 + $0x20] sm:$0xff]  ;;  %v6228_v60 = vld [vmem:[%s7972_s15 + $0x18] sm:$0xff] }
0x142e   : > { %5802 = vmatprep.subr.mxu1 %v6211_v51 }
0x142f   : > { %5803 = vmatpush3.msra.mxu1 %v6211_v51  ;;  %v6229_v51 = vld [vmem:[%s7972_s15 + $0x10] sm:$0xff] }
0x1430   : > { %5798 = vmatmul.mubr.msk.f32.gmra.mxu1 %vm1281_vm4, %v7072_v52  ;;  %5804 = vmatprep.subr.mxu1 %v6212_v34  ;;  %v6215_v52 = vld [vmem:[%s7967_s10 + $0x10] sm:$0xff] }
0x1431   : > { %5805 = vmatpush3.msra.mxu1 %v6212_v34  ;;  %v6230_v34 = vld [vmem:[%s7972_s15 + $0x8] sm:$0xff] }
0x1432   : > { %5806 = vmatprep.subr.mxu1 %v6213_v44 }
0x1433   : > { %5807 = vmatpush3.msra.mxu1 %v6213_v44  ;;  %v6231_v44 = vld [vmem:[%s7972_s15] sm:$0xff] }
0x1434   : > { %5808 = vmatprep.subr.mxu1 %v6214_v45 }
0x1435   : > { %5809 = vmatpush3.msra.mxu1 %v6214_v45 }
0x1436   : > { %5810 = vmatprep.subr.mxu1 %v6215_v52 }
0x1437   : > { %5811 = vmatpush3.msra.mxu1 %v6215_v52 }
0x1438   : > { %5812 = vmatprep.subr.mxu1 %v6216_v54 }
0x1439   : > { %5813 = vmatpush3.msra.mxu1 %v6216_v54 }
0x143a   : > { %5814 = vmatprep.subr.mxu1 %v6217_v56 }
0x143b   : > { %5815 = vmatpush3.msra.mxu1 %v6217_v56 }
0x14e4   : > { %v5786_v11 = vpop.f32.mrf.mxu1 }
0x14e6   : > { %v3533_v2 = vpop.f32.mrf.mxu1 }
0x14e8   : > { %v5789_v3 = vpop.f32.mrf.mxu1 }
0x14ea   : > { %v3543_v30 = vpop.f32.mrf.mxu1 }
0x14ec   : > { %v5796_v31 = vpop.f32.mrf.mxu1 }
0x14ed   : > { %3643 = vrot.lane.b32.xlu1 %v5796_v31, %s6659_s29 }
0x14ee   : > { %v3618_v22 = vpop.f32.mrf.mxu1 }
0x14ef   : > { %3641 = vrot.lane.b32.xlu0 %v3618_v22, %s6659_s29 }
0x14f0   : > { %v5799_v32 = vpop.f32.mrf.mxu1 }
0x14f1   : > { %3647 = vrot.lane.b32.xlu1 %v5799_v32, %s6659_s29 }
0x14f2   : > { %v3628_v25 = vpop.f32.mrf.mxu1 }
0x14f3   : > { %3645 = vrot.lane.b32.xlu0 %v3628_v25, %s6659_s29 }
0x155f   : > { %v3644_v49 = vpop.permute.xlu1 %3643 }
0x1560   : > { %v3654_v48 = vsel %vm1632_vm12, %v5786_v11, %v3644_v49 }
0x1561   : > { %v3642_v24 = vpop.permute.xlu0 %3641 }
0x1562   : > { %v3653_v28 = vsel %vm1632_vm12, %v3533_v2, %v3642_v24 }
0x1563   : > { %5816 = vmatprep.mubr.msk.f32.mxu1 %vm1637_vm13, %v3653_v28  ;;  %v3648_v20 = vpop.permute.xlu1 %3647 }
0x1564   : > { %5817 = vmatmul.mubr.msk.f32.vlgmr.msra.gmra.mxu1 %vm1637_vm13, %v3654_v48  ;;  %v3656_v53 = vsel %vm1632_vm12, %v5789_v3, %v3648_v20 }
0x1565   : > { %v3646_v47 = vpop.permute.xlu0 %3645 }
0x1566   : > { %v3655_v29 = vsel %vm1632_vm12, %v3543_v30, %v3646_v47 }
0x1567   : > { %5819 = vmatprep.mubr.msk.f32.mxu1 %vm1637_vm13, %v3655_v29 }
0x1568   : > { %5820 = vmatmul.mubr.msk.f32.gmra.mxu1 %vm1637_vm13, %v3656_v53 }
0x1569   : > { %5868 = vmatprep.mubr.msk.f32.mxu1 %vm1632_vm12, %v7290_v15 }
0x1624   : > { %v5818_v55 = vpop.f32.mrf.mxu1 }
0x1625   : > { %v3741_v50 = vadd.f32 %v5818_v55, %v7252_v39  ;;  %v7821_v39 = vld [vmem:[#allocation13 + $0x18] sm:$0xff] }
0x1626   : > { %v3735_v58 = vpop.f32.mrf.mxu1 }
0x1627   : > { %v3736_v59 = vadd.f32 %v3735_v58, %v7254_v41  ;;  %v3755_v5 = vmax.f32 %v3741_v50, 0.0 }
0x1628   : > { %v5821_v57 = vpop.f32.mrf.mxu1 }
0x1629   : > { %v3754_v4 = vmax.f32 %v3736_v59, 0.0  ;;  %v3751_v6 = vadd.f32 %v5821_v57, %v7258_v14 }
0x162a   : > { %v3745_v7 = vpop.f32.mrf.mxu1 }
0x162b   : > { %v3746_v38 = vadd.f32 %v3745_v7, %v7260_v17  ;;  %5854 = vmatprep.mubr.f32.mxu0 %v3754_v4  ;;  %v3757_v15 = vmax.f32 %v3751_v6, 0.0  ;;  %v6219_v17 = vld [vmem:[#allocation12] ss:$0 sm:$0xff]  ;;  %v6233_v6 = vld [vmem:[#allocation13 + $0x8] sm:$0xff]  ;;  %v6234_v7 = vld [vmem:[#allocation13] sm:$0xff] }
0x162c   : > { %5855 = vmatmul.mubr.f32.vlgmr.msra.gmra.mxu0 %v3755_v5  ;;  %v6232_v5 = vld [vmem:[#allocation13 + $0x10] sm:$0xff] }
0x162d   : > { %v3756_v62 = vmax.f32 %v3746_v38, 0.0  ;;  %5890 = vmatpush3.msra.mxu0 %v7749_v46 }
0x162e   : > { %5891 = vmatprep.subr.mxu0 %v7754_v37 }
0x162f   : > { %5892 = vmatpush3.msra.mxu0 %v7754_v37  ;;  %5857 = vmatprep.mubr.f32.mxu0 %v3756_v62 }
0x1630   : > { %5858 = vmatmul.mubr.f32.gmra.mxu0 %v3757_v15  ;;  %5923 = vmatprep.subr.mxu0 %v7821_v39 }
0x16ec   : > { %v5856_v41 = vpop.f32.mrf.mxu0 }
0x16ed   : > { %v3830_v9 = vadd.f32 %v6219_v17, %v5856_v41 }
0x16ee   : > { %v3824_v14 = vpop.f32.mrf.mxu0 }
0x16ef   : > { %v3825_v61 = vadd.f32 %v6219_v17, %v3824_v14 }
0x16f0   : > { %v5859_v63 = vpop.f32.mrf.mxu0 }
0x16f1   : > { %v3840_v43 = vadd.f32 %v6219_v17, %v5859_v63 }
0x16f2   : > { %v3834_v8 = vpop.f32.mrf.mxu0 }
0x16f3   : > { %v3835_v0 = vadd.f32 %v6219_v17, %v3834_v8  ;;  %3853 = vrot.lane.b32.xlu0 %v3840_v43, %s6660_s7 }
0x16f5   : > { %3851 = vrot.lane.b32.xlu1 %v3835_v0, %s6660_s7 }
0x16f7   : > { %3849 = vrot.lane.b32.xlu0 %v3830_v9, %s6660_s7 }
0x16f9   : > { %3847 = vrot.lane.b32.xlu1 %v3825_v61, %s6660_s7 }
0x1765   : > { %v3854_v18 = vpop.permute.xlu0 %3853 }
0x1766   : > { %5860 = vmatprep.subr.mxu1 %v3854_v18 }
0x1767   : > { %5861 = vmatpush3.msra.mxu1 %v3854_v18  ;;  %v3852_v33 = vpop.permute.xlu1 %3851 }
0x1768   : > { %5862 = vmatprep.subr.mxu1 %v3852_v33 }
0x1769   : > { %v3850_v13 = vpop.permute.xlu0 %3849  ;;  %5863 = vmatpush3.msra.mxu1 %v3852_v33  ;;  %v6236_v33 = vld [vmem:[#allocation15] ss:$0 sm:$0xff] }
0x176a   : > { %5864 = vmatprep.subr.mxu1 %v3850_v13 }
0x176b   : > { %5865 = vmatpush3.msra.mxu1 %v3850_v13  ;;  %v3848_v27 = vpop.permute.xlu1 %3847 }
0x176c   : > { %5866 = vmatprep.subr.mxu1 %v3848_v27 }
0x176d   : > { %5867 = vmatpush3.msra.mxu1 %v3848_v27 }
0x176e   : > { %5869 = vmatmul.mubr.msk.f32.vlgmr.msra.gmra.mxu1 %vm1632_vm12, %v7294_v16  ;;  %5871 = vmatprep.subr.mxu1 %v3840_v43  ;;  %v6220_v16 = vld [vmem:[%s7972_s15 + $0x58] sm:$0xff] }
0x176f   : > { %5872 = vmatpush3.msra.mxu1 %v3840_v43  ;;  %5879 = vmatprep.mubr.msk.f32.mxu1 %vm1632_vm12, %v7300_v21  ;;  %v6221_v21 = vld [vmem:[%s7972_s15 + $0x50] sm:$0xff] }
0x1770   : > { %5873 = vmatprep.subr.mxu1 %v3835_v0 }
0x1771   : > { %5874 = vmatpush3.msra.mxu1 %v3835_v0 }
0x1772   : > { %5875 = vmatprep.subr.mxu1 %v3830_v9 }
0x1773   : > { %5876 = vmatpush3.msra.mxu1 %v3830_v9 }
0x1774   : > { %5877 = vmatprep.subr.mxu1 %v3825_v61 }
0x1775   : > { %5878 = vmatpush3.msra.mxu1 %v3825_v61 }
0x1776   : > { %5880 = vmatmul.mubr.msk.f32.vlgmr.msra.gmra.mxu1 %vm1632_vm12, %v7304_v23  ;;  %5882 = vmatprep.subr.msk.mxu1 %vm1632_vm12, %v7749_v46  ;;  %v6222_v23 = vld [vmem:[%s7972_s15 + $0x48] sm:$0xff] }
0x1777   : > { %5883 = vmatpush3.xpose.msk.msra.mxu1 %vm1632_vm12, %v7749_v46  ;;  %5886 = vmatprep.mubr.msk.f32.mxu1 %vm1632_vm12, %v7754_v37 }
0x1778   : > { %5884 = vmatprep.subr.msk.mxu1 %vm1632_vm12, %v7754_v37 }
0x177b   : > { %5885 = vmatpush3.xpose.msk.msra.mxu1 %vm1632_vm12, %v7754_v37 }
0x177c   : > { %5896 = vmatprep.subr.mxu1 %v6220_v16 }
0x177e   : > { %5887 = vmatmul.mubr.msk.f32.vlgmr.msra.gmra.mxu1 %vm1632_vm12, %v7749_v46 }
0x177f   : > { %5897 = vmatpush3.msra.mxu1 %v6220_v16 }
0x1780   : > { %5898 = vmatprep.subr.mxu1 %v6221_v21 }
0x1781   : > { %5899 = vmatpush3.msra.mxu1 %v6221_v21 }
0x1782   : > { %5900 = vmatprep.subr.mxu1 %v6222_v23 }
0x1783   : > { %5901 = vmatpush3.msra.mxu1 %v6222_v23 }
0x1784   : > { %5902 = vmatprep.subr.mxu1 %v6223_v35 }
0x1785   : > { %5903 = vmatpush3.msra.mxu1 %v6223_v35 }
0x1786   : > { %5904 = vmatprep.subr.mxu1 %v6224_v40 }
0x1787   : > { %5905 = vmatpush3.msra.mxu1 %v6224_v40 }
0x1788   : > { %5906 = vmatprep.subr.mxu1 %v6225_v42 }
0x1789   : > { %5907 = vmatpush3.msra.mxu1 %v6225_v42 }
0x178a   : > { %5908 = vmatprep.subr.mxu1 %v6226_v12 }
0x178b   : > { %5909 = vmatpush3.msra.mxu1 %v6226_v12 }
0x178c   : > { %5910 = vmatprep.subr.mxu1 %v6227_v36 }
0x178d   : > { %5911 = vmatpush3.msra.mxu1 %v6227_v36 }
0x178e   : > { %5912 = vmatprep.subr.mxu1 %v6228_v60 }
0x178f   : > { %5913 = vmatpush3.msra.mxu1 %v6228_v60 }
0x1790   : > { %5914 = vmatprep.subr.mxu1 %v6229_v51 }
0x1791   : > { %5915 = vmatpush3.msra.mxu1 %v6229_v51 }
0x1792   : > { %5916 = vmatprep.subr.mxu1 %v6230_v34 }
0x1793   : > { %5917 = vmatpush3.msra.mxu1 %v6230_v34 }
0x1794   : > { %5918 = vmatprep.subr.mxu1 %v6231_v44 }
0x1795   : > { %5919 = vmatpush3.msra.mxu1 %v6231_v44 }
0x182e   : > { %v5870_v45 = vpop.f32.mrf.mxu1 }
0x1830   : > { %v3925_v52 = vpop.f32.mrf.mxu1 }
0x1836   : > { %v5881_v54 = vpop.f32.mrf.mxu1 }
0x1837   : > { %v7882_v56 = vadd.f32 %v5881_v54, %v5870_v45 }
0x1838   : > { %v4000_v11 = vpop.f32.mrf.mxu1 }
0x1839   : > { %v7884_v2 = vadd.f32 %v4000_v11, %v3925_v52 }
0x183e   : > { %v5888_v3 = vpop.f32.mrf.mxu1 }
0x183f   : > { %v4089_v30 = vsel %vm1265_vm14, %v5888_v3, -1e+30 }
0x1840   : > { %v4079_v31 = vpop.f32.mrf.mxu1  ;;  %v4093_v22 = vsel %vm1281_vm4, %v4089_v30, -inf }
0x1841   : > { %v4088_v32 = vsel %vm1264_vm15, %v4079_v31, -1e+30  ;;  %4094 = vmax.xlane.f32.xlu1 %v4093_v22  ;;  %v4423_v31 = vld [vmem:[#allocation18 + $0x10] sm:$0xff]  ;;  %v4422_v22 = vld [vmem:[#allocation18 + $0x8] sm:$0xff] }
0x1842   : > { %v4090_v25 = vsel %vm1281_vm4, %v4088_v32, -inf }
0x1843   : > { %4091 = vmax.xlane.f32.xlu0 %v4090_v25 }
0x18ca   : > { %v4095_v49 = vpop.xlane.xlu1 %4094 }
0x18cb   : > { %v4097_v24 = vsub.f32 %v4089_v30, %v4095_v49  ;;  %v4424_v30 = vld [vmem:[#allocation18 + $0x18] sm:$0xff]  ;;  %v4421_v49 = vld [vmem:[#allocation18] sm:$0xff] }
0x18cc   : > { %v4092_v28 = vpop.xlane.xlu0 %4091 }
0x18cd   : > { %v4096_v48 = vsub.f32 %v4088_v32, %v4092_v28  ;;  %v4100_v20 = vmul.f32 1.442695, %v4097_v24  ;;  %v8072_v24 = vmov 0.0  }
0x18cf   : > { %v4098_v47 = vmul.f32 1.442695, %v4096_v48 }
0x18d1   : > { %6166 = vpow2.f32 %v4098_v47 }
0x18d2   : > { %6168 = vpow2.f32 %v4100_v20 }
0x18de   : > { %v6167_v1 = vpop.eup %6166 }
0x18df   : > { %v4102_v29 = vsel %vm1281_vm4, %v6167_v1, 0.0  ;;  %v6169_v53 = vpop.eup %6168 }
0x18e0   : > { %4103 = vadd.xlane.f32.xlu0 %v4102_v29  ;;  %v4105_v19 = vsel %vm1281_vm4, %v6169_v53, 0.0 }
0x18e4   : > { %4106 = vadd.xlane.f32.xlu0 %v4105_v19 }
0x1969   : > { %v4104_v55 = vpop.xlane.xlu0 %4103 }
0x196a   : > { %6170 = vrcp.f32 %v4104_v55 }
0x196d   : > { %v4107_v50 = vpop.xlane.xlu0 %4106 }
0x196e   : > { %6172 = vrcp.f32 %v4107_v50 }
0x1977   : > { %v6171_v58 = vpop.eup %6170 }
0x1978   : > { %v4109_v59 = vmul.f32 %v6171_v58, %v6167_v1 }
0x197a   : > { %5893 = vmatprep.mubr.msk.f32.mxu0 %vm1281_vm4, %v4109_v59 }
0x197b   : > { %v6173_v57 = vpop.eup %6172 }
0x197c   : > { %v4111_v4 = vmul.f32 %v6173_v57, %v6169_v53  ;;  %v5152_v57 = vld [vmem:[#allocation19] ss:$0 sm:$0xff] }
0x197e   : > { %5894 = vmatmul.mubr.msk.f32.vlgmr.msra.gmra.mxu0 %vm1281_vm4, %v4111_v4 }
0x197f   : > { %5924 = vmatpush3.msra.mxu0 %v7821_v39  ;;  %5931 = vmatprep.mubr.msk.f32.mxu0 %vm1632_vm12, %v7754_v37  ;;  %v6235_v39 = vld [vmem:[#allocation16] ss:$0 sm:$0xff] }
0x1980   : > { %5925 = vmatprep.subr.mxu0 %v6232_v5 }
0x1981   : > { %5926 = vmatpush3.msra.mxu0 %v6232_v5 }
0x1982   : > { %5927 = vmatprep.subr.mxu0 %v6233_v6 }
0x1983   : > { %5928 = vmatpush3.msra.mxu0 %v6233_v6 }
0x1984   : > { %5929 = vmatprep.subr.mxu0 %v6234_v7 }
0x1985   : > { %5930 = vmatpush3.msra.mxu0 %v6234_v7 }
0x1986   : > { %5932 = vmatmul.mubr.msk.f32.vlgmr.msra.gmra.mxu0 %vm1632_vm12, %v7749_v46  ;;  %5934 = vmatprep.subr.mxu0 %v4424_v30 }
0x1987   : > { %5935 = vmatpush3.msra.mxu0 %v4424_v30 }
0x1988   : > { %5936 = vmatprep.subr.mxu0 %v4423_v31 }
0x1989   : > { %5937 = vmatpush3.msra.mxu0 %v4423_v31 }
0x198a   : > { %5938 = vmatprep.subr.mxu0 %v4422_v22 }
0x198b   : > { %5939 = vmatpush3.msra.mxu0 %v4422_v22 }
0x198c   : > { %5940 = vmatprep.subr.mxu0 %v4421_v49 }
0x198d   : > { %5941 = vmatpush3.msra.mxu0 %v4421_v49 }
0x198e   : > { %5945 = vmatprep.subr.mxu0 %v8072_v24 }
0x1a3e   : > { %v5895_v38 = vpop.f32.mrf.mxu0 }
0x1a3f   : > { %4197 = vrot.lane.b32.xlu0 %v5895_v38, %s6659_s29 }
0x1a40   : > { %v4184_v62 = vpop.f32.mrf.mxu0 }
0x1a41   : > { %4195 = vrot.lane.b32.xlu1 %v4184_v62, %s6659_s29 }
0x1a46   : > { %v5933_v15 = vpop.f32.mrf.mxu0 }
0x1a47   : > { %v4366_v43 = vadd.f32 %v6235_v39, %v5933_v15 }
0x1a48   : > { %v4360_v37 = vpop.f32.mrf.mxu0 }
0x1a49   : > { %v4361_v41 = vadd.f32 %v6235_v39, %v4360_v37 }
0x1a4b   : > { %4385 = vrot.lane.b32.xlu0 %v4361_v41, %s6660_s7 }
0x1ab1   : > { %v4198_v17 = vpop.permute.xlu0 %4197 }
0x1ab2   : > { %v4202_v46 = vsub.f32 %v7740_v10, %v4198_v17 }
0x1ab3   : > { %v4196_v14 = vpop.permute.xlu1 %4195 }
0x1ab4   : > { %v4201_v63 = vsub.f32 %v7743_v26, %v4196_v14 }
0x1ab6   : > { %4205 = vrot.lane.b32.xlu1 %v4201_v63, %s6659_s29 }
0x1aba   : > { %4207 = vrot.lane.b32.xlu1 %v4202_v46, %s6659_s29 }
0x1abd   : > { %v4386_v52 = vpop.permute.xlu0 %4385 }
0x1abe   : > { %4387 = vrot.lane.b32.xlu1 %v4366_v43, %s6660_s7 }
0x1b28   : > { %v4206_v8 = vpop.permute.xlu1 %4205 }
0x1b29   : > { %v4211_v0 = vsel %vm1637_vm13, %v7884_v2, %v4206_v8  ;;  %v8074_v8 = vld [vmem:[#allocation32_spill] sm:$0xff] }
0x1b2a   : > { %5920 = vmatprep.mubr.msk.f32.mxu1 %vm2276_vm0, %v4211_v0 }
0x1b2c   : > { %v4208_v9 = vpop.permute.xlu1 %4207 }
0x1b2d   : > { %v4212_v61 = vsel %vm1637_vm13, %v7882_v56, %v4208_v9  ;;  %v8075_v9 = vld [vmem:[#allocation34_spill] sm:$0xff] }
0x1b2e   : > { %5921 = vmatmul.mubr.msk.f32.vlgmr.msra.gmra.mxu1 %vm2276_vm0, %v4212_v61  ;;  %vm1267_vm3 = vcmp.eq.s32.totalorder %v8074_v8, %v8075_v9 }
0x1b2f   : > { %v5059_v61 = vsel %vm1267_vm3, 1.0, %v8072_v24 }
0x1b30   : > { %v4388_v34 = vpop.permute.xlu1 %4387 }
0x1bee   : > { %v5922_v18 = vpop.f32.mrf.mxu1 }
0x1bef   : > { %v4291_v13 = vadd.f32 %v6236_v33, %v5922_v18 }
0x1bf0   : > { %v4285_v27 = vpop.f32.mrf.mxu1 }
0x1bf1   : > { %v4370_v16 = vadd.f32 %v4366_v43, %v4291_v13  ;;  %v4286_v21 = vadd.f32 %v6236_v33, %v4285_v27  ;;  %v8073_v43 = vld [vmem:[#allocation35_spill] sm:$0xff] }
0x1bf2   : > { %vm1266_vm2 = vcmp.eq.s32.totalorder %v8074_v8, %v8073_v43 }
0x1bf3   : > { %v5151_v23 = vmul.f32 -1.442695, %v4370_v16  ;;  %v4369_v35 = vadd.f32 %v4361_v41, %v4286_v21  ;;  %v5058_v0 = vsel %vm1266_vm2, 1.0, %v8072_v24  ;;  %v4654_v16 = vld [vmem:[#allocation21 + $0x10] sm:$0xff] }
0x1bf5   : > { %6174 = vpow2.f32 %v5151_v23  ;;  %v5150_v40 = vmul.f32 -1.442695, %v4369_v35  ;;  %v4652_v23 = vld [vmem:[#allocation21] sm:$0xff] }
0x1bf7   : > { %6176 = vpow2.f32 %v5150_v40 }
0x1c02   : > { %v6175_v42 = vpop.eup %6174 }
0x1c03   : > { %v4378_v12 = vadd.f32 1.0, %v6175_v42  ;;  %v8076_v42 = vlaneseq }
0x1c04   : > { %v6177_v36 = vpop.eup %6176 }
0x1c05   : > { %6178 = vrcp.f32 %v4378_v12  ;;  %v4377_v60 = vadd.f32 1.0, %v6177_v36  ;;  %v4737_v12 = vshrl.u32 %v8076_v42, 7 }
0x1c07   : > { %6180 = vrcp.f32 %v4377_v60  ;;  %vm4741_vm5 = vcmp.eq.s32.totalorder %v4737_v12, 1 }
0x1c08   : > { %v5161_v60 = vsel %vm4741_vm5, 1.0, %v8072_v24 }
0x1c12   : > { %v6179_v51 = vpop.eup %6178 }
0x1c13   : > { %v4392_v44 = vmul.f32 %v6179_v51, %v4388_v34  ;;  %v4406_v28 = vsub.f32 1.0, %v6179_v51  ;;  %v4418_v20 = vmul.f32 %v6179_v51, %v7740_v10  ;;  %v5158_v51 = vld [vmem:[#allocation22] ss:$0 sm:$0xff] }
0x1c14   : > { %v6181_v45 = vpop.eup %6180 }
0x1c15   : > { %4397 = vrot.lane.b32.xlu1 %v4392_v44, %s6660_s7  ;;  %v4391_v54 = vmul.f32 %v6181_v45, %v4386_v52  ;;  %v4405_v1 = vsub.f32 1.0, %v6181_v45  ;;  %v4417_v19 = vmul.f32 %v6181_v45, %v7743_v26 }
0x1c17   : > { %4395 = vrot.lane.b32.xlu0 %v4391_v54, %s6660_s7 }
0x1c87   : > { %v4398_v56 = vpop.permute.xlu1 %4397 }
0x1c88   : > { %v4402_v11 = vadd.f32 %v4398_v56, %v4291_v13  ;;  %v4655_v13 = vld [vmem:[#allocation21 + $0x18] sm:$0xff] }
0x1c89   : > { %v4396_v2 = vpop.permute.xlu0 %4395 }
0x1c8a   : > { %6182 = vtanh.f32 %v4402_v11  ;;  %v4401_v3 = vadd.f32 %v4396_v2, %v4286_v21  ;;  %v4653_v21 = vld [vmem:[#allocation21 + $0x8] sm:$0xff] }
0x1c8c   : > { %6184 = vtanh.f32 %v4401_v3 }
0x1c97   : > { %v6183_v32 = vpop.eup %6182 }
0x1c98   : > { %4411 = vrot.lane.b32.xlu1 %v6183_v32, %s6661_s6 }
0x1c99   : > { %v6185_v25 = vpop.eup %6184 }
0x1c9a   : > { %4409 = vrot.lane.b32.xlu0 %v6185_v25, %s6661_s6 }
0x1d0a   : > { %v4412_v48 = vpop.permute.xlu1 %4411 }
0x1d0b   : > { %v4416_v47 = vmul.f32 %v4412_v48, %v4406_v28 }
0x1d0c   : > { %v4410_v29 = vpop.permute.xlu0 %4409 }
0x1d0d   : > { %v4420_v53 = vadd.f32 %v4418_v20, %v4416_v47  ;;  %v4415_v55 = vmul.f32 %v4410_v29, %v4405_v1 }
0x1d0f   : > { %v4419_v50 = vadd.f32 %v4417_v19, %v4415_v55  ;;  %4436 = vrot.lane.b32.xlu1 %v4420_v53, %s6661_s6 }
0x1d11   : > { %4434 = vrot.lane.b32.xlu0 %v4419_v50, %s6661_s6 }
0x1d81   : > { %v4437_v59 = vpop.permute.xlu1 %4436 }
0x1d83   : > { %v4435_v58 = vpop.permute.xlu0 %4434 }
0x1d84   : > { %5942 = vmatprep.mubr.msk.f32.mxu0 %vm1632_vm12, %v4435_v58 }
0x1d85   : > { %5943 = vmatmul.mubr.msk.f32.vlgmr.msra.gmra.mxu0 %vm1632_vm12, %v4437_v59 }
0x1d86   : > { %5949 = vmatprep.mubr.msk.f32.mxu0 %vm6662_vm1, %v8072_v24 }
0x1e45   : > { %v5944_v10 = vpop.f32.mrf.mxu0 }
0x1e46   : > { %v4514_v4 = vadd.f32 %v5944_v10, %v5152_v57 }
0x1e47   : > { %v4508_v5 = vpop.f32.mrf.mxu0 }
0x1e48   : > { %v5156_v6 = vmul.f32 -1.442695, %v4514_v4  ;;  %v4509_v7 = vadd.f32 %v5152_v57, %v4508_v5 }
0x1e4a   : > { %6186 = vpow2.f32 %v5156_v6  ;;  %v5155_v26 = vmul.f32 -1.442695, %v4509_v7 }
0x1e4c   : > { %6188 = vpow2.f32 %v5155_v26 }
0x1e57   : > { %v6187_v38 = vpop.eup %6186 }
0x1e58   : > { %v4524_v62 = vadd.f32 1.0, %v6187_v38 }
0x1e59   : > { %v6189_v15 = vpop.eup %6188 }
0x1e5a   : > { %6190 = vrcp.f32 %v4524_v62  ;;  %v4523_v37 = vadd.f32 1.0, %v6189_v15 }
0x1e5c   : > { %6192 = vrcp.f32 %v4523_v37 }
0x1e67   : > { %v6191_v39 = vpop.eup %6190 }
0x1e68   : > { %4533 = vrot.lane.b32.xlu0 %v6191_v39, %s6659_s29 }
0x1e69   : > { %v6193_v41 = vpop.eup %6192 }
0x1e6a   : > { %4531 = vrot.lane.b32.xlu1 %v6193_v41, %s6659_s29 }
0x1eda   : > { %v4534_v14 = vpop.permute.xlu0 %4533 }
0x1edb   : > { %v4538_v63 = vmul.f32 %v4534_v14, %v4514_v4 }
0x1edc   : > { %v4532_v17 = vpop.permute.xlu1 %4531 }
0x1edd   : > { %v4537_v46 = vmul.f32 %v4532_v17, %v4509_v7  ;;  %4575 = vrot.lane.b32.xlu0 %v4538_v63, %s6661_s6 }
0x1edf   : > { %4573 = vrot.lane.b32.xlu1 %v4537_v46, %s6661_s6  ;;  %s984_s6 = scalar_lea.vmem %s7980_s23, %s8078_s25 }
0x1efb   : > { %4539 = vxpose.xlu0.b32.start [1/2] (short) (narrow) %v5058_v0, 8 }
0x1eff   : > { %4540 = vxpose.xlu0.b32.end [2/2] (short) (narrow) %v5059_v61, 8 }
0x1f4f   : > { %v4576_v18 = vpop.permute.xlu0 %4575 }
0x1f50   : > { %5946 = vmatpush3.msra.mxu0 %v4576_v18 }
0x1f51   : > { %5947 = vmatprep.subr.mxu0 %v8072_v24  ;;  %v4574_v33 = vpop.permute.xlu1 %4573 }
0x1f52   : > { %5948 = vmatpush3.msra.mxu0 %v4574_v33 }
0x1f53   : > { %5952 = vmatprep.subr.mxu0 %v8072_v24 }
0x1f77   : > { %v4555_v27 = vpop.trf.xlu0 }
0x1f78   : > { %5950 = vmatmul.mubr.msk.f32.vlgmr.msra.gmra.mxu0 %vm1281_vm4, %v4555_v27  ;;  %vm4738_vm4 = vcmp.eq.s32.totalorder %v4737_v12, 0 }
0x1f79   : > { %5953 = vmatpush3.msra.mxu0 %v4655_v13  ;;  %5960 = vmatprep.mubr.msk.f32.mxu0 %vm6662_vm1, %v8072_v24  ;;  %v5160_v36 = vsel %vm4738_vm4, 1.0, %v8072_v24 }
0x1f7a   : > { %5954 = vmatprep.subr.mxu0 %v8072_v24  ;;  %v4744_v34 = vsub.f32 %v5160_v36, %v5161_v60 }
0x1f7b   : > { %5955 = vmatpush3.msra.mxu0 %v4654_v16 }
0x1f7c   : > { %5956 = vmatprep.subr.mxu0 %v8072_v24 }
0x1f7d   : > { %5957 = vmatpush3.msra.mxu0 %v4653_v21 }
0x1f7e   : > { %5958 = vmatprep.subr.mxu0 %v8072_v24 }
0x1f7f   : > { %5959 = vmatpush3.msra.mxu0 %v4652_v23 }
0x2038   : > { %v4648_v35 = vpop.f32.mrf.mxu0 }
0x2039   : > { %5961 = vmatmul.mubr.msk.f32.vlgmr.msra.gmra.mxu0 %vm1632_vm12, %v4648_v35 }
0x203a   : > { %v5951_v40 = vpop.f32.mrf.mxu0 }
0x20f9   : > { %v4732_v44 = vpop.f32.mrf.mxu0 }
0x20fa   : > { %v4733_v45 = vadd.f32 %v5158_v51, %v4732_v44 }
0x20fb   : > { %v5962_v52 = vpop.f32.mrf.mxu0 }
0x20fc   : > { %v4745_v54 = vmul.f32 %v4744_v34, %v4733_v45 }
0x20fe   : > { %v4747_v56 = vsel %vm4746_vm6, %v4745_v54, 0.0 }
0x20ff   : > { %v4748_v11 = vrot.slane %v4747_v56, 4 }
0x2101   : > { %v4749_v2 = vadd.f32 %v4748_v11, %v4747_v56 }
0x2103   : > { %v4750_v3 = vrot.slane %v4749_v2, 2 }
0x2105   : > { %v4751_v30 = vadd.f32 %v4750_v3, %v4749_v2 }
0x2107   : > { %v4752_v31 = vrot.slane %v4751_v30, 1 }
0x2109   : > { %v4753_v22 = vadd.f32 %v4752_v31, %v4751_v30 }
0x210b   : > { %v4754_v32 = vmax.f32 %v4753_v22, 0.0 }
0x210d   : > { %4756 = vst.msk [vmem:[%s984_s6] sm:$0x1] %vm4755_vm7, %v4754_v32 }
0x210e PF: > { %s41_s4 = sadd.s32 1, %s6639_s4  }
0x210f   : > { %p38_p8 = scmp.ge.s32.totalorder %s41_s4, 4  }
0x2111   :  { %40 = sbr.rel (!%p38_p8) target bundleno = 18 (0x12), region = 214 }
0x2116   :  { %4774 = vsyncpa [#allocation3], 1 }
0x2117   :  { %4776 = vsyncpa [#allocation3 + $0x1], 1 }
0x2118   :  { %4777 = vsyncpa [#allocation5], 1 }
0x2119   :  { %4778 = vsyncpa [#allocation8], 1 }
0x211a   :  { %4779 = vsyncpa [#allocation11], 1 }
0x211b   :  { %4780 = vsyncpa [#allocation14], 1 }
0x211c   :  { %4781 = vsyncpa [#allocation17], 1 }
0x211d   :  { %4782 = vsyncpa [#allocation20], 1 }
0x211e   :  { %4783 = vsyncpa [#allocation23], 1 }

</bundles_post_ra>
